<compile_context>
chip_gen: v5e
topology: v5e:2x2
jax: 0.10.0
libtpu: 0.0.40
codegen_flags: <defaults>
</compile_context>

<pallas_src>
import functools

import jax
import jax.numpy as jnp
from jax.experimental import pallas as pl
from jax.experimental.pallas import tpu as pltpu


def _round_up(v: int, m: int) -> int:
    return ((v + m - 1) // m) * m


def _pad128(w: int) -> int:
    return _round_up(max(int(w), 1), 128)


def _posenc_kernel(x_ref, o_ref, *, num_frequencies: int, d: int, fold: int):
    """One (tile_rows, fold*2*F*d) output tile, single lane-dense store.

    x_ref: (tile_rows, fold*d)        -- `fold` original rows per kernel row
    o_ref: (tile_rows, fold*2*F*d)
    """
    F = num_frequencies
    x = x_ref[...].astype(jnp.float32)                      # (T, fold*d)

    # Half-width argument, frequency-major layout:
    #   arg[:, i*fold*d + j*d + dd] = (2**i) * x[:, j*d + dd]
    # One wide (T, fold*d) multiply per frequency; 2**i is an exact power of
    # two so every argument is bit-identical to the reference.  The F-way
    # concat is a cheap lane concat of wide slabs.
    arg = jnp.concatenate([x * float(2.0 ** i) for i in range(F)], axis=-1)

    # Exactly ONE transcendental evaluation per output element (was two).
    s = jnp.sin(arg)                                        # (T, F*fold*d)
    c = jnp.cos(arg)                                        # (T, F*fold*d)

    # Interleave the D-blocks into the torch.cat output layout (XLU lane
    # concat, not VALU).  Per folded sub-row j the output lanes are
    #   [sin(2^0 x_j), cos(2^0 x_j), sin(2^1 x_j), cos(2^1 x_j), ...]
    blk = fold * d
    pieces = []
    for j in range(fold):
        for i in range(F):
            lo = i * blk + j * d
            pieces.append(s[:, lo:lo + d])
            pieces.append(c[:, lo:lo + d])
    out = jnp.concatenate(pieces, axis=-1)                  # (T, fold*2*F*d)

    o_ref[...] = out.astype(o_ref.dtype)                    # single full-tile store


def _choose_fold(n_rows: int, d: int, F: int, *,
                 max_fold: int = 64, max_pieces: int = 384) -> int:
    """Pick how many original rows to fold into one kernel row.

    Prefers a fold whose output row width (fold*2*F*d) is a multiple of 128
    lanes (unmasked stores, fully dense trig), then the best lane utilization,
    while keeping the in-kernel interleave piece count bounded.  Must divide
    n_rows so the wrapper reshapes stay free; fold=1 is the safe fallback.
    """
    out_row = 2 * F * d
    best, best_key = 1, None
    for r in range(1, max_fold + 1):
        if n_rows % r != 0 or 2 * F * r > max_pieces:
            continue
        w = r * out_row
        key = (w % 128 == 0, w / _pad128(w), r)
        if best_key is None or key > best_key:
            best, best_key = r, key
    return best


def _choose_rows(n2: int, in_w: int, half_w: int, out_w: int,
                 in_itemsize: int, out_itemsize: int,
                 vmem_budget_bytes: int) -> int:
    """Row-tile size from PADDED widths, double buffering and temporaries."""
    per_row = (
        2 * _pad128(in_w) * in_itemsize          # input tile, double buffered
        + 2 * _pad128(out_w) * out_itemsize      # output tile, double buffered
        + _pad128(in_w) * 4                      # x (f32)
        + 3 * _pad128(half_w) * 4                # arg, sin, cos (f32)
        + 2 * _pad128(out_w) * 4                 # assembled tile + concat temp
    )
    rows = vmem_budget_bytes // max(per_row, 1)
    rows = max(8, (min(rows, 1024) // 8) * 8)
    # >=2 grid steps only when there is enough work to share across the two
    # v7x TensorCores; do not split tiny inputs (v5e/v6e single-core).
    if n2 >= 16:
        rows = min(rows, _round_up((n2 + 1) // 2, 8))
    rows = min(rows, _round_up(n2, 8))
    return max(rows, 8)


def positional_encoding(x: jax.Array, num_frequencies: int = 10, *,
                        out_dtype=None) -> jax.Array:
    """Pallas wrapper: folds rows for lane density, tiles over row blocks.

    x: [..., D] float array.  Output: [..., 2 * num_frequencies * D].
    out_dtype: optional output dtype (e.g. jnp.bfloat16, recommended on v5e to
               halve the dominant HBM store traffic); default keeps x.dtype,
               which keeps numerics identical to the reference.
    """
    *batch, d = x.shape
    F = int(num_frequencies)
    out_row = 2 * F * d
    out_dtype = x.dtype if out_dtype is None else jnp.dtype(out_dtype)

    n = 1
    for b in batch:
        n *= int(b)

    fold = _choose_fold(n, d, F)
    n2 = n // fold
    in_w = fold * d
    half_w = F * fold * d
    out_w = fold * out_row

    x3 = x.reshape(n2, in_w)                    # free row-major fold

    tile_rows = _choose_rows(n2, in_w, half_w, out_w,
                             x3.dtype.itemsize, out_dtype.itemsize,
                             vmem_budget_bytes=20 * 1024 * 1024)
    grid = ((n2 + tile_rows - 1) // tile_rows,)  # ragged last block is masked

    kernel = functools.partial(_posenc_kernel, num_frequencies=F, d=d,
                               fold=fold)

    out = pl.pallas_call(
        kernel,
        out_shape=jax.ShapeDtypeStruct((n2, out_w), out_dtype),
        grid_spec=pltpu.PrefetchScalarGridSpec(
            num_scalar_prefetch=0,
            grid=grid,
            in_specs=[pl.BlockSpec((tile_rows, in_w), lambda i: (i, 0))],
            out_specs=pl.BlockSpec((tile_rows, out_w), lambda i: (i, 0)),
        ),
        compiler_params=pltpu.CompilerParams(
            dimension_semantics=("parallel",),
            vmem_limit_bytes=48 * 1024 * 1024,
        ),
    )(x3)
    return out.reshape(*batch, out_row)


def _reference(x: jnp.ndarray, num_frequencies: int) -> jnp.ndarray:
    outs = []
    for i in range(num_frequencies):
        outs.append(jnp.sin(2.0 ** i * x))
        outs.append(jnp.cos(2.0 ** i * x))
    return jnp.concatenate(outs, axis=-1)


if __name__ == "__main__":
    key = jax.random.PRNGKey(0)
    num_frequencies = 10
    # Small NeRF-like input: 256 sample points, 4 coordinate channels.
    x = jax.random.uniform(key, (256, 4), dtype=jnp.float32,
                           minval=-1.0, maxval=1.0)

    out = positional_encoding(x, num_frequencies=num_frequencies)
    out = jax.block_until_ready(out)

    ref = _reference(x, num_frequencies)
    assert out.shape == (256, 2 * num_frequencies * 4), out.shape
    assert jnp.allclose(out, ref, atol=1e-5, rtol=1e-5), "mismatch vs reference"

    print("KERNEL_OK")
</pallas_src>

<mosaic_0001>
module attributes {stable_mosaic.version = 11 : i64} {
  func.func @_posenc_kernel(%arg0: i32, %arg1: memref<8x64xf32, #tpu.memory_space<vmem>>, %arg2: memref<8x1280xf32, #tpu.memory_space<vmem>>) attributes {dimension_semantics = [#tpu.dimension_semantics<parallel>], iteration_bounds = array<i64: 2>, scalar_prefetch = 0 : i64, scratch_operands = 0 : i64, tpu.core_type = #tpu.core_type<tc>, window_params = [{transform_indices = @transform_0, window_bounds = array<i64: 8, 64>}, {transform_indices = @transform_1, window_bounds = array<i64: 8, 1280>}]} {
    %c0 = arith.constant 0 : index
    %c0_0 = arith.constant 0 : index
    %0 = vector.load %arg1[%c0, %c0_0] : memref<8x64xf32, #tpu.memory_space<vmem>>, vector<8x64xf32>
    %cst = arith.constant 1.000000e+00 : f32
    %1 = vector.broadcast %cst : f32 to vector<8x64xf32>
    %2 = arith.mulf %0, %1 : vector<8x64xf32>
    %cst_1 = arith.constant 2.000000e+00 : f32
    %3 = vector.broadcast %cst_1 : f32 to vector<8x64xf32>
    %4 = arith.mulf %0, %3 : vector<8x64xf32>
    %cst_2 = arith.constant 4.000000e+00 : f32
    %5 = vector.broadcast %cst_2 : f32 to vector<8x64xf32>
    %6 = arith.mulf %0, %5 : vector<8x64xf32>
    %cst_3 = arith.constant 8.000000e+00 : f32
    %7 = vector.broadcast %cst_3 : f32 to vector<8x64xf32>
    %8 = arith.mulf %0, %7 : vector<8x64xf32>
    %cst_4 = arith.constant 1.600000e+01 : f32
    %9 = vector.broadcast %cst_4 : f32 to vector<8x64xf32>
    %10 = arith.mulf %0, %9 : vector<8x64xf32>
    %cst_5 = arith.constant 3.200000e+01 : f32
    %11 = vector.broadcast %cst_5 : f32 to vector<8x64xf32>
    %12 = arith.mulf %0, %11 : vector<8x64xf32>
    %cst_6 = arith.constant 6.400000e+01 : f32
    %13 = vector.broadcast %cst_6 : f32 to vector<8x64xf32>
    %14 = arith.mulf %0, %13 : vector<8x64xf32>
    %cst_7 = arith.constant 1.280000e+02 : f32
    %15 = vector.broadcast %cst_7 : f32 to vector<8x64xf32>
    %16 = arith.mulf %0, %15 : vector<8x64xf32>
    %cst_8 = arith.constant 2.560000e+02 : f32
    %17 = vector.broadcast %cst_8 : f32 to vector<8x64xf32>
    %18 = arith.mulf %0, %17 : vector<8x64xf32>
    %cst_9 = arith.constant 5.120000e+02 : f32
    %19 = vector.broadcast %cst_9 : f32 to vector<8x64xf32>
    %20 = arith.mulf %0, %19 : vector<8x64xf32>
    %21 = tpu.concatenate %2, %4, %6, %8, %10, %12, %14, %16, %18, %20 in 1 : vector<8x64xf32>, vector<8x64xf32>, vector<8x64xf32>, vector<8x64xf32>, vector<8x64xf32>, vector<8x64xf32>, vector<8x64xf32>, vector<8x64xf32>, vector<8x64xf32>, vector<8x64xf32> -> vector<8x640xf32>
    %22 = math.sin %21 : vector<8x640xf32>
    %23 = math.cos %21 : vector<8x640xf32>
    %24 = vector.extract_strided_slice %22 {offsets = [0, 0], sizes = [8, 4], strides = [1, 1]} : vector<8x640xf32> to vector<8x4xf32>
    %25 = vector.extract_strided_slice %23 {offsets = [0, 0], sizes = [8, 4], strides = [1, 1]} : vector<8x640xf32> to vector<8x4xf32>
    %26 = vector.extract_strided_slice %22 {offsets = [0, 64], sizes = [8, 4], strides = [1, 1]} : vector<8x640xf32> to vector<8x4xf32>
    %27 = vector.extract_strided_slice %23 {offsets = [0, 64], sizes = [8, 4], strides = [1, 1]} : vector<8x640xf32> to vector<8x4xf32>
    %28 = vector.extract_strided_slice %22 {offsets = [0, 128], sizes = [8, 4], strides = [1, 1]} : vector<8x640xf32> to vector<8x4xf32>
    %29 = vector.extract_strided_slice %23 {offsets = [0, 128], sizes = [8, 4], strides = [1, 1]} : vector<8x640xf32> to vector<8x4xf32>
    %30 = vector.extract_strided_slice %22 {offsets = [0, 192], sizes = [8, 4], strides = [1, 1]} : vector<8x640xf32> to vector<8x4xf32>
    %31 = vector.extract_strided_slice %23 {offsets = [0, 192], sizes = [8, 4], strides = [1, 1]} : vector<8x640xf32> to vector<8x4xf32>
    %32 = vector.extract_strided_slice %22 {offsets = [0, 256], sizes = [8, 4], strides = [1, 1]} : vector<8x640xf32> to vector<8x4xf32>
    %33 = vector.extract_strided_slice %23 {offsets = [0, 256], sizes = [8, 4], strides = [1, 1]} : vector<8x640xf32> to vector<8x4xf32>
    %34 = vector.extract_strided_slice %22 {offsets = [0, 320], sizes = [8, 4], strides = [1, 1]} : vector<8x640xf32> to vector<8x4xf32>
    %35 = vector.extract_strided_slice %23 {offsets = [0, 320], sizes = [8, 4], strides = [1, 1]} : vector<8x640xf32> to vector<8x4xf32>
    %36 = vector.extract_strided_slice %22 {offsets = [0, 384], sizes = [8, 4], strides = [1, 1]} : vector<8x640xf32> to vector<8x4xf32>
    %37 = vector.extract_strided_slice %23 {offsets = [0, 384], sizes = [8, 4], strides = [1, 1]} : vector<8x640xf32> to vector<8x4xf32>
    %38 = vector.extract_strided_slice %22 {offsets = [0, 448], sizes = [8, 4], strides = [1, 1]} : vector<8x640xf32> to vector<8x4xf32>
    %39 = vector.extract_strided_slice %23 {offsets = [0, 448], sizes = [8, 4], strides = [1, 1]} : vector<8x640xf32> to vector<8x4xf32>
    %40 = vector.extract_strided_slice %22 {offsets = [0, 512], sizes = [8, 4], strides = [1, 1]} : vector<8x640xf32> to vector<8x4xf32>
    %41 = vector.extract_strided_slice %23 {offsets = [0, 512], sizes = [8, 4], strides = [1, 1]} : vector<8x640xf32> to vector<8x4xf32>
    %42 = vector.extract_strided_slice %22 {offsets = [0, 576], sizes = [8, 4], strides = [1, 1]} : vector<8x640xf32> to vector<8x4xf32>
    %43 = vector.extract_strided_slice %23 {offsets = [0, 576], sizes = [8, 4], strides = [1, 1]} : vector<8x640xf32> to vector<8x4xf32>
    %44 = vector.extract_strided_slice %22 {offsets = [0, 4], sizes = [8, 4], strides = [1, 1]} : vector<8x640xf32> to vector<8x4xf32>
    %45 = vector.extract_strided_slice %23 {offsets = [0, 4], sizes = [8, 4], strides = [1, 1]} : vector<8x640xf32> to vector<8x4xf32>
    %46 = vector.extract_strided_slice %22 {offsets = [0, 68], sizes = [8, 4], strides = [1, 1]} : vector<8x640xf32> to vector<8x4xf32>
    %47 = vector.extract_strided_slice %23 {offsets = [0, 68], sizes = [8, 4], strides = [1, 1]} : vector<8x640xf32> to vector<8x4xf32>
    %48 = vector.extract_strided_slice %22 {offsets = [0, 132], sizes = [8, 4], strides = [1, 1]} : vector<8x640xf32> to vector<8x4xf32>
    %49 = vector.extract_strided_slice %23 {offsets = [0, 132], sizes = [8, 4], strides = [1, 1]} : vector<8x640xf32> to vector<8x4xf32>
    %50 = vector.extract_strided_slice %22 {offsets = [0, 196], sizes = [8, 4], strides = [1, 1]} : vector<8x640xf32> to vector<8x4xf32>
    %51 = vector.extract_strided_slice %23 {offsets = [0, 196], sizes = [8, 4], strides = [1, 1]} : vector<8x640xf32> to vector<8x4xf32>
    %52 = vector.extract_strided_slice %22 {offsets = [0, 260], sizes = [8, 4], strides = [1, 1]} : vector<8x640xf32> to vector<8x4xf32>
    %53 = vector.extract_strided_slice %23 {offsets = [0, 260], sizes = [8, 4], strides = [1, 1]} : vector<8x640xf32> to vector<8x4xf32>
    %54 = vector.extract_strided_slice %22 {offsets = [0, 324], sizes = [8, 4], strides = [1, 1]} : vector<8x640xf32> to vector<8x4xf32>
    %55 = vector.extract_strided_slice %23 {offsets = [0, 324], sizes = [8, 4], strides = [1, 1]} : vector<8x640xf32> to vector<8x4xf32>
    %56 = vector.extract_strided_slice %22 {offsets = [0, 388], sizes = [8, 4], strides = [1, 1]} : vector<8x640xf32> to vector<8x4xf32>
    %57 = vector.extract_strided_slice %23 {offsets = [0, 388], sizes = [8, 4], strides = [1, 1]} : vector<8x640xf32> to vector<8x4xf32>
    %58 = vector.extract_strided_slice %22 {offsets = [0, 452], sizes = [8, 4], strides = [1, 1]} : vector<8x640xf32> to vector<8x4xf32>
    %59 = vector.extract_strided_slice %23 {offsets = [0, 452], sizes = [8, 4], strides = [1, 1]} : vector<8x640xf32> to vector<8x4xf32>
    %60 = vector.extract_strided_slice %22 {offsets = [0, 516], sizes = [8, 4], strides = [1, 1]} : vector<8x640xf32> to vector<8x4xf32>
    %61 = vector.extract_strided_slice %23 {offsets = [0, 516], sizes = [8, 4], strides = [1, 1]} : vector<8x640xf32> to vector<8x4xf32>
    %62 = vector.extract_strided_slice %22 {offsets = [0, 580], sizes = [8, 4], strides = [1, 1]} : vector<8x640xf32> to vector<8x4xf32>
    %63 = vector.extract_strided_slice %23 {offsets = [0, 580], sizes = [8, 4], strides = [1, 1]} : vector<8x640xf32> to vector<8x4xf32>
    %64 = vector.extract_strided_slice %22 {offsets = [0, 8], sizes = [8, 4], strides = [1, 1]} : vector<8x640xf32> to vector<8x4xf32>
    %65 = vector.extract_strided_slice %23 {offsets = [0, 8], sizes = [8, 4], strides = [1, 1]} : vector<8x640xf32> to vector<8x4xf32>
    %66 = vector.extract_strided_slice %22 {offsets = [0, 72], sizes = [8, 4], strides = [1, 1]} : vector<8x640xf32> to vector<8x4xf32>
    %67 = vector.extract_strided_slice %23 {offsets = [0, 72], sizes = [8, 4], strides = [1, 1]} : vector<8x640xf32> to vector<8x4xf32>
    %68 = vector.extract_strided_slice %22 {offsets = [0, 136], sizes = [8, 4], strides = [1, 1]} : vector<8x640xf32> to vector<8x4xf32>
    %69 = vector.extract_strided_slice %23 {offsets = [0, 136], sizes = [8, 4], strides = [1, 1]} : vector<8x640xf32> to vector<8x4xf32>
    %70 = vector.extract_strided_slice %22 {offsets = [0, 200], sizes = [8, 4], strides = [1, 1]} : vector<8x640xf32> to vector<8x4xf32>
    %71 = vector.extract_strided_slice %23 {offsets = [0, 200], sizes = [8, 4], strides = [1, 1]} : vector<8x640xf32> to vector<8x4xf32>
    %72 = vector.extract_strided_slice %22 {offsets = [0, 264], sizes = [8, 4], strides = [1, 1]} : vector<8x640xf32> to vector<8x4xf32>
    %73 = vector.extract_strided_slice %23 {offsets = [0, 264], sizes = [8, 4], strides = [1, 1]} : vector<8x640xf32> to vector<8x4xf32>
    %74 = vector.extract_strided_slice %22 {offsets = [0, 328], sizes = [8, 4], strides = [1, 1]} : vector<8x640xf32> to vector<8x4xf32>
    %75 = vector.extract_strided_slice %23 {offsets = [0, 328], sizes = [8, 4], strides = [1, 1]} : vector<8x640xf32> to vector<8x4xf32>
    %76 = vector.extract_strided_slice %22 {offsets = [0, 392], sizes = [8, 4], strides = [1, 1]} : vector<8x640xf32> to vector<8x4xf32>
    %77 = vector.extract_strided_slice %23 {offsets = [0, 392], sizes = [8, 4], strides = [1, 1]} : vector<8x640xf32> to vector<8x4xf32>
    %78 = vector.extract_strided_slice %22 {offsets = [0, 456], sizes = [8, 4], strides = [1, 1]} : vector<8x640xf32> to vector<8x4xf32>
    %79 = vector.extract_strided_slice %23 {offsets = [0, 456], sizes = [8, 4], strides = [1, 1]} : vector<8x640xf32> to vector<8x4xf32>
    %80 = vector.extract_strided_slice %22 {offsets = [0, 520], sizes = [8, 4], strides = [1, 1]} : vector<8x640xf32> to vector<8x4xf32>
    %81 = vector.extract_strided_slice %23 {offsets = [0, 520], sizes = [8, 4], strides = [1, 1]} : vector<8x640xf32> to vector<8x4xf32>
    %82 = vector.extract_strided_slice %22 {offsets = [0, 584], sizes = [8, 4], strides = [1, 1]} : vector<8x640xf32> to vector<8x4xf32>
    %83 = vector.extract_strided_slice %23 {offsets = [0, 584], sizes = [8, 4], strides = [1, 1]} : vector<8x640xf32> to vector<8x4xf32>
    %84 = vector.extract_strided_slice %22 {offsets = [0, 12], sizes = [8, 4], strides = [1, 1]} : vector<8x640xf32> to vector<8x4xf32>
    %85 = vector.extract_strided_slice %23 {offsets = [0, 12], sizes = [8, 4], strides = [1, 1]} : vector<8x640xf32> to vector<8x4xf32>
    %86 = vector.extract_strided_slice %22 {offsets = [0, 76], sizes = [8, 4], strides = [1, 1]} : vector<8x640xf32> to vector<8x4xf32>
    %87 = vector.extract_strided_slice %23 {offsets = [0, 76], sizes = [8, 4], strides = [1, 1]} : vector<8x640xf32> to vector<8x4xf32>
    %88 = vector.extract_strided_slice %22 {offsets = [0, 140], sizes = [8, 4], strides = [1, 1]} : vector<8x640xf32> to vector<8x4xf32>
    %89 = vector.extract_strided_slice %23 {offsets = [0, 140], sizes = [8, 4], strides = [1, 1]} : vector<8x640xf32> to vector<8x4xf32>
    %90 = vector.extract_strided_slice %22 {offsets = [0, 204], sizes = [8, 4], strides = [1, 1]} : vector<8x640xf32> to vector<8x4xf32>
    %91 = vector.extract_strided_slice %23 {offsets = [0, 204], sizes = [8, 4], strides = [1, 1]} : vector<8x640xf32> to vector<8x4xf32>
    %92 = vector.extract_strided_slice %22 {offsets = [0, 268], sizes = [8, 4], strides = [1, 1]} : vector<8x640xf32> to vector<8x4xf32>
    %93 = vector.extract_strided_slice %23 {offsets = [0, 268], sizes = [8, 4], strides = [1, 1]} : vector<8x640xf32> to vector<8x4xf32>
    %94 = vector.extract_strided_slice %22 {offsets = [0, 332], sizes = [8, 4], strides = [1, 1]} : vector<8x640xf32> to vector<8x4xf32>
    %95 = vector.extract_strided_slice %23 {offsets = [0, 332], sizes = [8, 4], strides = [1, 1]} : vector<8x640xf32> to vector<8x4xf32>
    %96 = vector.extract_strided_slice %22 {offsets = [0, 396], sizes = [8, 4], strides = [1, 1]} : vector<8x640xf32> to vector<8x4xf32>
    %97 = vector.extract_strided_slice %23 {offsets = [0, 396], sizes = [8, 4], strides = [1, 1]} : vector<8x640xf32> to vector<8x4xf32>
    %98 = vector.extract_strided_slice %22 {offsets = [0, 460], sizes = [8, 4], strides = [1, 1]} : vector<8x640xf32> to vector<8x4xf32>
    %99 = vector.extract_strided_slice %23 {offsets = [0, 460], sizes = [8, 4], strides = [1, 1]} : vector<8x640xf32> to vector<8x4xf32>
    %100 = vector.extract_strided_slice %22 {offsets = [0, 524], sizes = [8, 4], strides = [1, 1]} : vector<8x640xf32> to vector<8x4xf32>
    %101 = vector.extract_strided_slice %23 {offsets = [0, 524], sizes = [8, 4], strides = [1, 1]} : vector<8x640xf32> to vector<8x4xf32>
    %102 = vector.extract_strided_slice %22 {offsets = [0, 588], sizes = [8, 4], strides = [1, 1]} : vector<8x640xf32> to vector<8x4xf32>
    %103 = vector.extract_strided_slice %23 {offsets = [0, 588], sizes = [8, 4], strides = [1, 1]} : vector<8x640xf32> to vector<8x4xf32>
    %104 = vector.extract_strided_slice %22 {offsets = [0, 16], sizes = [8, 4], strides = [1, 1]} : vector<8x640xf32> to vector<8x4xf32>
    %105 = vector.extract_strided_slice %23 {offsets = [0, 16], sizes = [8, 4], strides = [1, 1]} : vector<8x640xf32> to vector<8x4xf32>
    %106 = vector.extract_strided_slice %22 {offsets = [0, 80], sizes = [8, 4], strides = [1, 1]} : vector<8x640xf32> to vector<8x4xf32>
    %107 = vector.extract_strided_slice %23 {offsets = [0, 80], sizes = [8, 4], strides = [1, 1]} : vector<8x640xf32> to vector<8x4xf32>
    %108 = vector.extract_strided_slice %22 {offsets = [0, 144], sizes = [8, 4], strides = [1, 1]} : vector<8x640xf32> to vector<8x4xf32>
    %109 = vector.extract_strided_slice %23 {offsets = [0, 144], sizes = [8, 4], strides = [1, 1]} : vector<8x640xf32> to vector<8x4xf32>
    %110 = vector.extract_strided_slice %22 {offsets = [0, 208], sizes = [8, 4], strides = [1, 1]} : vector<8x640xf32> to vector<8x4xf32>
    %111 = vector.extract_strided_slice %23 {offsets = [0, 208], sizes = [8, 4], strides = [1, 1]} : vector<8x640xf32> to vector<8x4xf32>
    %112 = vector.extract_strided_slice %22 {offsets = [0, 272], sizes = [8, 4], strides = [1, 1]} : vector<8x640xf32> to vector<8x4xf32>
    %113 = vector.extract_strided_slice %23 {offsets = [0, 272], sizes = [8, 4], strides = [1, 1]} : vector<8x640xf32> to vector<8x4xf32>
    %114 = vector.extract_strided_slice %22 {offsets = [0, 336], sizes = [8, 4], strides = [1, 1]} : vector<8x640xf32> to vector<8x4xf32>
    %115 = vector.extract_strided_slice %23 {offsets = [0, 336], sizes = [8, 4], strides = [1, 1]} : vector<8x640xf32> to vector<8x4xf32>
    %116 = vector.extract_strided_slice %22 {offsets = [0, 400], sizes = [8, 4], strides = [1, 1]} : vector<8x640xf32> to vector<8x4xf32>
    %117 = vector.extract_strided_slice %23 {offsets = [0, 400], sizes = [8, 4], strides = [1, 1]} : vector<8x640xf32> to vector<8x4xf32>
    %118 = vector.extract_strided_slice %22 {offsets = [0, 464], sizes = [8, 4], strides = [1, 1]} : vector<8x640xf32> to vector<8x4xf32>
    %119 = vector.extract_strided_slice %23 {offsets = [0, 464], sizes = [8, 4], strides = [1, 1]} : vector<8x640xf32> to vector<8x4xf32>
    %120 = vector.extract_strided_slice %22 {offsets = [0, 528], sizes = [8, 4], strides = [1, 1]} : vector<8x640xf32> to vector<8x4xf32>
    %121 = vector.extract_strided_slice %23 {offsets = [0, 528], sizes = [8, 4], strides = [1, 1]} : vector<8x640xf32> to vector<8x4xf32>
    %122 = vector.extract_strided_slice %22 {offsets = [0, 592], sizes = [8, 4], strides = [1, 1]} : vector<8x640xf32> to vector<8x4xf32>
    %123 = vector.extract_strided_slice %23 {offsets = [0, 592], sizes = [8, 4], strides = [1, 1]} : vector<8x640xf32> to vector<8x4xf32>
    %124 = vector.extract_strided_slice %22 {offsets = [0, 20], sizes = [8, 4], strides = [1, 1]} : vector<8x640xf32> to vector<8x4xf32>
    %125 = vector.extract_strided_slice %23 {offsets = [0, 20], sizes = [8, 4], strides = [1, 1]} : vector<8x640xf32> to vector<8x4xf32>
    %126 = vector.extract_strided_slice %22 {offsets = [0, 84], sizes = [8, 4], strides = [1, 1]} : vector<8x640xf32> to vector<8x4xf32>
    %127 = vector.extract_strided_slice %23 {offsets = [0, 84], sizes = [8, 4], strides = [1, 1]} : vector<8x640xf32> to vector<8x4xf32>
    %128 = vector.extract_strided_slice %22 {offsets = [0, 148], sizes = [8, 4], strides = [1, 1]} : vector<8x640xf32> to vector<8x4xf32>
    %129 = vector.extract_strided_slice %23 {offsets = [0, 148], sizes = [8, 4], strides = [1, 1]} : vector<8x640xf32> to vector<8x4xf32>
    %130 = vector.extract_strided_slice %22 {offsets = [0, 212], sizes = [8, 4], strides = [1, 1]} : vector<8x640xf32> to vector<8x4xf32>
    %131 = vector.extract_strided_slice %23 {offsets = [0, 212], sizes = [8, 4], strides = [1, 1]} : vector<8x640xf32> to vector<8x4xf32>
    %132 = vector.extract_strided_slice %22 {offsets = [0, 276], sizes = [8, 4], strides = [1, 1]} : vector<8x640xf32> to vector<8x4xf32>
    %133 = vector.extract_strided_slice %23 {offsets = [0, 276], sizes = [8, 4], strides = [1, 1]} : vector<8x640xf32> to vector<8x4xf32>
    %134 = vector.extract_strided_slice %22 {offsets = [0, 340], sizes = [8, 4], strides = [1, 1]} : vector<8x640xf32> to vector<8x4xf32>
    %135 = vector.extract_strided_slice %23 {offsets = [0, 340], sizes = [8, 4], strides = [1, 1]} : vector<8x640xf32> to vector<8x4xf32>
    %136 = vector.extract_strided_slice %22 {offsets = [0, 404], sizes = [8, 4], strides = [1, 1]} : vector<8x640xf32> to vector<8x4xf32>
    %137 = vector.extract_strided_slice %23 {offsets = [0, 404], sizes = [8, 4], strides = [1, 1]} : vector<8x640xf32> to vector<8x4xf32>
    %138 = vector.extract_strided_slice %22 {offsets = [0, 468], sizes = [8, 4], strides = [1, 1]} : vector<8x640xf32> to vector<8x4xf32>
    %139 = vector.extract_strided_slice %23 {offsets = [0, 468], sizes = [8, 4], strides = [1, 1]} : vector<8x640xf32> to vector<8x4xf32>
    %140 = vector.extract_strided_slice %22 {offsets = [0, 532], sizes = [8, 4], strides = [1, 1]} : vector<8x640xf32> to vector<8x4xf32>
    %141 = vector.extract_strided_slice %23 {offsets = [0, 532], sizes = [8, 4], strides = [1, 1]} : vector<8x640xf32> to vector<8x4xf32>
    %142 = vector.extract_strided_slice %22 {offsets = [0, 596], sizes = [8, 4], strides = [1, 1]} : vector<8x640xf32> to vector<8x4xf32>
    %143 = vector.extract_strided_slice %23 {offsets = [0, 596], sizes = [8, 4], strides = [1, 1]} : vector<8x640xf32> to vector<8x4xf32>
    %144 = vector.extract_strided_slice %22 {offsets = [0, 24], sizes = [8, 4], strides = [1, 1]} : vector<8x640xf32> to vector<8x4xf32>
    %145 = vector.extract_strided_slice %23 {offsets = [0, 24], sizes = [8, 4], strides = [1, 1]} : vector<8x640xf32> to vector<8x4xf32>
    %146 = vector.extract_strided_slice %22 {offsets = [0, 88], sizes = [8, 4], strides = [1, 1]} : vector<8x640xf32> to vector<8x4xf32>
    %147 = vector.extract_strided_slice %23 {offsets = [0, 88], sizes = [8, 4], strides = [1, 1]} : vector<8x640xf32> to vector<8x4xf32>
    %148 = vector.extract_strided_slice %22 {offsets = [0, 152], sizes = [8, 4], strides = [1, 1]} : vector<8x640xf32> to vector<8x4xf32>
    %149 = vector.extract_strided_slice %23 {offsets = [0, 152], sizes = [8, 4], strides = [1, 1]} : vector<8x640xf32> to vector<8x4xf32>
    %150 = vector.extract_strided_slice %22 {offsets = [0, 216], sizes = [8, 4], strides = [1, 1]} : vector<8x640xf32> to vector<8x4xf32>
    %151 = vector.extract_strided_slice %23 {offsets = [0, 216], sizes = [8, 4], strides = [1, 1]} : vector<8x640xf32> to vector<8x4xf32>
    %152 = vector.extract_strided_slice %22 {offsets = [0, 280], sizes = [8, 4], strides = [1, 1]} : vector<8x640xf32> to vector<8x4xf32>
    %153 = vector.extract_strided_slice %23 {offsets = [0, 280], sizes = [8, 4], strides = [1, 1]} : vector<8x640xf32> to vector<8x4xf32>
    %154 = vector.extract_strided_slice %22 {offsets = [0, 344], sizes = [8, 4], strides = [1, 1]} : vector<8x640xf32> to vector<8x4xf32>
    %155 = vector.extract_strided_slice %23 {offsets = [0, 344], sizes = [8, 4], strides = [1, 1]} : vector<8x640xf32> to vector<8x4xf32>
    %156 = vector.extract_strided_slice %22 {offsets = [0, 408], sizes = [8, 4], strides = [1, 1]} : vector<8x640xf32> to vector<8x4xf32>
    %157 = vector.extract_strided_slice %23 {offsets = [0, 408], sizes = [8, 4], strides = [1, 1]} : vector<8x640xf32> to vector<8x4xf32>
    %158 = vector.extract_strided_slice %22 {offsets = [0, 472], sizes = [8, 4], strides = [1, 1]} : vector<8x640xf32> to vector<8x4xf32>
    %159 = vector.extract_strided_slice %23 {offsets = [0, 472], sizes = [8, 4], strides = [1, 1]} : vector<8x640xf32> to vector<8x4xf32>
    %160 = vector.extract_strided_slice %22 {offsets = [0, 536], sizes = [8, 4], strides = [1, 1]} : vector<8x640xf32> to vector<8x4xf32>
    %161 = vector.extract_strided_slice %23 {offsets = [0, 536], sizes = [8, 4], strides = [1, 1]} : vector<8x640xf32> to vector<8x4xf32>
    %162 = vector.extract_strided_slice %22 {offsets = [0, 600], sizes = [8, 4], strides = [1, 1]} : vector<8x640xf32> to vector<8x4xf32>
    %163 = vector.extract_strided_slice %23 {offsets = [0, 600], sizes = [8, 4], strides = [1, 1]} : vector<8x640xf32> to vector<8x4xf32>
    %164 = vector.extract_strided_slice %22 {offsets = [0, 28], sizes = [8, 4], strides = [1, 1]} : vector<8x640xf32> to vector<8x4xf32>
    %165 = vector.extract_strided_slice %23 {offsets = [0, 28], sizes = [8, 4], strides = [1, 1]} : vector<8x640xf32> to vector<8x4xf32>
    %166 = vector.extract_strided_slice %22 {offsets = [0, 92], sizes = [8, 4], strides = [1, 1]} : vector<8x640xf32> to vector<8x4xf32>
    %167 = vector.extract_strided_slice %23 {offsets = [0, 92], sizes = [8, 4], strides = [1, 1]} : vector<8x640xf32> to vector<8x4xf32>
    %168 = vector.extract_strided_slice %22 {offsets = [0, 156], sizes = [8, 4], strides = [1, 1]} : vector<8x640xf32> to vector<8x4xf32>
    %169 = vector.extract_strided_slice %23 {offsets = [0, 156], sizes = [8, 4], strides = [1, 1]} : vector<8x640xf32> to vector<8x4xf32>
    %170 = vector.extract_strided_slice %22 {offsets = [0, 220], sizes = [8, 4], strides = [1, 1]} : vector<8x640xf32> to vector<8x4xf32>
    %171 = vector.extract_strided_slice %23 {offsets = [0, 220], sizes = [8, 4], strides = [1, 1]} : vector<8x640xf32> to vector<8x4xf32>
    %172 = vector.extract_strided_slice %22 {offsets = [0, 284], sizes = [8, 4], strides = [1, 1]} : vector<8x640xf32> to vector<8x4xf32>
    %173 = vector.extract_strided_slice %23 {offsets = [0, 284], sizes = [8, 4], strides = [1, 1]} : vector<8x640xf32> to vector<8x4xf32>
    %174 = vector.extract_strided_slice %22 {offsets = [0, 348], sizes = [8, 4], strides = [1, 1]} : vector<8x640xf32> to vector<8x4xf32>
    %175 = vector.extract_strided_slice %23 {offsets = [0, 348], sizes = [8, 4], strides = [1, 1]} : vector<8x640xf32> to vector<8x4xf32>
    %176 = vector.extract_strided_slice %22 {offsets = [0, 412], sizes = [8, 4], strides = [1, 1]} : vector<8x640xf32> to vector<8x4xf32>
    %177 = vector.extract_strided_slice %23 {offsets = [0, 412], sizes = [8, 4], strides = [1, 1]} : vector<8x640xf32> to vector<8x4xf32>
    %178 = vector.extract_strided_slice %22 {offsets = [0, 476], sizes = [8, 4], strides = [1, 1]} : vector<8x640xf32> to vector<8x4xf32>
    %179 = vector.extract_strided_slice %23 {offsets = [0, 476], sizes = [8, 4], strides = [1, 1]} : vector<8x640xf32> to vector<8x4xf32>
    %180 = vector.extract_strided_slice %22 {offsets = [0, 540], sizes = [8, 4], strides = [1, 1]} : vector<8x640xf32> to vector<8x4xf32>
    %181 = vector.extract_strided_slice %23 {offsets = [0, 540], sizes = [8, 4], strides = [1, 1]} : vector<8x640xf32> to vector<8x4xf32>
    %182 = vector.extract_strided_slice %22 {offsets = [0, 604], sizes = [8, 4], strides = [1, 1]} : vector<8x640xf32> to vector<8x4xf32>
    %183 = vector.extract_strided_slice %23 {offsets = [0, 604], sizes = [8, 4], strides = [1, 1]} : vector<8x640xf32> to vector<8x4xf32>
    %184 = vector.extract_strided_slice %22 {offsets = [0, 32], sizes = [8, 4], strides = [1, 1]} : vector<8x640xf32> to vector<8x4xf32>
    %185 = vector.extract_strided_slice %23 {offsets = [0, 32], sizes = [8, 4], strides = [1, 1]} : vector<8x640xf32> to vector<8x4xf32>
    %186 = vector.extract_strided_slice %22 {offsets = [0, 96], sizes = [8, 4], strides = [1, 1]} : vector<8x640xf32> to vector<8x4xf32>
    %187 = vector.extract_strided_slice %23 {offsets = [0, 96], sizes = [8, 4], strides = [1, 1]} : vector<8x640xf32> to vector<8x4xf32>
    %188 = vector.extract_strided_slice %22 {offsets = [0, 160], sizes = [8, 4], strides = [1, 1]} : vector<8x640xf32> to vector<8x4xf32>
    %189 = vector.extract_strided_slice %23 {offsets = [0, 160], sizes = [8, 4], strides = [1, 1]} : vector<8x640xf32> to vector<8x4xf32>
    %190 = vector.extract_strided_slice %22 {offsets = [0, 224], sizes = [8, 4], strides = [1, 1]} : vector<8x640xf32> to vector<8x4xf32>
    %191 = vector.extract_strided_slice %23 {offsets = [0, 224], sizes = [8, 4], strides = [1, 1]} : vector<8x640xf32> to vector<8x4xf32>
    %192 = vector.extract_strided_slice %22 {offsets = [0, 288], sizes = [8, 4], strides = [1, 1]} : vector<8x640xf32> to vector<8x4xf32>
    %193 = vector.extract_strided_slice %23 {offsets = [0, 288], sizes = [8, 4], strides = [1, 1]} : vector<8x640xf32> to vector<8x4xf32>
    %194 = vector.extract_strided_slice %22 {offsets = [0, 352], sizes = [8, 4], strides = [1, 1]} : vector<8x640xf32> to vector<8x4xf32>
    %195 = vector.extract_strided_slice %23 {offsets = [0, 352], sizes = [8, 4], strides = [1, 1]} : vector<8x640xf32> to vector<8x4xf32>
    %196 = vector.extract_strided_slice %22 {offsets = [0, 416], sizes = [8, 4], strides = [1, 1]} : vector<8x640xf32> to vector<8x4xf32>
    %197 = vector.extract_strided_slice %23 {offsets = [0, 416], sizes = [8, 4], strides = [1, 1]} : vector<8x640xf32> to vector<8x4xf32>
    %198 = vector.extract_strided_slice %22 {offsets = [0, 480], sizes = [8, 4], strides = [1, 1]} : vector<8x640xf32> to vector<8x4xf32>
    %199 = vector.extract_strided_slice %23 {offsets = [0, 480], sizes = [8, 4], strides = [1, 1]} : vector<8x640xf32> to vector<8x4xf32>
    %200 = vector.extract_strided_slice %22 {offsets = [0, 544], sizes = [8, 4], strides = [1, 1]} : vector<8x640xf32> to vector<8x4xf32>
    %201 = vector.extract_strided_slice %23 {offsets = [0, 544], sizes = [8, 4], strides = [1, 1]} : vector<8x640xf32> to vector<8x4xf32>
    %202 = vector.extract_strided_slice %22 {offsets = [0, 608], sizes = [8, 4], strides = [1, 1]} : vector<8x640xf32> to vector<8x4xf32>
    %203 = vector.extract_strided_slice %23 {offsets = [0, 608], sizes = [8, 4], strides = [1, 1]} : vector<8x640xf32> to vector<8x4xf32>
    %204 = vector.extract_strided_slice %22 {offsets = [0, 36], sizes = [8, 4], strides = [1, 1]} : vector<8x640xf32> to vector<8x4xf32>
    %205 = vector.extract_strided_slice %23 {offsets = [0, 36], sizes = [8, 4], strides = [1, 1]} : vector<8x640xf32> to vector<8x4xf32>
    %206 = vector.extract_strided_slice %22 {offsets = [0, 100], sizes = [8, 4], strides = [1, 1]} : vector<8x640xf32> to vector<8x4xf32>
    %207 = vector.extract_strided_slice %23 {offsets = [0, 100], sizes = [8, 4], strides = [1, 1]} : vector<8x640xf32> to vector<8x4xf32>
    %208 = vector.extract_strided_slice %22 {offsets = [0, 164], sizes = [8, 4], strides = [1, 1]} : vector<8x640xf32> to vector<8x4xf32>
    %209 = vector.extract_strided_slice %23 {offsets = [0, 164], sizes = [8, 4], strides = [1, 1]} : vector<8x640xf32> to vector<8x4xf32>
    %210 = vector.extract_strided_slice %22 {offsets = [0, 228], sizes = [8, 4], strides = [1, 1]} : vector<8x640xf32> to vector<8x4xf32>
    %211 = vector.extract_strided_slice %23 {offsets = [0, 228], sizes = [8, 4], strides = [1, 1]} : vector<8x640xf32> to vector<8x4xf32>
    %212 = vector.extract_strided_slice %22 {offsets = [0, 292], sizes = [8, 4], strides = [1, 1]} : vector<8x640xf32> to vector<8x4xf32>
    %213 = vector.extract_strided_slice %23 {offsets = [0, 292], sizes = [8, 4], strides = [1, 1]} : vector<8x640xf32> to vector<8x4xf32>
    %214 = vector.extract_strided_slice %22 {offsets = [0, 356], sizes = [8, 4], strides = [1, 1]} : vector<8x640xf32> to vector<8x4xf32>
    %215 = vector.extract_strided_slice %23 {offsets = [0, 356], sizes = [8, 4], strides = [1, 1]} : vector<8x640xf32> to vector<8x4xf32>
    %216 = vector.extract_strided_slice %22 {offsets = [0, 420], sizes = [8, 4], strides = [1, 1]} : vector<8x640xf32> to vector<8x4xf32>
    %217 = vector.extract_strided_slice %23 {offsets = [0, 420], sizes = [8, 4], strides = [1, 1]} : vector<8x640xf32> to vector<8x4xf32>
    %218 = vector.extract_strided_slice %22 {offsets = [0, 484], sizes = [8, 4], strides = [1, 1]} : vector<8x640xf32> to vector<8x4xf32>
    %219 = vector.extract_strided_slice %23 {offsets = [0, 484], sizes = [8, 4], strides = [1, 1]} : vector<8x640xf32> to vector<8x4xf32>
    %220 = vector.extract_strided_slice %22 {offsets = [0, 548], sizes = [8, 4], strides = [1, 1]} : vector<8x640xf32> to vector<8x4xf32>
    %221 = vector.extract_strided_slice %23 {offsets = [0, 548], sizes = [8, 4], strides = [1, 1]} : vector<8x640xf32> to vector<8x4xf32>
    %222 = vector.extract_strided_slice %22 {offsets = [0, 612], sizes = [8, 4], strides = [1, 1]} : vector<8x640xf32> to vector<8x4xf32>
    %223 = vector.extract_strided_slice %23 {offsets = [0, 612], sizes = [8, 4], strides = [1, 1]} : vector<8x640xf32> to vector<8x4xf32>
    %224 = vector.extract_strided_slice %22 {offsets = [0, 40], sizes = [8, 4], strides = [1, 1]} : vector<8x640xf32> to vector<8x4xf32>
    %225 = vector.extract_strided_slice %23 {offsets = [0, 40], sizes = [8, 4], strides = [1, 1]} : vector<8x640xf32> to vector<8x4xf32>
    %226 = vector.extract_strided_slice %22 {offsets = [0, 104], sizes = [8, 4], strides = [1, 1]} : vector<8x640xf32> to vector<8x4xf32>
    %227 = vector.extract_strided_slice %23 {offsets = [0, 104], sizes = [8, 4], strides = [1, 1]} : vector<8x640xf32> to vector<8x4xf32>
    %228 = vector.extract_strided_slice %22 {offsets = [0, 168], sizes = [8, 4], strides = [1, 1]} : vector<8x640xf32> to vector<8x4xf32>
    %229 = vector.extract_strided_slice %23 {offsets = [0, 168], sizes = [8, 4], strides = [1, 1]} : vector<8x640xf32> to vector<8x4xf32>
    %230 = vector.extract_strided_slice %22 {offsets = [0, 232], sizes = [8, 4], strides = [1, 1]} : vector<8x640xf32> to vector<8x4xf32>
    %231 = vector.extract_strided_slice %23 {offsets = [0, 232], sizes = [8, 4], strides = [1, 1]} : vector<8x640xf32> to vector<8x4xf32>
    %232 = vector.extract_strided_slice %22 {offsets = [0, 296], sizes = [8, 4], strides = [1, 1]} : vector<8x640xf32> to vector<8x4xf32>
    %233 = vector.extract_strided_slice %23 {offsets = [0, 296], sizes = [8, 4], strides = [1, 1]} : vector<8x640xf32> to vector<8x4xf32>
    %234 = vector.extract_strided_slice %22 {offsets = [0, 360], sizes = [8, 4], strides = [1, 1]} : vector<8x640xf32> to vector<8x4xf32>
    %235 = vector.extract_strided_slice %23 {offsets = [0, 360], sizes = [8, 4], strides = [1, 1]} : vector<8x640xf32> to vector<8x4xf32>
    %236 = vector.extract_strided_slice %22 {offsets = [0, 424], sizes = [8, 4], strides = [1, 1]} : vector<8x640xf32> to vector<8x4xf32>
    %237 = vector.extract_strided_slice %23 {offsets = [0, 424], sizes = [8, 4], strides = [1, 1]} : vector<8x640xf32> to vector<8x4xf32>
    %238 = vector.extract_strided_slice %22 {offsets = [0, 488], sizes = [8, 4], strides = [1, 1]} : vector<8x640xf32> to vector<8x4xf32>
    %239 = vector.extract_strided_slice %23 {offsets = [0, 488], sizes = [8, 4], strides = [1, 1]} : vector<8x640xf32> to vector<8x4xf32>
    %240 = vector.extract_strided_slice %22 {offsets = [0, 552], sizes = [8, 4], strides = [1, 1]} : vector<8x640xf32> to vector<8x4xf32>
    %241 = vector.extract_strided_slice %23 {offsets = [0, 552], sizes = [8, 4], strides = [1, 1]} : vector<8x640xf32> to vector<8x4xf32>
    %242 = vector.extract_strided_slice %22 {offsets = [0, 616], sizes = [8, 4], strides = [1, 1]} : vector<8x640xf32> to vector<8x4xf32>
    %243 = vector.extract_strided_slice %23 {offsets = [0, 616], sizes = [8, 4], strides = [1, 1]} : vector<8x640xf32> to vector<8x4xf32>
    %244 = vector.extract_strided_slice %22 {offsets = [0, 44], sizes = [8, 4], strides = [1, 1]} : vector<8x640xf32> to vector<8x4xf32>
    %245 = vector.extract_strided_slice %23 {offsets = [0, 44], sizes = [8, 4], strides = [1, 1]} : vector<8x640xf32> to vector<8x4xf32>
    %246 = vector.extract_strided_slice %22 {offsets = [0, 108], sizes = [8, 4], strides = [1, 1]} : vector<8x640xf32> to vector<8x4xf32>
    %247 = vector.extract_strided_slice %23 {offsets = [0, 108], sizes = [8, 4], strides = [1, 1]} : vector<8x640xf32> to vector<8x4xf32>
    %248 = vector.extract_strided_slice %22 {offsets = [0, 172], sizes = [8, 4], strides = [1, 1]} : vector<8x640xf32> to vector<8x4xf32>
    %249 = vector.extract_strided_slice %23 {offsets = [0, 172], sizes = [8, 4], strides = [1, 1]} : vector<8x640xf32> to vector<8x4xf32>
    %250 = vector.extract_strided_slice %22 {offsets = [0, 236], sizes = [8, 4], strides = [1, 1]} : vector<8x640xf32> to vector<8x4xf32>
    %251 = vector.extract_strided_slice %23 {offsets = [0, 236], sizes = [8, 4], strides = [1, 1]} : vector<8x640xf32> to vector<8x4xf32>
    %252 = vector.extract_strided_slice %22 {offsets = [0, 300], sizes = [8, 4], strides = [1, 1]} : vector<8x640xf32> to vector<8x4xf32>
    %253 = vector.extract_strided_slice %23 {offsets = [0, 300], sizes = [8, 4], strides = [1, 1]} : vector<8x640xf32> to vector<8x4xf32>
    %254 = vector.extract_strided_slice %22 {offsets = [0, 364], sizes = [8, 4], strides = [1, 1]} : vector<8x640xf32> to vector<8x4xf32>
    %255 = vector.extract_strided_slice %23 {offsets = [0, 364], sizes = [8, 4], strides = [1, 1]} : vector<8x640xf32> to vector<8x4xf32>
    %256 = vector.extract_strided_slice %22 {offsets = [0, 428], sizes = [8, 4], strides = [1, 1]} : vector<8x640xf32> to vector<8x4xf32>
    %257 = vector.extract_strided_slice %23 {offsets = [0, 428], sizes = [8, 4], strides = [1, 1]} : vector<8x640xf32> to vector<8x4xf32>
    %258 = vector.extract_strided_slice %22 {offsets = [0, 492], sizes = [8, 4], strides = [1, 1]} : vector<8x640xf32> to vector<8x4xf32>
    %259 = vector.extract_strided_slice %23 {offsets = [0, 492], sizes = [8, 4], strides = [1, 1]} : vector<8x640xf32> to vector<8x4xf32>
    %260 = vector.extract_strided_slice %22 {offsets = [0, 556], sizes = [8, 4], strides = [1, 1]} : vector<8x640xf32> to vector<8x4xf32>
    %261 = vector.extract_strided_slice %23 {offsets = [0, 556], sizes = [8, 4], strides = [1, 1]} : vector<8x640xf32> to vector<8x4xf32>
    %262 = vector.extract_strided_slice %22 {offsets = [0, 620], sizes = [8, 4], strides = [1, 1]} : vector<8x640xf32> to vector<8x4xf32>
    %263 = vector.extract_strided_slice %23 {offsets = [0, 620], sizes = [8, 4], strides = [1, 1]} : vector<8x640xf32> to vector<8x4xf32>
    %264 = vector.extract_strided_slice %22 {offsets = [0, 48], sizes = [8, 4], strides = [1, 1]} : vector<8x640xf32> to vector<8x4xf32>
    %265 = vector.extract_strided_slice %23 {offsets = [0, 48], sizes = [8, 4], strides = [1, 1]} : vector<8x640xf32> to vector<8x4xf32>
    %266 = vector.extract_strided_slice %22 {offsets = [0, 112], sizes = [8, 4], strides = [1, 1]} : vector<8x640xf32> to vector<8x4xf32>
    %267 = vector.extract_strided_slice %23 {offsets = [0, 112], sizes = [8, 4], strides = [1, 1]} : vector<8x640xf32> to vector<8x4xf32>
    %268 = vector.extract_strided_slice %22 {offsets = [0, 176], sizes = [8, 4], strides = [1, 1]} : vector<8x640xf32> to vector<8x4xf32>
    %269 = vector.extract_strided_slice %23 {offsets = [0, 176], sizes = [8, 4], strides = [1, 1]} : vector<8x640xf32> to vector<8x4xf32>
    %270 = vector.extract_strided_slice %22 {offsets = [0, 240], sizes = [8, 4], strides = [1, 1]} : vector<8x640xf32> to vector<8x4xf32>
    %271 = vector.extract_strided_slice %23 {offsets = [0, 240], sizes = [8, 4], strides = [1, 1]} : vector<8x640xf32> to vector<8x4xf32>
    %272 = vector.extract_strided_slice %22 {offsets = [0, 304], sizes = [8, 4], strides = [1, 1]} : vector<8x640xf32> to vector<8x4xf32>
    %273 = vector.extract_strided_slice %23 {offsets = [0, 304], sizes = [8, 4], strides = [1, 1]} : vector<8x640xf32> to vector<8x4xf32>
    %274 = vector.extract_strided_slice %22 {offsets = [0, 368], sizes = [8, 4], strides = [1, 1]} : vector<8x640xf32> to vector<8x4xf32>
    %275 = vector.extract_strided_slice %23 {offsets = [0, 368], sizes = [8, 4], strides = [1, 1]} : vector<8x640xf32> to vector<8x4xf32>
    %276 = vector.extract_strided_slice %22 {offsets = [0, 432], sizes = [8, 4], strides = [1, 1]} : vector<8x640xf32> to vector<8x4xf32>
    %277 = vector.extract_strided_slice %23 {offsets = [0, 432], sizes = [8, 4], strides = [1, 1]} : vector<8x640xf32> to vector<8x4xf32>
    %278 = vector.extract_strided_slice %22 {offsets = [0, 496], sizes = [8, 4], strides = [1, 1]} : vector<8x640xf32> to vector<8x4xf32>
    %279 = vector.extract_strided_slice %23 {offsets = [0, 496], sizes = [8, 4], strides = [1, 1]} : vector<8x640xf32> to vector<8x4xf32>
    %280 = vector.extract_strided_slice %22 {offsets = [0, 560], sizes = [8, 4], strides = [1, 1]} : vector<8x640xf32> to vector<8x4xf32>
    %281 = vector.extract_strided_slice %23 {offsets = [0, 560], sizes = [8, 4], strides = [1, 1]} : vector<8x640xf32> to vector<8x4xf32>
    %282 = vector.extract_strided_slice %22 {offsets = [0, 624], sizes = [8, 4], strides = [1, 1]} : vector<8x640xf32> to vector<8x4xf32>
    %283 = vector.extract_strided_slice %23 {offsets = [0, 624], sizes = [8, 4], strides = [1, 1]} : vector<8x640xf32> to vector<8x4xf32>
    %284 = vector.extract_strided_slice %22 {offsets = [0, 52], sizes = [8, 4], strides = [1, 1]} : vector<8x640xf32> to vector<8x4xf32>
    %285 = vector.extract_strided_slice %23 {offsets = [0, 52], sizes = [8, 4], strides = [1, 1]} : vector<8x640xf32> to vector<8x4xf32>
    %286 = vector.extract_strided_slice %22 {offsets = [0, 116], sizes = [8, 4], strides = [1, 1]} : vector<8x640xf32> to vector<8x4xf32>
    %287 = vector.extract_strided_slice %23 {offsets = [0, 116], sizes = [8, 4], strides = [1, 1]} : vector<8x640xf32> to vector<8x4xf32>
    %288 = vector.extract_strided_slice %22 {offsets = [0, 180], sizes = [8, 4], strides = [1, 1]} : vector<8x640xf32> to vector<8x4xf32>
    %289 = vector.extract_strided_slice %23 {offsets = [0, 180], sizes = [8, 4], strides = [1, 1]} : vector<8x640xf32> to vector<8x4xf32>
    %290 = vector.extract_strided_slice %22 {offsets = [0, 244], sizes = [8, 4], strides = [1, 1]} : vector<8x640xf32> to vector<8x4xf32>
    %291 = vector.extract_strided_slice %23 {offsets = [0, 244], sizes = [8, 4], strides = [1, 1]} : vector<8x640xf32> to vector<8x4xf32>
    %292 = vector.extract_strided_slice %22 {offsets = [0, 308], sizes = [8, 4], strides = [1, 1]} : vector<8x640xf32> to vector<8x4xf32>
    %293 = vector.extract_strided_slice %23 {offsets = [0, 308], sizes = [8, 4], strides = [1, 1]} : vector<8x640xf32> to vector<8x4xf32>
    %294 = vector.extract_strided_slice %22 {offsets = [0, 372], sizes = [8, 4], strides = [1, 1]} : vector<8x640xf32> to vector<8x4xf32>
    %295 = vector.extract_strided_slice %23 {offsets = [0, 372], sizes = [8, 4], strides = [1, 1]} : vector<8x640xf32> to vector<8x4xf32>
    %296 = vector.extract_strided_slice %22 {offsets = [0, 436], sizes = [8, 4], strides = [1, 1]} : vector<8x640xf32> to vector<8x4xf32>
    %297 = vector.extract_strided_slice %23 {offsets = [0, 436], sizes = [8, 4], strides = [1, 1]} : vector<8x640xf32> to vector<8x4xf32>
    %298 = vector.extract_strided_slice %22 {offsets = [0, 500], sizes = [8, 4], strides = [1, 1]} : vector<8x640xf32> to vector<8x4xf32>
    %299 = vector.extract_strided_slice %23 {offsets = [0, 500], sizes = [8, 4], strides = [1, 1]} : vector<8x640xf32> to vector<8x4xf32>
    %300 = vector.extract_strided_slice %22 {offsets = [0, 564], sizes = [8, 4], strides = [1, 1]} : vector<8x640xf32> to vector<8x4xf32>
    %301 = vector.extract_strided_slice %23 {offsets = [0, 564], sizes = [8, 4], strides = [1, 1]} : vector<8x640xf32> to vector<8x4xf32>
    %302 = vector.extract_strided_slice %22 {offsets = [0, 628], sizes = [8, 4], strides = [1, 1]} : vector<8x640xf32> to vector<8x4xf32>
    %303 = vector.extract_strided_slice %23 {offsets = [0, 628], sizes = [8, 4], strides = [1, 1]} : vector<8x640xf32> to vector<8x4xf32>
    %304 = vector.extract_strided_slice %22 {offsets = [0, 56], sizes = [8, 4], strides = [1, 1]} : vector<8x640xf32> to vector<8x4xf32>
    %305 = vector.extract_strided_slice %23 {offsets = [0, 56], sizes = [8, 4], strides = [1, 1]} : vector<8x640xf32> to vector<8x4xf32>
    %306 = vector.extract_strided_slice %22 {offsets = [0, 120], sizes = [8, 4], strides = [1, 1]} : vector<8x640xf32> to vector<8x4xf32>
    %307 = vector.extract_strided_slice %23 {offsets = [0, 120], sizes = [8, 4], strides = [1, 1]} : vector<8x640xf32> to vector<8x4xf32>
    %308 = vector.extract_strided_slice %22 {offsets = [0, 184], sizes = [8, 4], strides = [1, 1]} : vector<8x640xf32> to vector<8x4xf32>
    %309 = vector.extract_strided_slice %23 {offsets = [0, 184], sizes = [8, 4], strides = [1, 1]} : vector<8x640xf32> to vector<8x4xf32>
    %310 = vector.extract_strided_slice %22 {offsets = [0, 248], sizes = [8, 4], strides = [1, 1]} : vector<8x640xf32> to vector<8x4xf32>
    %311 = vector.extract_strided_slice %23 {offsets = [0, 248], sizes = [8, 4], strides = [1, 1]} : vector<8x640xf32> to vector<8x4xf32>
    %312 = vector.extract_strided_slice %22 {offsets = [0, 312], sizes = [8, 4], strides = [1, 1]} : vector<8x640xf32> to vector<8x4xf32>
    %313 = vector.extract_strided_slice %23 {offsets = [0, 312], sizes = [8, 4], strides = [1, 1]} : vector<8x640xf32> to vector<8x4xf32>
    %314 = vector.extract_strided_slice %22 {offsets = [0, 376], sizes = [8, 4], strides = [1, 1]} : vector<8x640xf32> to vector<8x4xf32>
    %315 = vector.extract_strided_slice %23 {offsets = [0, 376], sizes = [8, 4], strides = [1, 1]} : vector<8x640xf32> to vector<8x4xf32>
    %316 = vector.extract_strided_slice %22 {offsets = [0, 440], sizes = [8, 4], strides = [1, 1]} : vector<8x640xf32> to vector<8x4xf32>
    %317 = vector.extract_strided_slice %23 {offsets = [0, 440], sizes = [8, 4], strides = [1, 1]} : vector<8x640xf32> to vector<8x4xf32>
    %318 = vector.extract_strided_slice %22 {offsets = [0, 504], sizes = [8, 4], strides = [1, 1]} : vector<8x640xf32> to vector<8x4xf32>
    %319 = vector.extract_strided_slice %23 {offsets = [0, 504], sizes = [8, 4], strides = [1, 1]} : vector<8x640xf32> to vector<8x4xf32>
    %320 = vector.extract_strided_slice %22 {offsets = [0, 568], sizes = [8, 4], strides = [1, 1]} : vector<8x640xf32> to vector<8x4xf32>
    %321 = vector.extract_strided_slice %23 {offsets = [0, 568], sizes = [8, 4], strides = [1, 1]} : vector<8x640xf32> to vector<8x4xf32>
    %322 = vector.extract_strided_slice %22 {offsets = [0, 632], sizes = [8, 4], strides = [1, 1]} : vector<8x640xf32> to vector<8x4xf32>
    %323 = vector.extract_strided_slice %23 {offsets = [0, 632], sizes = [8, 4], strides = [1, 1]} : vector<8x640xf32> to vector<8x4xf32>
    %324 = vector.extract_strided_slice %22 {offsets = [0, 60], sizes = [8, 4], strides = [1, 1]} : vector<8x640xf32> to vector<8x4xf32>
    %325 = vector.extract_strided_slice %23 {offsets = [0, 60], sizes = [8, 4], strides = [1, 1]} : vector<8x640xf32> to vector<8x4xf32>
    %326 = vector.extract_strided_slice %22 {offsets = [0, 124], sizes = [8, 4], strides = [1, 1]} : vector<8x640xf32> to vector<8x4xf32>
    %327 = vector.extract_strided_slice %23 {offsets = [0, 124], sizes = [8, 4], strides = [1, 1]} : vector<8x640xf32> to vector<8x4xf32>
    %328 = vector.extract_strided_slice %22 {offsets = [0, 188], sizes = [8, 4], strides = [1, 1]} : vector<8x640xf32> to vector<8x4xf32>
    %329 = vector.extract_strided_slice %23 {offsets = [0, 188], sizes = [8, 4], strides = [1, 1]} : vector<8x640xf32> to vector<8x4xf32>
    %330 = vector.extract_strided_slice %22 {offsets = [0, 252], sizes = [8, 4], strides = [1, 1]} : vector<8x640xf32> to vector<8x4xf32>
    %331 = vector.extract_strided_slice %23 {offsets = [0, 252], sizes = [8, 4], strides = [1, 1]} : vector<8x640xf32> to vector<8x4xf32>
    %332 = vector.extract_strided_slice %22 {offsets = [0, 316], sizes = [8, 4], strides = [1, 1]} : vector<8x640xf32> to vector<8x4xf32>
    %333 = vector.extract_strided_slice %23 {offsets = [0, 316], sizes = [8, 4], strides = [1, 1]} : vector<8x640xf32> to vector<8x4xf32>
    %334 = vector.extract_strided_slice %22 {offsets = [0, 380], sizes = [8, 4], strides = [1, 1]} : vector<8x640xf32> to vector<8x4xf32>
    %335 = vector.extract_strided_slice %23 {offsets = [0, 380], sizes = [8, 4], strides = [1, 1]} : vector<8x640xf32> to vector<8x4xf32>
    %336 = vector.extract_strided_slice %22 {offsets = [0, 444], sizes = [8, 4], strides = [1, 1]} : vector<8x640xf32> to vector<8x4xf32>
    %337 = vector.extract_strided_slice %23 {offsets = [0, 444], sizes = [8, 4], strides = [1, 1]} : vector<8x640xf32> to vector<8x4xf32>
    %338 = vector.extract_strided_slice %22 {offsets = [0, 508], sizes = [8, 4], strides = [1, 1]} : vector<8x640xf32> to vector<8x4xf32>
    %339 = vector.extract_strided_slice %23 {offsets = [0, 508], sizes = [8, 4], strides = [1, 1]} : vector<8x640xf32> to vector<8x4xf32>
    %340 = vector.extract_strided_slice %22 {offsets = [0, 572], sizes = [8, 4], strides = [1, 1]} : vector<8x640xf32> to vector<8x4xf32>
    %341 = vector.extract_strided_slice %23 {offsets = [0, 572], sizes = [8, 4], strides = [1, 1]} : vector<8x640xf32> to vector<8x4xf32>
    %342 = vector.extract_strided_slice %22 {offsets = [0, 636], sizes = [8, 4], strides = [1, 1]} : vector<8x640xf32> to vector<8x4xf32>
    %343 = vector.extract_strided_slice %23 {offsets = [0, 636], sizes = [8, 4], strides = [1, 1]} : vector<8x640xf32> to vector<8x4xf32>
    %344 = tpu.concatenate %24, %25, %26, %27, %28, %29, %30, %31, %32, %33, %34, %35, %36, %37, %38, %39 in 1 : vector<8x4xf32>, vector<8x4xf32>, vector<8x4xf32>, vector<8x4xf32>, vector<8x4xf32>, vector<8x4xf32>, vector<8x4xf32>, vector<8x4xf32>, vector<8x4xf32>, vector<8x4xf32>, vector<8x4xf32>, vector<8x4xf32>, vector<8x4xf32>, vector<8x4xf32>, vector<8x4xf32>, vector<8x4xf32> -> vector<8x64xf32>
    %345 = tpu.concatenate %40, %41, %42, %43, %44, %45, %46, %47, %48, %49, %50, %51, %52, %53, %54, %55 in 1 : vector<8x4xf32>, vector<8x4xf32>, vector<8x4xf32>, vector<8x4xf32>, vector<8x4xf32>, vector<8x4xf32>, vector<8x4xf32>, vector<8x4xf32>, vector<8x4xf32>, vector<8x4xf32>, vector<8x4xf32>, vector<8x4xf32>, vector<8x4xf32>, vector<8x4xf32>, vector<8x4xf32>, vector<8x4xf32> -> vector<8x64xf32>
    %346 = tpu.concatenate %56, %57, %58, %59, %60, %61, %62, %63, %64, %65, %66, %67, %68, %69, %70, %71 in 1 : vector<8x4xf32>, vector<8x4xf32>, vector<8x4xf32>, vector<8x4xf32>, vector<8x4xf32>, vector<8x4xf32>, vector<8x4xf32>, vector<8x4xf32>, vector<8x4xf32>, vector<8x4xf32>, vector<8x4xf32>, vector<8x4xf32>, vector<8x4xf32>, vector<8x4xf32>, vector<8x4xf32>, vector<8x4xf32> -> vector<8x64xf32>
    %347 = tpu.concatenate %72, %73, %74, %75, %76, %77, %78, %79, %80, %81, %82, %83, %84, %85, %86, %87 in 1 : vector<8x4xf32>, vector<8x4xf32>, vector<8x4xf32>, vector<8x4xf32>, vector<8x4xf32>, vector<8x4xf32>, vector<8x4xf32>, vector<8x4xf32>, vector<8x4xf32>, vector<8x4xf32>, vector<8x4xf32>, vector<8x4xf32>, vector<8x4xf32>, vector<8x4xf32>, vector<8x4xf32>, vector<8x4xf32> -> vector<8x64xf32>
    %348 = tpu.concatenate %88, %89, %90, %91, %92, %93, %94, %95, %96, %97, %98, %99, %100, %101, %102, %103 in 1 : vector<8x4xf32>, vector<8x4xf32>, vector<8x4xf32>, vector<8x4xf32>, vector<8x4xf32>, vector<8x4xf32>, vector<8x4xf32>, vector<8x4xf32>, vector<8x4xf32>, vector<8x4xf32>, vector<8x4xf32>, vector<8x4xf32>, vector<8x4xf32>, vector<8x4xf32>, vector<8x4xf32>, vector<8x4xf32> -> vector<8x64xf32>
    %349 = tpu.concatenate %104, %105, %106, %107, %108, %109, %110, %111, %112, %113, %114, %115, %116, %117, %118, %119 in 1 : vector<8x4xf32>, vector<8x4xf32>, vector<8x4xf32>, vector<8x4xf32>, vector<8x4xf32>, vector<8x4xf32>, vector<8x4xf32>, vector<8x4xf32>, vector<8x4xf32>, vector<8x4xf32>, vector<8x4xf32>, vector<8x4xf32>, vector<8x4xf32>, vector<8x4xf32>, vector<8x4xf32>, vector<8x4xf32> -> vector<8x64xf32>
    %350 = tpu.concatenate %120, %121, %122, %123, %124, %125, %126, %127, %128, %129, %130, %131, %132, %133, %134, %135 in 1 : vector<8x4xf32>, vector<8x4xf32>, vector<8x4xf32>, vector<8x4xf32>, vector<8x4xf32>, vector<8x4xf32>, vector<8x4xf32>, vector<8x4xf32>, vector<8x4xf32>, vector<8x4xf32>, vector<8x4xf32>, vector<8x4xf32>, vector<8x4xf32>, vector<8x4xf32>, vector<8x4xf32>, vector<8x4xf32> -> vector<8x64xf32>
    %351 = tpu.concatenate %136, %137, %138, %139, %140, %141, %142, %143, %144, %145, %146, %147, %148, %149, %150, %151 in 1 : vector<8x4xf32>, vector<8x4xf32>, vector<8x4xf32>, vector<8x4xf32>, vector<8x4xf32>, vector<8x4xf32>, vector<8x4xf32>, vector<8x4xf32>, vector<8x4xf32>, vector<8x4xf32>, vector<8x4xf32>, vector<8x4xf32>, vector<8x4xf32>, vector<8x4xf32>, vector<8x4xf32>, vector<8x4xf32> -> vector<8x64xf32>
    %352 = tpu.concatenate %152, %153, %154, %155, %156, %157, %158, %159, %160, %161, %162, %163, %164, %165, %166, %167 in 1 : vector<8x4xf32>, vector<8x4xf32>, vector<8x4xf32>, vector<8x4xf32>, vector<8x4xf32>, vector<8x4xf32>, vector<8x4xf32>, vector<8x4xf32>, vector<8x4xf32>, vector<8x4xf32>, vector<8x4xf32>, vector<8x4xf32>, vector<8x4xf32>, vector<8x4xf32>, vector<8x4xf32>, vector<8x4xf32> -> vector<8x64xf32>
    %353 = tpu.concatenate %168, %169, %170, %171, %172, %173, %174, %175, %176, %177, %178, %179, %180, %181, %182, %183 in 1 : vector<8x4xf32>, vector<8x4xf32>, vector<8x4xf32>, vector<8x4xf32>, vector<8x4xf32>, vector<8x4xf32>, vector<8x4xf32>, vector<8x4xf32>, vector<8x4xf32>, vector<8x4xf32>, vector<8x4xf32>, vector<8x4xf32>, vector<8x4xf32>, vector<8x4xf32>, vector<8x4xf32>, vector<8x4xf32> -> vector<8x64xf32>
    %354 = tpu.concatenate %184, %185, %186, %187, %188, %189, %190, %191, %192, %193, %194, %195, %196, %197, %198, %199 in 1 : vector<8x4xf32>, vector<8x4xf32>, vector<8x4xf32>, vector<8x4xf32>, vector<8x4xf32>, vector<8x4xf32>, vector<8x4xf32>, vector<8x4xf32>, vector<8x4xf32>, vector<8x4xf32>, vector<8x4xf32>, vector<8x4xf32>, vector<8x4xf32>, vector<8x4xf32>, vector<8x4xf32>, vector<8x4xf32> -> vector<8x64xf32>
    %355 = tpu.concatenate %200, %201, %202, %203, %204, %205, %206, %207, %208, %209, %210, %211, %212, %213, %214, %215 in 1 : vector<8x4xf32>, vector<8x4xf32>, vector<8x4xf32>, vector<8x4xf32>, vector<8x4xf32>, vector<8x4xf32>, vector<8x4xf32>, vector<8x4xf32>, vector<8x4xf32>, vector<8x4xf32>, vector<8x4xf32>, vector<8x4xf32>, vector<8x4xf32>, vector<8x4xf32>, vector<8x4xf32>, vector<8x4xf32> -> vector<8x64xf32>
    %356 = tpu.concatenate %216, %217, %218, %219, %220, %221, %222, %223, %224, %225, %226, %227, %228, %229, %230, %231 in 1 : vector<8x4xf32>, vector<8x4xf32>, vector<8x4xf32>, vector<8x4xf32>, vector<8x4xf32>, vector<8x4xf32>, vector<8x4xf32>, vector<8x4xf32>, vector<8x4xf32>, vector<8x4xf32>, vector<8x4xf32>, vector<8x4xf32>, vector<8x4xf32>, vector<8x4xf32>, vector<8x4xf32>, vector<8x4xf32> -> vector<8x64xf32>
    %357 = tpu.concatenate %232, %233, %234, %235, %236, %237, %238, %239, %240, %241, %242, %243, %244, %245, %246, %247 in 1 : vector<8x4xf32>, vector<8x4xf32>, vector<8x4xf32>, vector<8x4xf32>, vector<8x4xf32>, vector<8x4xf32>, vector<8x4xf32>, vector<8x4xf32>, vector<8x4xf32>, vector<8x4xf32>, vector<8x4xf32>, vector<8x4xf32>, vector<8x4xf32>, vector<8x4xf32>, vector<8x4xf32>, vector<8x4xf32> -> vector<8x64xf32>
    %358 = tpu.concatenate %248, %249, %250, %251, %252, %253, %254, %255, %256, %257, %258, %259, %260, %261, %262, %263 in 1 : vector<8x4xf32>, vector<8x4xf32>, vector<8x4xf32>, vector<8x4xf32>, vector<8x4xf32>, vector<8x4xf32>, vector<8x4xf32>, vector<8x4xf32>, vector<8x4xf32>, vector<8x4xf32>, vector<8x4xf32>, vector<8x4xf32>, vector<8x4xf32>, vector<8x4xf32>, vector<8x4xf32>, vector<8x4xf32> -> vector<8x64xf32>
    %359 = tpu.concatenate %264, %265, %266, %267, %268, %269, %270, %271, %272, %273, %274, %275, %276, %277, %278, %279 in 1 : vector<8x4xf32>, vector<8x4xf32>, vector<8x4xf32>, vector<8x4xf32>, vector<8x4xf32>, vector<8x4xf32>, vector<8x4xf32>, vector<8x4xf32>, vector<8x4xf32>, vector<8x4xf32>, vector<8x4xf32>, vector<8x4xf32>, vector<8x4xf32>, vector<8x4xf32>, vector<8x4xf32>, vector<8x4xf32> -> vector<8x64xf32>
    %360 = tpu.concatenate %280, %281, %282, %283, %284, %285, %286, %287, %288, %289, %290, %291, %292, %293, %294, %295 in 1 : vector<8x4xf32>, vector<8x4xf32>, vector<8x4xf32>, vector<8x4xf32>, vector<8x4xf32>, vector<8x4xf32>, vector<8x4xf32>, vector<8x4xf32>, vector<8x4xf32>, vector<8x4xf32>, vector<8x4xf32>, vector<8x4xf32>, vector<8x4xf32>, vector<8x4xf32>, vector<8x4xf32>, vector<8x4xf32> -> vector<8x64xf32>
    %361 = tpu.concatenate %296, %297, %298, %299, %300, %301, %302, %303, %304, %305, %306, %307, %308, %309, %310, %311 in 1 : vector<8x4xf32>, vector<8x4xf32>, vector<8x4xf32>, vector<8x4xf32>, vector<8x4xf32>, vector<8x4xf32>, vector<8x4xf32>, vector<8x4xf32>, vector<8x4xf32>, vector<8x4xf32>, vector<8x4xf32>, vector<8x4xf32>, vector<8x4xf32>, vector<8x4xf32>, vector<8x4xf32>, vector<8x4xf32> -> vector<8x64xf32>
    %362 = tpu.concatenate %312, %313, %314, %315, %316, %317, %318, %319, %320, %321, %322, %323, %324, %325, %326, %327 in 1 : vector<8x4xf32>, vector<8x4xf32>, vector<8x4xf32>, vector<8x4xf32>, vector<8x4xf32>, vector<8x4xf32>, vector<8x4xf32>, vector<8x4xf32>, vector<8x4xf32>, vector<8x4xf32>, vector<8x4xf32>, vector<8x4xf32>, vector<8x4xf32>, vector<8x4xf32>, vector<8x4xf32>, vector<8x4xf32> -> vector<8x64xf32>
    %363 = tpu.concatenate %328, %329, %330, %331, %332, %333, %334, %335, %336, %337, %338, %339, %340, %341, %342, %343 in 1 : vector<8x4xf32>, vector<8x4xf32>, vector<8x4xf32>, vector<8x4xf32>, vector<8x4xf32>, vector<8x4xf32>, vector<8x4xf32>, vector<8x4xf32>, vector<8x4xf32>, vector<8x4xf32>, vector<8x4xf32>, vector<8x4xf32>, vector<8x4xf32>, vector<8x4xf32>, vector<8x4xf32>, vector<8x4xf32> -> vector<8x64xf32>
    %364 = tpu.concatenate %344, %345, %346, %347, %348, %349, %350, %351, %352, %353, %354, %355, %356, %357, %358, %359 in 1 : vector<8x64xf32>, vector<8x64xf32>, vector<8x64xf32>, vector<8x64xf32>, vector<8x64xf32>, vector<8x64xf32>, vector<8x64xf32>, vector<8x64xf32>, vector<8x64xf32>, vector<8x64xf32>, vector<8x64xf32>, vector<8x64xf32>, vector<8x64xf32>, vector<8x64xf32>, vector<8x64xf32>, vector<8x64xf32> -> vector<8x1024xf32>
    %365 = tpu.concatenate %360, %361, %362, %363 in 1 : vector<8x64xf32>, vector<8x64xf32>, vector<8x64xf32>, vector<8x64xf32> -> vector<8x256xf32>
    %366 = tpu.concatenate %364, %365 in 1 : vector<8x1024xf32>, vector<8x256xf32> -> vector<8x1280xf32>
    %c0_10 = arith.constant 0 : index
    %c0_11 = arith.constant 0 : index
    %367 = vector.load %arg2[%c0_10, %c0_11] : memref<8x1280xf32, #tpu.memory_space<vmem>>, vector<8x1280xf32>
    tpu.vector_store %arg2[%c0_10, %c0_11], %366 {strides = array<i32>} : memref<8x1280xf32, #tpu.memory_space<vmem>>, vector<8x1280xf32>,
    return
  }
  func.func @transform_0(%arg0: i32) -> (i32, i32) {
    %c0_i32 = arith.constant 0 : i32
    %c0_i32_0 = arith.constant 0 : i32
    return %arg0, %c0_i32 : i32, i32
  }
  func.func @transform_1(%arg0: i32) -> (i32, i32) {
    %c0_i32 = arith.constant 0 : i32
    %c0_i32_0 = arith.constant 0 : i32
    return %arg0, %c0_i32 : i32, i32
  }
}

</mosaic_0001>

<bundles_post_ra>
// kernel: tpu_custom_call.1
= control target key start
LH: loop header
LB: loop body
LE: loop exit
PB: predicated region body
PF: predicated region fallthrough
CT: control target
= control target key end

     0   :  { %6 = vsyncpa [#allocation3], 0  ;;  %s5242_s0 = inlined_call_operand.hbm [shape: f32[16,64], index: 0, kind: input, shape index: {}]   ;;  %s5243_s1 = inlined_call_operand.hbm [shape: f32[16,1280], index: 1, kind: output, shape index: {}]  }
   0x1   :  { %8 = vsyncpa [#allocation3 + $0x1], 0 }
   0x2   :  { %9 = vsyncpa [#allocation4], 0 }
   0x3   :  { %11 = vsyncpa [#allocation4 + $0x1], 0  ;;  %s3161_s6 = smov 0   ;;  %s3163_s7 = smov 0  }
   0x4   :  { %s3165_s8 = smov 0   ;;  %s3167_s9 = smov 0  }
   0x5 LB: > { %s3182_s10 = sadd.s32 4294967295, %s3111_s9   ;;  %s2889_s11 = sadd.s32 4294967294, %s3111_s9   ;;  %s3111_s9 = sphi %s3167_s9, %s5523_s9   ;;  %s3107_s8 = sphi %s3165_s8, %s5522_s8   ;;  %s3103_s7 = sphi %s3163_s7, %s5521_s7   ;;  %s3099_s6 = sphi %s3161_s6, %s5520_s6  }
   0x6   : > { %s3186_s12 = sadd.s32 1, %s3111_s9   ;;  %s24_s13 = sadd.s32 1, %s3107_s8 }
   0x7   : > { %s21_s14 = ssub.s32 %s3111_s9, %s3186_s12  ;;  %p31_p0 = scmp.ne.s32.totalorder %s3107_s8, %s3103_s7 }
   0x8   : > { %p22_p1 = scmp.eq.s32.totalorder %s21_s14, 0  ;;  %p32_p2 = scmp.eq.s32.totalorder %s3111_s9, 0 }
   0x9   : > { %p37_p3 = scmp.ne.s32.totalorder %s3103_s7, %s3099_s6  ;;  %p38_p4 = scmp.eq.s32.totalorder %s3182_s10, 0 }
   0xa   : > { %s3198_s15 = scalar_select %p22_p1, %s3107_s8, %s24_s13  }
   0xb   : > { %p3200_p5 = por %p32_p2, %p31_p0  ;;  %p3204_p6 = por %p38_p4, %p37_p3 }
   0xc   : > { %p61_p7 = scmp.eq.s32.totalorder %s3182_s10, 1  ;;  %p67_p8 = scmp.eq.s32.totalorder %s2889_s11, 1 }
   0xd   : > { %p2943_p10 = scmp.lt.s32.totalorder %s3111_s9, 2  ;;  %s87_s20 = sand.u32 1, %s3107_s8  }
   0xe   : > { %p3211_p11 = por %p61_p7, %p31_p0  ;;  %p3215_p12 = por %p67_p8, %p37_p3 }
   0xf   : > { %s2893_s21 = sshll.u32 %s3111_s9, 3  ;;  %s2892_s22 = sshll.u32 %s87_s20, 3 }
  0x10   : > { %s95_s25 = scalar_lea.hbm %s5242_s0, %s2893_s21  ;;  %s91_s27 = scalar_lea.vmem [#allocation2], %s2892_s22 }
  0x11   : > { %s97_s26 = sshll.u32 %s95_s25, 4  ;;  %s99_s28 = sshll.u32 %s91_s27, 4  ;;  %s98_s26 = int_to_ptr.hbm [resolvable:$true] %s97_s26  ;;  %s100_s28 = int_to_ptr.vmem [resolvable:$true] %s99_s28 }
  0x12   : > { %p3226_p13 = pnand %p2943_p10, %p3200_p5  ;;  %p2894_p0 = scmp.ge.s32.totalorder %s3111_s9, 1 }
  0x13   : > { %p104_p1 = scmp.lt.s32.totalorder %s3111_s9, 3  ;;  %s88_s30 = scalar_lea.sflag [#allocation3], %s87_s20 }
  0x14   : > { %s3015_s2 = sshra.s32 %s98_s26, 4  ;;  %p3019_p3 = pneg %p3226_p13  ;;  %s3016_s2 = int_to_ptr.hbm [resolvable:$true] %s3015_s2 }
  0x15   : > { %s3017_s3 = scalar_lea.hbm %s3016_s2, 8  ;;  %s3022_s11 = scalar_lea.hbm %s5242_s0, 16 }
  0x16   : > { %p3018_p2 = scmp.ne.s32.totalorder %s3016_s2, %s3017_s3  ;;  %p3023_p5 = scmp.lt.s32.totalorder %s3016_s2, %s5242_s0 }
  0x17   : > { %p3024_p8 = scmp.lt.s32.totalorder %s3022_s11, %s3017_s3 }
  0x18   : > { %p3020_p4 = pnand %p3019_p3, %p3018_p2 }
  0x19   : > { %p3025_p10 = por %p3024_p8, %p3023_p5 }
  0x1a   : > { %p3021_p7 = pneg %p3020_p4 }
  0x1c   : > { %p3026_p9 = pnand %p3025_p10, %p3021_p7 }
  0x1e   : > { %3029 = shalt.err (!%p3026_p9)
}
  0x1f   : > { %2938 = dma.hbm_to_vmem [thread:$0]  (!%p3226_p13), %s98_s26, 128, %s100_s28, %s88_s30  }
  0x20   : > { %p105_p2 = pnand %p2894_p0, %p104_p1 }
  0x22   : > { %108 = sbr.rel (%p105_p2) target bundleno = 1186 (0x4a2), region = 24 }
  0x27   : > { %s3247_s16 = sand.u32 1, %s3103_s7  }
  0x28   : > { %s2895_s20 = sshll.u32 %s3247_s16, 3  ;;  %s111_s21 = scalar_lea.sflag [#allocation3], %s3247_s16 }
  0x29   : > { %s114_s22 = scalar_lea.vmem [#allocation2], %s2895_s20 }
  0x2a   : > { %3090 = dma.done.wait (%p3204_p6), %s111_s21, 128  }
  0x2b   : > { %3092 = vsyncadd (%p3204_p6), %s111_s21, 4294967168  ;;  %v3255_v0 = vld [vmem:[%s114_s22] sm:$0xff]  ;;  %s5277_s23 = smov 64   ;;  %vm164_vm0 = vcmask 523264   ;;  %v3114_v29 = vmov 2475754826  }
  0x2c   : > { %v143_v1 = vmul.f32 512.0, %v3255_v0  ;;  %v139_v2 = vmul.f32 32.0, %v3255_v0  ;;  %v135_v3 = vmul.f32 2.0, %v3255_v0  ;;  %v141_v4 = vmul.f32 128.0, %v3255_v0  ;;  %s5289_s17 = smov 76   ;;  %s5287_s24 = smov 4  }
  0x2d   : > { %v137_v5 = vmul.f32 8.0, %v3255_v0  ;;  %v142_v6 = vmul.f32 256.0, %v3255_v0  ;;  %v138_v11 = vmul.f32 16.0, %v3255_v0  ;;  %v3115_v31 = vmov 2131351028   ;;  %s5267_s25 = smov 72  }
  0x2e   : > { %161 = vrot.lane.b32.xlu2 %v143_v1, %s5277_s23  ;;  %153 = vrot.lane.b32.xlu1 %v139_v2, %s5277_s23  ;;  %v3116_v38 = vmov 2102212464   ;;  %v5247_v40 = vmov 920167782   ;;  %v3118_v43 = vmov 683565275  }
  0x2f   : > { %145 = vrot.lane.b32.xlu0 %v135_v3, %s5277_s23  ;;  %v5250_v49 = vmov 1326507024   ;;  %s5255_s26 = smov 20   ;;  %s5269_s27 = smov 88  }
  0x30   : > { %s5265_s28 = smov 16   ;;  %s5259_s29 = smov 32  }
  0x31   : > { %s5302_s30 = smov 36   ;;  %s5257_s2 = smov 92  }
  0x32   : > { %s5294_s3 = smov 108   ;;  %s5261_s4 = smov 48  }
  0x33   : > { %s5263_s5 = smov 104   ;;  %s5275_s11 = smov 120  }
  0x34   : > { %s5303_s13 = smov 124   ;;  %s5253_s14 = smov 52  }
  0x35   : > { %s5320_s20 = smov 84   ;;  %s5322_s21 = smov 12  }
  0x36   : > { %157 = vrot.lane.b32.xlu1 %v141_v4, %s5277_s23  ;;  %s3138_s22 = smov 28  }
  0x37   : > { %149 = vrot.lane.b32.xlu0 %v137_v5, %s5277_s23 }
  0x88   : > { %v162_v7 = vpop.permute.xlu2 %161 }
  0x89   : > { %v3269_v8 = vsel %vm164_vm0, %v142_v6, %v162_v7 }
  0x8a   : > { %v793_v9 = vand.u32 2139095040, %v3269_v8  ;;  %v5244_v21 = vand.u32 2147483647, %v3269_v8 }
  0x8c   : > { %v794_v10 = vshrl.u32 %v793_v9, 23  ;;  %v3281_v26 = vand.u32 8388607, %v5244_v21 }
  0x8e   : > { %v2908_v12 = vadd.s32 4294967169, %v794_v10 }
  0x90   : > { %v800_v15 = vadd.s32 1, %v2908_v12 }
  0x92   : > { %vm801_vm1 = vcmp.gt.s32.totalorder %v800_v15, 0 }
  0x93   : > { %v802_v18 = vsel %vm801_vm1, %v800_v15, 0 }
  0x94   : > { %v804_v22 = vand.u32 31, %v802_v18  ;;  %v3283_v27 = vshrl.u32 %v802_v18, 5 }
  0x96   : > { %v3285_v28 = vsub.s32 32, %v804_v22  ;;  %v810_v30 = vshll.u32 %v3114_v29, %v804_v22  ;;  %v813_v32 = vshll.u32 %v3115_v31, %v804_v22  ;;  %v819_v53 = vshll.u32 %v5247_v40, %v804_v22 }
  0x97   : > { %v807_v2 = vshll.u32 %v3118_v43, %v804_v22  ;;  %v816_v3 = vshll.u32 %v3116_v38, %v804_v22  ;;  %vm825_vm6 = vcmp.lt.s32.totalorder %v3283_v27, 4  ;;  %vm822_vm8 = vcmp.lt.s32.totalorder %v3283_v27, 1 }
  0x98   : > { %v811_v52 = vshrl.u32 %v3115_v31, %v3285_v28  ;;  %v820_v54 = vshrl.u32 %v5250_v49, %v3285_v28  ;;  %v814_v61 = vshrl.u32 %v3116_v38, %v3285_v28  ;;  %v817_v4 = vshrl.u32 %v5247_v40, %v3285_v28 }
  0x99   : > { %v808_v9 = vshrl.u32 %v3114_v29, %v3285_v28  ;;  %vm824_vm9 = vcmp.lt.s32.totalorder %v3283_v27, 3  ;;  %vm823_vm10 = vcmp.lt.s32.totalorder %v3283_v27, 2 }
  0x9a   : > { %v821_v5 = vor.u32 %v820_v54, %v819_v53  ;;  %v3358_v15 = vor.u32 %v814_v61, %v813_v32 }
  0x9c   : > { %v835_v18 = vsel %vm825_vm6, %v821_v5, 1326507024 }
  0xa0   : > { %v154_v13 = vpop.permute.xlu1 %153 }
  0xa1   : > { %v3274_v14 = vsel %vm164_vm0, %v138_v11, %v154_v13  ;;  %v146_v35 = vpop.permute.xlu0 %145  ;;  %v3356_v13 = vor.u32 %v811_v52, %v810_v30 }
  0xa2   : > { %v483_v16 = vand.u32 2139095040, %v3274_v14  ;;  %v5245_v24 = vand.u32 2147483647, %v3274_v14  ;;  %v3312_v51 = vsel %vm164_vm0, %v3255_v0, %v146_v35 }
  0xa3   : > { %v173_v60 = vand.u32 2139095040, %v3312_v51  ;;  %v834_v30 = vsel %vm822_vm8, %v3356_v13, %v3358_v15 }
  0xa4   : > { %v484_v17 = vshrl.u32 %v483_v16, 23  ;;  %v487_v42 = vand.u32 8388607, %v5245_v24 }
  0xa5   : > { %v174_v12 = vshrl.u32 %v173_v60, 23 }
  0xa6   : > { %v2902_v19 = vadd.s32 4294967169, %v484_v17  ;;  %v488_v62 = vor.u32 8388608, %v487_v42  ;;  %v818_v17 = vor.u32 %v817_v4, %v816_v3 }
  0xa8   : > { %v490_v20 = vadd.s32 1, %v2902_v19  ;;  %v3361_v16 = vshll.u32 %v488_v62, 8  ;;  %v836_v32 = vsel %vm824_vm9, %v818_v17, %v835_v18 }
  0xa9   : > { %v837_v42 = vsel %vm823_vm10, %v834_v30, %v836_v32 }
  0xaa   : > { %vm491_vm2 = vcmp.gt.s32.totalorder %v490_v20, 0 }
  0xab   : > { %v492_v23 = vsel %vm491_vm2, %v490_v20, 0  ;;  %v798_v20 = vor.u32 8388608, %v3281_v26  ;;  %v831_v26 = vsel %vm825_vm6, %v818_v17, 920167782 }
  0xac   : > { %v494_v25 = vand.u32 31, %v492_v23  ;;  %v3292_v36 = vshrl.u32 %v492_v23, 5  ;;  %v3371_v23 = vor.u32 %v808_v9, %v807_v2 }
  0xae   : > { %v3289_v33 = vsub.s32 32, %v494_v25  ;;  %v500_v34 = vshll.u32 %v3114_v29, %v494_v25  ;;  %v503_v37 = vshll.u32 %v3115_v31, %v494_v25  ;;  %v506_v39 = vshll.u32 %v3116_v38, %v494_v25 }
  0xaf   : > { %v509_v41 = vshll.u32 %v5247_v40, %v494_v25  ;;  %v497_v44 = vshll.u32 %v3118_v43, %v494_v25  ;;  %vm515_vm3 = vcmp.lt.s32.totalorder %v3292_v36, 4  ;;  %vm512_vm4 = vcmp.lt.s32.totalorder %v3292_v36, 1 }
  0xb0   : > { %v498_v45 = vshrl.u32 %v3114_v29, %v3289_v33  ;;  %v501_v46 = vshrl.u32 %v3115_v31, %v3289_v33  ;;  %v504_v47 = vshrl.u32 %v3116_v38, %v3289_v33  ;;  %v507_v48 = vshrl.u32 %v5247_v40, %v3289_v33 }
  0xb1   : > { %v510_v50 = vshrl.u32 %v5250_v49, %v3289_v33  ;;  %vm514_vm5 = vcmp.lt.s32.totalorder %v3292_v36, 3  ;;  %vm513_vm7 = vcmp.lt.s32.totalorder %v3292_v36, 2  ;;  %v2896_v25 = vadd.s32 4294967169, %v174_v12 }
  0xb2   : > { %v3319_v55 = vor.u32 %v501_v46, %v500_v34  ;;  %v3321_v56 = vor.u32 %v504_v47, %v503_v37  ;;  %v508_v57 = vor.u32 %v507_v48, %v506_v39  ;;  %v3324_v59 = vor.u32 %v498_v45, %v497_v44 }
  0xb3   : > { %v511_v58 = vor.u32 %v510_v50, %v509_v41  ;;  %v529_v34 = vand.u32 65535, %v3361_v16  ;;  %v3383_v39 = vshll.u32 %v798_v20, 8  ;;  %v830_v41 = vsel %vm822_vm8, %v3371_v23, %v3356_v13 }
  0xb4   : > { %v521_v63 = vsel %vm515_vm3, %v508_v57, 920167782  ;;  %v524_v6 = vsel %vm512_vm4, %v3319_v55, %v3321_v56  ;;  %v520_v10 = vsel %vm512_vm4, %v3324_v59, %v3319_v55  ;;  %v180_v44 = vadd.s32 1, %v2896_v25 }
  0xb5   : > { %v525_v1 = vsel %vm515_vm3, %v511_v58, 1326507024  ;;  %v522_v11 = vsel %vm514_vm5, %v3321_v56, %v521_v63  ;;  %v832_v45 = vsel %vm824_vm9, %v3358_v15, %v831_v26  ;;  %v530_v46 = vshrl.u32 %v3361_v16, 16 }
  0xb6   : > { %v526_v7 = vsel %vm514_vm5, %v508_v57, %v525_v1  ;;  %v523_v22 = vsel %vm513_vm7, %v520_v10, %v522_v11  ;;  %v839_v53 = vand.u32 65535, %v3383_v39  ;;  %v3401_v54 = vshrl.u32 %v3383_v39, 16 }
  0xb7   : > { %v527_v19 = vsel %vm513_vm7, %v524_v6, %v526_v7  ;;  %v554_v37 = vshrl.u32 %v523_v22, 16  ;;  %v553_v50 = vand.u32 65535, %v523_v22  ;;  %v841_v57 = vand.u32 65535, %v837_v42 }
  0xb8   : > { %v532_v35 = vshrl.u32 %v527_v19, 16  ;;  %v531_v47 = vand.u32 65535, %v527_v19  ;;  %v842_v58 = vshrl.u32 %v837_v42, 16  ;;  %v3405_v60 = vsel %vm823_vm10, %v830_v41, %v832_v45 }
  0xb9   : > { %v3397_v52 = vmul.u32 %v554_v37, %v529_v34  ;;  %vm181_vm11 = vcmp.gt.s32.totalorder %v180_v44, 0  ;;  %v863_v61 = vand.u32 65535, %v3405_v60  ;;  %v555_v2 = vmul.u32 %v553_v50, %v529_v34 }
  0xba   : > { %v3395_v48 = vmul.u32 %v532_v35, %v529_v34  ;;  %v533_v62 = vmul.u32 %v531_v47, %v529_v34  ;;  %v3408_v63 = vmul.u32 %v531_v47, %v530_v46  ;;  %v3411_v3 = vmul.u32 %v553_v50, %v530_v46 }
  0xbb   : > { %v559_v4 = vshll.u32 %v3397_v52, 16  ;;  %v182_v5 = vsel %vm181_vm11, %v180_v44, 0  ;;  %v3414_v6 = vmul.u32 %v842_v58, %v839_v53  ;;  %v3417_v7 = vmul.u32 %v841_v57, %v3401_v54 }
  0xbc   : > { %v537_v1 = vshll.u32 %v3395_v48, 16  ;;  %v5252_v9 = vshrl.u32 %v3405_v60, 16  ;;  %v843_v10 = vmul.u32 %v841_v57, %v839_v53  ;;  %v3421_v11 = vmul.u32 %v842_v58, %v3401_v54 }
  0xbd   : > { %v5246_v12 = vand.u32 2147483647, %v3312_v51  ;;  %v184_v17 = vand.u32 31, %v182_v5  ;;  %v865_v18 = vmul.u32 %v863_v61, %v839_v53  ;;  %v539_v19 = vshll.u32 %v3408_v63, 16 }
  0xbe   : > { %vm541_vm12 = vc.u32 %v533_v62, %v537_v1  ;;  %v543_v20 = vadd.s32 %v537_v1, %v533_v62  ;;  %v5249_v22 = vshll.u32 %v3411_v3, 16  ;;  %vm563_vm13 = vc.u32 %v555_v2, %v559_v4 }
  0xbf   : > { %v3426_v25 = vadd.s32 %v559_v4, %v555_v2  ;;  %v3428_v30 = vsub.s32 32, %v184_v17  ;;  %v847_v32 = vshll.u32 %v3414_v6, 16  ;;  %v849_v34 = vshll.u32 %v3417_v7, 16 }
  0xc0   : > { %v3434_v26 = vmul.u32 %v5252_v9, %v839_v53  ;;  %v3437_v41 = vmul.u32 %v863_v61, %v3401_v54  ;;  %v536_v42 = vmul.u32 %v532_v35, %v530_v46  ;;  %v3120_v44 = vmov 0  }
  0xc1   : > { %v542_v45 = vsel %vm541_vm12, 1, %v3120_v44  ;;  %v558_v47 = vmul.u32 %v554_v37, %v530_v46  ;;  %v177_v50 = vand.u32 8388607, %v5246_v12  ;;  %vm3442_vm14 = vc.u32 %v543_v20, %v539_v19 }
  0xc2   : > { %v564_v58 = vsel %vm563_vm13, 1, %v3120_v44  ;;  %v191_v53 = vshrl.u32 %v3115_v31, %v3428_v30  ;;  %v194_v61 = vshrl.u32 %v3116_v38, %v3428_v30  ;;  %vm567_vm15 = vc.u32 %v3426_v25, %v5249_v22 }
  0xc3   : > { %v197_v35 = vshrl.u32 %v5247_v40, %v3428_v30  ;;  %v199_v37 = vshll.u32 %v5247_v40, %v184_v17  ;;  %v200_v46 = vshrl.u32 %v5250_v49, %v3428_v30  ;;  %v3459_v62 = vshrl.u32 %v182_v5, 5 }
  0xc4   : > { %v190_v1 = vshll.u32 %v3114_v29, %v184_v17  ;;  %v193_v2 = vshll.u32 %v3115_v31, %v184_v17  ;;  %v196_v4 = vshll.u32 %v3116_v38, %v184_v17  ;;  %v544_v19 = vadd.s32 %v542_v45, %v536_v42 }
  0xc5   : > { %v566_v20 = vadd.s32 %v564_v58, %v558_v47  ;;  %v188_v21 = vshrl.u32 %v3114_v29, %v3428_v30  ;;  %v201_v24 = vor.u32 %v200_v46, %v199_v37  ;;  %v568_v12 = vsel %vm567_vm15, 1, %v3120_v44 }
  0xc6   : > { %v3467_v40 = vor.u32 %v191_v53, %v190_v1  ;;  %v3469_v22 = vor.u32 %v194_v61, %v193_v2  ;;  %v198_v5 = vor.u32 %v197_v35, %v196_v4  ;;  %v869_v49 = vshll.u32 %v3434_v26, 16 }
  0xc7   : > { %v871_v9 = vshll.u32 %v3437_v41, 16  ;;  %v546_v42 = vsel %vm3442_vm14, 1, %v3120_v44  ;;  %v187_v45 = vshll.u32 %v3118_v43, %v184_v17  ;;  %vm851_vm1 = vc.u32 %v843_v10, %v847_v32 }
  0xc8   : > { %v853_v47 = vadd.s32 %v847_v32, %v843_v10  ;;  %v178_v58 = vor.u32 8388608, %v177_v50  ;;  %vm205_vm2 = vcmp.lt.s32.totalorder %v3459_v62, 4  ;;  %v570_v53 = vadd.s32 %v568_v12, %v566_v20 }
  0xc9   : > { %v3478_v37 = vor.u32 %v188_v21, %v187_v45  ;;  %vm202_vm11 = vcmp.lt.s32.totalorder %v3459_v62, 1  ;;  %v215_v61 = vsel %vm205_vm2, %v201_v24, 1326507024  ;;  %v548_v35 = vadd.s32 %v546_v42, %v544_v19 }
  0xca   : > { %vm204_vm12 = vcmp.lt.s32.totalorder %v3459_v62, 3  ;;  %v211_v57 = vsel %vm205_vm2, %v198_v5, 920167782  ;;  %v214_v10 = vsel %vm202_vm11, %v3467_v40, %v3469_v22  ;;  %v852_v12 = vsel %vm851_vm1, 1, %v3120_v44 }
  0xcb   : > { %v3491_v21 = vadd.s32 %v869_v49, %v865_v18  ;;  %v560_v17 = vshrl.u32 %v3397_v52, 16  ;;  %v216_v24 = vsel %vm204_vm12, %v198_v5, %v215_v61  ;;  %vm873_vm13 = vc.u32 %v865_v18, %v869_v49 }
  0xcc   : > { %v538_v32 = vshrl.u32 %v3395_v48, 16  ;;  %vm203_vm14 = vcmp.lt.s32.totalorder %v3459_v62, 2  ;;  %v3498_v50 = vshll.u32 %v178_v58, 8  ;;  %v210_v1 = vsel %vm202_vm11, %v3478_v37, %v3467_v40 }
  0xcd   : > { %v571_v46 = vadd.s32 %v570_v53, %v560_v17  ;;  %v212_v52 = vsel %vm204_vm12, %v3469_v22, %v211_v57  ;;  %v217_v2 = vsel %vm203_vm14, %v214_v10, %v216_v24  ;;  %v854_v49 = vadd.s32 %v852_v12, %v3421_v11 }
  0xce   : > { %vm855_vm15 = vc.u32 %v853_v47, %v849_v34  ;;  %v5342_v48 = vshrl.u32 %v3405_v60, 16  ;;  %v549_v4 = vadd.s32 %v548_v35, %v538_v32  ;;  %v874_v19 = vsel %vm873_vm13, 1, %v3120_v44 }
  0xcf   : > { %vm3517_vm1 = vc.u32 %v3491_v21, %v871_v9  ;;  %v562_v5 = vshrl.u32 %v3411_v3, 16  ;;  %v222_v42 = vshrl.u32 %v217_v2, 16  ;;  %v496_v11 = vshrl.u32 %v3118_v43, %v3289_v33 }
  0xd0   : > { %v868_v18 = vmul.u32 %v5342_v48, %v3401_v54  ;;  %v540_v34 = vshrl.u32 %v3408_v63, 16  ;;  %v213_v54 = vsel %vm203_vm14, %v210_v1, %v212_v52  ;;  %v219_v60 = vand.u32 65535, %v3498_v50 }
  0xd1   : > { %v806_v45 = vshrl.u32 %v3118_v43, %v3285_v28  ;;  %v856_v47 = vsel %vm855_vm15, 1, %v3120_v44  ;;  %v517_v58 = vsel %vm515_vm3, %v3321_v56, 2102212464  ;;  %v572_v53 = vadd.s32 %v571_v46, %v562_v5 }
  0xd2   : > { %v876_v61 = vadd.s32 %v874_v19, %v868_v18  ;;  %v3534_v35 = vadd.s32 %v549_v4, %v540_v34  ;;  %v221_v33 = vand.u32 65535, %v217_v2  ;;  %v224_v63 = vmul.u32 %v222_v42, %v219_v60 }
  0xd3   : > { %v827_v57 = vsel %vm825_vm6, %v3358_v15, 2102212464  ;;  %v848_v10 = vshrl.u32 %v3414_v6, 16  ;;  %v878_v28 = vsel %vm3517_vm1, 1, %v3120_v44  ;;  %v244_v12 = vshrl.u32 %v213_v54, 16 }
  0xd4   : > { %v858_v17 = vadd.s32 %v856_v47, %v854_v49  ;;  %v516_v56 = vsel %vm512_vm4, %v496_v11, %v3324_v59  ;;  %v518_v24 = vsel %vm514_vm5, %v3319_v55, %v517_v58  ;;  %v5345_v32 = vshll.u32 %v3411_v3, 16 }
  0xd5   : > { %v870_v6 = vshrl.u32 %v3434_v26, 16  ;;  %v576_v46 = vadd.s32 1, %v572_v53  ;;  %v220_v1 = vshrl.u32 %v3498_v50, 16  ;;  %v243_v52 = vand.u32 65535, %v213_v54 }
  0xd6   : > { %v3552_v15 = vadd.s32 %v3426_v25, %v5345_v32  ;;  %v880_v2 = vadd.s32 %v878_v28, %v876_v61  ;;  %v223_v59 = vmul.u32 %v221_v33, %v219_v60  ;;  %v227_v49 = vshll.u32 %v224_v63, 16  ;;  %v158_v32 = vpop.permute.xlu1 %157 }
  0xd7   : > { %v826_v55 = vsel %vm822_vm8, %v806_v45, %v3371_v23  ;;  %v519_v3 = vsel %vm513_vm7, %v516_v56, %v518_v24  ;;  %v225_v25 = vmul.u32 %v221_v33, %v220_v1  ;;  %v246_v48 = vmul.u32 %v244_v12, %v219_v60 }
  0xd8   : > { %vm575_vm3 = vc.u32 %v3534_v35, %v3552_v15  ;;  %v828_v26 = vsel %vm824_vm9, %v3356_v13, %v827_v57  ;;  %v850_v18 = vshrl.u32 %v3417_v7, 16  ;;  %v859_v4 = vadd.s32 %v858_v17, %v848_v10 }
  0xd9   : > { %vm231_vm4 = vc.u32 %v223_v59, %v227_v49  ;;  %v872_v19 = vshrl.u32 %v3437_v41, 16  ;;  %v577_v20 = vsel %vm575_vm3, %v576_v46, %v572_v53  ;;  %v226_v5 = vmul.u32 %v222_v42, %v220_v1 }
  0xda   : > { %v247_v11 = vmul.u32 %v243_v52, %v220_v1  ;;  %v881_v34 = vadd.s32 %v880_v2, %v870_v6  ;;  %v573_v23 = vmul.u32 %v3361_v16, %v519_v3  ;;  %v232_v36 = vsel %vm231_vm4, 1, %v3120_v44 }
  0xdb   : > { %v245_v54 = vmul.u32 %v243_v52, %v219_v60  ;;  %v229_v45 = vshll.u32 %v225_v25, 16  ;;  %v233_v47 = vadd.s32 %v227_v49, %v223_v59  ;;  %v234_v58 = vadd.s32 %v232_v36, %v226_v5 }
  0xdc   : > { %v249_v61 = vshll.u32 %v246_v48, 16  ;;  %v3570_v13 = vadd.s32 %v859_v4, %v850_v18  ;;  %v3575_v7 = vadd.s32 %v3491_v21, %v871_v9  ;;  %v578_v53 = vadd.s32 %v577_v20, %v573_v23 }
  0xdd   : > { %v248_v42 = vmul.u32 %v244_v12, %v220_v1  ;;  %vm235_vm5 = vc.u32 %v233_v47, %v229_v45  ;;  %v251_v33 = vshll.u32 %v247_v11, 16  ;;  %v882_v57 = vadd.s32 %v881_v34, %v872_v19 }
  0xde   : > { %vm253_vm6 = vc.u32 %v245_v54, %v249_v61  ;;  %v255_v16 = vadd.s32 %v249_v61, %v245_v54  ;;  %v207_v60 = vsel %vm205_vm2, %v3469_v22, 2102212464  ;;  %v236_v10 = vsel %vm235_vm5, 1, %v3120_v44 }
  0xdf   : > { %v254_v28 = vsel %vm253_vm6, 1, %v3120_v44  ;;  %v228_v17 = vshrl.u32 %v224_v63, 16  ;;  %v238_v41 = vadd.s32 %v236_v10, %v234_v58  ;;  %v579_v9 = vadd.s32 536870912, %v578_v53  ;;  %v150_v58 = vpop.permute.xlu0 %149 }
  0xe0   : > { %v256_v56 = vadd.s32 %v254_v28, %v248_v42  ;;  %vm257_vm7 = vc.u32 %v255_v16, %v251_v33  ;;  %v186_v21 = vshrl.u32 %v3118_v43, %v3428_v30  ;;  %v230_v12 = vshrl.u32 %v225_v25, 16 }
  0xe1   : > { %v258_v24 = vsel %vm257_vm7, 1, %v3120_v44  ;;  %v239_v6 = vadd.s32 %v238_v41, %v228_v17  ;;  %v250_v46 = vshrl.u32 %v246_v48, 16  ;;  %v140_v22 = vmul.f32 64.0, %v3255_v0 }
  0xe2   : > { %v260_v1 = vadd.s32 %v258_v24, %v256_v56  ;;  %v829_v52 = vsel %vm823_vm10, %v826_v55, %v828_v26  ;;  %v886_v63 = vadd.s32 1, %v882_v57  ;;  %v206_v2 = vsel %vm202_vm11, %v186_v21, %v3478_v37 }
  0xe3   : > { %v208_v30 = vsel %vm204_vm12, %v3467_v40, %v207_v60  ;;  %v240_v59 = vadd.s32 %v239_v6, %v230_v12  ;;  %v252_v49 = vshrl.u32 %v247_v11, 16  ;;  %v3595_v25 = vsel %vm164_vm0, %v140_v22, %v158_v32 }
  0xe4   : > { %v261_v3 = vadd.s32 %v260_v1, %v250_v46  ;;  %vm885_vm8 = vc.u32 %v3570_v13, %v3575_v7  ;;  %v3599_v27 = vshrl.u32 %v579_v9, 30  ;;  %v259_v55 = vadd.s32 %v255_v16, %v251_v33 }
  0xe5   : > { %v638_v48 = vand.u32 2139095040, %v3595_v25  ;;  %v209_v37 = vsel %vm203_vm14, %v206_v2, %v208_v30  ;;  %v883_v40 = vmul.u32 %v3383_v39, %v829_v52  ;;  %v887_v4 = vsel %vm885_vm8, %v886_v63, %v882_v57 }
  0xe6   : > { %v262_v26 = vadd.s32 %v261_v3, %v252_v49  ;;  %vm265_vm9 = vc.u32 %v240_v59, %v259_v55  ;;  %v581_v20 = vshll.u32 %v3599_v27, 30  ;;  %v263_v5 = vmul.u32 %v3498_v50, %v209_v37 }
  0xe7   : > { %v639_v18 = vshrl.u32 %v638_v48, 23  ;;  %v3607_v23 = vadd.s32 %v887_v4, %v883_v40  ;;  %v635_v62 = vand.u32 2147483647, %v3595_v25  ;;  %v136_v45 = vmul.f32 4.0, %v3255_v0 }
  0xe8   : > { %v266_v19 = vadd.s32 1, %v262_v26  ;;  %v3611_v47 = vsub.s32 %v578_v53, %v581_v20  ;;  %vm172_vm12 = vcmp.lt.s32.totalorder %v3312_v51, 0  ;;  %v5346_v30 = vand.u32 2147483647, %v3312_v51 }
  0xe9   : > { %v2905_v11 = vadd.s32 4294967169, %v639_v18  ;;  %v889_v42 = vadd.s32 536870912, %v3607_v23  ;;  %v642_v50 = vand.u32 8388607, %v635_v62  ;;  %v3617_v16 = vsel %vm164_vm0, %v136_v45, %v150_v58 }
  0xea   : > { %v267_v34 = vsel %vm265_vm9, %v266_v19, %v262_v26  ;;  %v584_v57 = vsub.s32 0, %v3611_v47  ;;  %vm583_vm2 = vcmp.lt.s32.totalorder %v3611_v47, 0  ;;  %v328_v28 = vand.u32 2139095040, %v3617_v16 }
  0xeb   : > { %v268_v36 = vadd.s32 %v267_v34, %v263_v5  ;;  %v645_v54 = vadd.s32 1, %v2905_v11  ;;  %v3621_v0 = vshrl.u32 %v889_v42, 30  ;;  %v643_v17 = vor.u32 8388608, %v642_v50 }
  0xec   : > { %v3625_v41 = vsel %vm583_vm2, %v584_v57, %v3611_v47  ;;  %v329_v24 = vshrl.u32 %v328_v28, 23  ;;  %v325_v1 = vand.u32 2147483647, %v3617_v16  ;;  %vm3639_vm13 = vcmp.le.f32.partialorder %v5346_v30, 0.7853982 }
  0xed   : > { %v269_v39 = vadd.s32 536870912, %v268_v36  ;;  %vm646_vm10 = vcmp.gt.s32.totalorder %v645_v54, 0  ;;  %v891_v21 = vshll.u32 %v3621_v0, 30  ;;  %v586_v32 = vclz %v3625_v41 }
  0xee   : > { %v647_v61 = vsel %vm646_vm10, %v645_v54, 0  ;;  %v3630_v46 = vshll.u32 %v643_v17, 8  ;;  %v264_v40 = vadd.s32 %v259_v55, %v240_v59  ;;  %v2899_v19 = vadd.s32 4294967169, %v329_v24 }
  0xef   : > { %v270_v33 = vshrl.u32 %v269_v39, 30  ;;  %v649_v10 = vand.u32 31, %v647_v61  ;;  %v3643_v48 = vshrl.u32 %v647_v61, 5  ;;  %v5349_v20 = vmov 920167782  }
  0xf0   : > { %v5350_v34 = vmov 1326507024   ;;  %v3653_v58 = vand.u32 8388607, %v325_v1  ;;  %v684_v55 = vand.u32 65535, %v3630_v46  ;;  %v3818_v41 = vsub.s32 %v3607_v23, %v891_v21 }
  0xf1   : > { %v271_v60 = vshll.u32 %v270_v33, 30  ;;  %v650_v9 = vsub.s32 32, %v649_v10  ;;  %v652_v22 = vshll.u32 %v3118_v43, %v649_v10  ;;  %v655_v63 = vshll.u32 %v3114_v29, %v649_v10 }
  0xf2   : > { %v658_v37 = vshll.u32 %v3115_v31, %v649_v10  ;;  %v294_v18 = vsub.s32 4, %v270_v33  ;;  %v661_v4 = vshll.u32 %v3116_v38, %v649_v10  ;;  %v664_v11 = vshll.u32 %v5349_v20, %v649_v10 }
  0xf3   : > { %v272_v53 = vsub.s32 %v268_v36, %v271_v60  ;;  %v653_v52 = vshrl.u32 %v3114_v29, %v650_v9  ;;  %v656_v2 = vshrl.u32 %v3115_v31, %v650_v9  ;;  %v659_v26 = vshrl.u32 %v3116_v38, %v650_v9 }
  0xf4   : > { %v662_v5 = vshrl.u32 %v5349_v20, %v650_v9  ;;  %v665_v36 = vshrl.u32 %v5350_v34, %v650_v9  ;;  %vm667_vm15 = vcmp.lt.s32.totalorder %v3643_v48, 1  ;;  %v295_v50 = vsel %vm172_vm12, %v294_v18, %v270_v33 }
  0xf5   : > { %vm273_vm11 = vcmp.lt.s32.totalorder %v272_v53, 0  ;;  %v274_v56 = vsub.s32 0, %v272_v53  ;;  %v654_v45 = vor.u32 %v653_v52, %v652_v22  ;;  %v657_v39 = vor.u32 %v656_v2, %v655_v63 }
  0xf6   : > { %v660_v59 = vor.u32 %v659_v26, %v658_v37  ;;  %v663_v57 = vor.u32 %v662_v5, %v661_v4  ;;  %v685_v60 = vshrl.u32 %v3630_v46, 16  ;;  %v666_v17 = vor.u32 %v665_v36, %v664_v11 }
  0xf7   : > { %v275_v12 = vsel %vm273_vm11, %v274_v56, %v272_v53  ;;  %vm669_vm1 = vcmp.lt.s32.totalorder %v3643_v48, 3  ;;  %vm668_vm3 = vcmp.lt.s32.totalorder %v3643_v48, 2  ;;  %vm670_vm4 = vcmp.lt.s32.totalorder %v3643_v48, 4 }
  0xf8   : > { %v276_v6 = vclz %v275_v12  ;;  %v675_v12 = vsel %vm667_vm15, %v654_v45, %v657_v39  ;;  %v676_v33 = vsel %vm670_vm4, %v663_v57, 920167782  ;;  %v3672_v52 = vsel %vm3639_vm13, 0, %v295_v50 }
  0xf9   : > { %v677_v63 = vsel %vm669_vm1, %v660_v59, %v676_v33  ;;  %v680_v2 = vsel %vm670_vm4, %v666_v17, 1326507024  ;;  %v651_v30 = vshrl.u32 %v3118_v43, %v650_v9  ;;  %v335_v26 = vadd.s32 1, %v2899_v19 }
  0xfa   : > { %v2897_v3 = vadd.s32 4294967294, %v276_v6  ;;  %v679_v6 = vsel %vm667_vm15, %v657_v39, %v660_v59  ;;  %v681_v37 = vsel %vm669_vm1, %v663_v57, %v680_v2  ;;  %v314_v36 = vadd.s32 3, %v3672_v52 }
  0xfb   : > { %v682_v18 = vsel %vm668_vm3, %v679_v6, %v681_v37  ;;  %vm336_vm5 = vcmp.gt.s32.totalorder %v335_v26, 0 }
  0xfc   : > { %vm2898_vm14 = vcmp.lt.s32.totalorder %v2897_v3, 0 }
  0xfd   : > { %v279_v54 = vsel %vm2898_vm14, 0, %v2897_v3  ;;  %v678_v3 = vsel %vm668_vm3, %v675_v12, %v677_v63  ;;  %v671_v12 = vsel %vm667_vm15, %v651_v30, %v654_v45 }
  0xfe   : > { %v280_v61 = vsub.s32 32, %v279_v54  ;;  %v284_v42 = vsub.s32 4294967266, %v279_v54  ;;  %v281_v10 = vshll.u32 %v272_v53, %v279_v54  ;;  %v333_v53 = vor.u32 8388608, %v3653_v58 }
  0xff   : > { %v708_v4 = vand.u32 65535, %v678_v3  ;;  %v709_v5 = vshrl.u32 %v678_v3, 16  ;;  %v686_v54 = vand.u32 65535, %v682_v18 }
 0x100   : > { %v282_v28 = vshrl.u32 %v264_v40, %v280_v61  ;;  %v285_v56 = vadd.s32 127, %v284_v42  ;;  %v687_v61 = vshrl.u32 %v682_v18, 16  ;;  %v337_v18 = vsel %vm336_vm5, %v335_v26, 0 }
 0x101   : > { %v710_v9 = vmul.u32 %v708_v4, %v684_v55  ;;  %v711_v50 = vmul.u32 %v709_v5, %v684_v55  ;;  %v688_v57 = vmul.u32 %v686_v54, %v684_v55  ;;  %v690_v17 = vmul.u32 %v686_v54, %v685_v60 }
 0x102   : > { %v283_v24 = vor.u32 %v282_v28, %v281_v10  ;;  %v286_v22 = vshll.u32 %v285_v56, 23  ;;  %v712_v10 = vmul.u32 %v708_v4, %v685_v60  ;;  %v672_v28 = vsel %vm670_vm4, %v660_v59, 2102212464 }
 0x103   : > { %v689_v19 = vmul.u32 %v687_v61, %v684_v55  ;;  %v713_v33 = vmul.u32 %v709_v5, %v685_v60  ;;  %v691_v6 = vmul.u32 %v687_v61, %v685_v60  ;;  %v694_v63 = vshll.u32 %v690_v17, 16 }
 0x104   : > { %v287_v40 = vor.u32 4788187, %v286_v22  ;;  %v290_v11 = vcvt.s32.f32 %v283_v24  ;;  %v714_v24 = vshll.u32 %v711_v50, 16  ;;  %v673_v3 = vsel %vm669_vm1, %v657_v39, %v672_v28 }
 0x105   : > { %v692_v22 = vshll.u32 %v689_v19, 16  ;;  %v716_v37 = vshll.u32 %v712_v10, 16  ;;  %v715_v54 = vshrl.u32 %v711_v50, 16  ;;  %v339_v26 = vand.u32 31, %v337_v18 }
 0x106   : > { %v288_v42 = vand.u32 2147483647, %v287_v40  ;;  %vm718_vm6 = vc.u32 %v710_v9, %v714_v24  ;;  %v720_v40 = vadd.s32 %v714_v24, %v710_v9  ;;  %v674_v49 = vsel %vm668_vm3, %v671_v12, %v673_v3 }
 0x107   : > { %vm696_vm7 = vc.u32 %v688_v57, %v692_v22  ;;  %v698_v59 = vadd.s32 %v692_v22, %v688_v57  ;;  %v719_v55 = vsel %vm718_vm6, 1, %v3120_v44  ;;  %v3709_v50 = vand.u32 3, %v314_v36 }
 0x108   : > { %v291_v56 = vmul.f32 %v290_v11, %v288_v42  ;;  %v697_v30 = vsel %vm696_vm7, 1, %v3120_v44  ;;  %v721_v60 = vadd.s32 %v719_v55, %v713_v33  ;;  %vm722_vm9 = vc.u32 %v720_v40, %v716_v37 }
 0x109   : > { %v699_v39 = vadd.s32 %v697_v30, %v691_v6  ;;  %vm700_vm8 = vc.u32 %v698_v59, %v694_v63  ;;  %v723_v61 = vsel %vm722_vm9, 1, %v3120_v44  ;;  %v693_v42 = vshrl.u32 %v689_v19, 16 }
 0x10a   : > { %v292_v2 = vxor.u32 2147483648, %v291_v56  ;;  %v701_v11 = vsel %vm700_vm8, 1, %v3120_v44  ;;  %v725_v28 = vadd.s32 %v723_v61, %v721_v60  ;;  %v695_v33 = vshrl.u32 %v690_v17, 16 }
 0x10b   : > { %v703_v9 = vadd.s32 %v701_v11, %v699_v39  ;;  %v717_v6 = vshrl.u32 %v712_v10, 16  ;;  %v3707_v63 = vsub.s32 32, %v339_v26  ;;  %v3712_v19 = vand.u32 3, %v3672_v52 }
 0x10c   : > { %v293_v45 = vsel %vm172_vm12, %v292_v2, %v291_v56  ;;  %v726_v22 = vadd.s32 %v725_v28, %v715_v54  ;;  %v728_v48 = vmul.u32 %v3630_v46, %v674_v49  ;;  %v3719_v10 = vshrl.u32 %v337_v18, 5 }
 0x10d   : > { %v3699_v4 = vsel %vm3639_vm13, %v3312_v51, %v293_v45  ;;  %v704_v24 = vadd.s32 %v703_v9, %v693_v42  ;;  %v3716_v45 = vadd.s32 %v720_v40, %v716_v37  ;;  %v345_v3 = vshll.u32 %v3114_v29, %v339_v26 }
 0x10e   : > { %v298_v5 = vmul.f32 %v3699_v4, %v3699_v4  ;;  %v727_v30 = vadd.s32 %v726_v22, %v717_v6  ;;  %v346_v52 = vshrl.u32 %v3115_v31, %v3707_v63  ;;  %v349_v37 = vshrl.u32 %v3116_v38, %v3707_v63 }
 0x10f   : > { %v3714_v55 = vadd.s32 %v704_v24, %v695_v33  ;;  %v343_v46 = vshrl.u32 %v3114_v29, %v3707_v63  ;;  %v348_v18 = vshll.u32 %v3115_v31, %v339_v26  ;;  %vm1091_vm2 = vcmp.eq.s32.totalorder %v3712_v19, 0 }
 0x110   : > { %v299_v57 = vmul.f32 -0.001358992, %v298_v5  ;;  %v306_v56 = vmul.f32 -0.00019511016, %v298_v5  ;;  %v731_v36 = vadd.s32 1, %v727_v30  ;;  %vm1094_vm11 = vcmp.eq.s32.totalorder %v3712_v19, 2 }
 0x111   : > { %vm730_vm10 = vc.u32 %v3714_v55, %v3716_v45  ;;  %v351_v11 = vshll.u32 %v3116_v38, %v339_v26  ;;  %v352_v54 = vshrl.u32 %v5349_v20, %v3707_v63  ;;  %v354_v61 = vshll.u32 %v5349_v20, %v339_v26 }
 0x112   : > { %v300_v2 = vadd.f32 0.041655596, %v299_v57  ;;  %v307_v59 = vadd.f32 0.008332121, %v306_v56  ;;  %v732_v39 = vsel %vm730_vm10, %v731_v36, %v727_v30  ;;  %vm1090_vm12 = vcmp.lt.s32.totalorder %v3712_v19, 2 }
 0x113   : > { %v733_v28 = vadd.s32 %v732_v39, %v728_v48  ;;  %v355_v29 = vshrl.u32 %v5350_v34, %v3707_v63  ;;  %vm313_vm13 = vweird.f32 %v3312_v51  ;;  %v342_v31 = vshll.u32 %v3118_v43, %v339_v26 }
 0x114   : > { %v301_v17 = vmul.f32 %v300_v2, %v298_v5  ;;  %v308_v12 = vmul.f32 %v307_v59, %v298_v5  ;;  %v3742_v57 = vor.u32 %v346_v52, %v345_v3  ;;  %v3744_v38 = vor.u32 %v349_v37, %v348_v18 }
 0x115   : > { %v353_v56 = vor.u32 %v352_v54, %v351_v11  ;;  %v734_v20 = vadd.s32 536870912, %v733_v28  ;;  %v356_v24 = vor.u32 %v355_v29, %v354_v61  ;;  %vm316_vm14 = vcmp.lt.s32.totalorder %v3709_v50, 2 }
 0x116   : > { %v302_v40 = vadd.f32 -0.4999988, %v301_v17  ;;  %v309_v60 = vadd.f32 -0.16666654, %v308_v12  ;;  %vm317_vm15 = vcmp.eq.s32.totalorder %v3709_v50, 0  ;;  %vm320_vm1 = vcmp.eq.s32.totalorder %v3709_v50, 2 }
 0x117   : > { %v3749_v34 = vor.u32 %v343_v46, %v342_v31  ;;  %v3752_v6 = vshrl.u32 %v734_v20, 30  ;;  %vm360_vm3 = vcmp.lt.s32.totalorder %v3719_v10, 4  ;;  %vm357_vm4 = vcmp.lt.s32.totalorder %v3719_v10, 1 }
 0x118   : > { %v303_v42 = vmul.f32 %v302_v40, %v298_v5  ;;  %v310_v9 = vmul.f32 %v309_v60, %v298_v5  ;;  %vm359_vm5 = vcmp.lt.s32.totalorder %v3719_v10, 3  ;;  %v370_v22 = vsel %vm360_vm3, %v356_v24, 1326507024 }
 0x119   : > { %v3761_v2 = vshll.u32 %v333_v53, 8  ;;  %v736_v30 = vshll.u32 %v3752_v6, 30  ;;  %v369_v48 = vsel %vm357_vm4, %v3742_v57, %v3744_v38  ;;  %vm358_vm6 = vcmp.lt.s32.totalorder %v3719_v10, 2 }
 0x11a   : > { %v304_v49 = vadd.f32 1.0, %v303_v42  ;;  %v311_v33 = vadd.f32 1.0, %v310_v9  ;;  %v365_v58 = vsel %vm357_vm4, %v3749_v34, %v3742_v57  ;;  %v371_v53 = vsel %vm359_vm5, %v353_v56, %v370_v22 }
 0x11b   : > { %v3783_v52 = vsub.s32 %v733_v28, %v736_v30  ;;  %v372_v46 = vsel %vm358_vm6, %v369_v48, %v371_v53  ;;  %v2903_v19 = vadd.s32 4294967294, %v586_v32  ;;  %v374_v11 = vand.u32 65535, %v3761_v2 }
 0x11c   : > { %v312_v5 = vmul.f32 %v311_v33, %v3699_v4  ;;  %v321_v26 = vxor.u32 2147483648, %v304_v49  ;;  %v366_v4 = vsel %vm360_vm3, %v353_v56, 920167782  ;;  %v376_v54 = vand.u32 65535, %v372_v46 }
 0x11d   : > { %v367_v60 = vsel %vm359_vm5, %v3744_v38, %v366_v4  ;;  %vm738_vm7 = vcmp.lt.s32.totalorder %v3783_v52, 0  ;;  %v739_v50 = vsub.s32 0, %v3783_v52  ;;  %v377_v61 = vshrl.u32 %v372_v46, 16 }
 0x11e   : > { %v318_v59 = vxor.u32 2147483648, %v312_v5  ;;  %v322_v17 = vsel %vm320_vm1, %v321_v26, %v312_v5  ;;  %v1096_v36 = vsel %vm1094_vm11, %v321_v26, %v312_v5  ;;  %v375_v42 = vshrl.u32 %v3761_v2, 16 }
 0x11f   : > { %v740_v51 = vsel %vm738_vm7, %v739_v50, %v3783_v52  ;;  %v368_v32 = vsel %vm358_vm6, %v365_v58, %v367_v60  ;;  %v379_v9 = vmul.u32 %v377_v61, %v374_v11  ;;  %vm2904_vm8 = vcmp.lt.s32.totalorder %v2903_v19, 0 }
 0x120   : > { %v319_v12 = vsel %vm317_vm15, %v304_v49, %v318_v59  ;;  %v1093_v3 = vsel %vm1091_vm2, %v304_v49, %v318_v59  ;;  %v380_v28 = vmul.u32 %v376_v54, %v375_v42  ;;  %v741_v29 = vclz %v740_v51 }
 0x121   : > { %v323_v37 = vsel %vm316_vm14, %v319_v12, %v322_v17  ;;  %v1097_v40 = vsel %vm1090_vm12, %v1093_v3, %v1096_v36  ;;  %v378_v31 = vmul.u32 %v376_v54, %v374_v11  ;;  %v382_v56 = vshll.u32 %v379_v9, 16 }
 0x122   : > { %v3796_v18 = vsel %vm313_vm13, nan, %v323_v37  ;;  %v3800_v39 = vsel %vm313_vm13, nan, %v1097_v40  ;;  %v398_v49 = vand.u32 65535, %v368_v32  ;;  %v894_v33 = vsub.s32 0, %v3818_v41 }
 0x123   : > { %1723 = vrot.lane.b32.xlu1 %v3800_v39, %s5289_s17  ;;  %1716 = vrot.lane.b32.xlu2 %v3800_v39, %s5287_s24  ;;  %v381_v20 = vmul.u32 %v377_v61, %v375_v42  ;;  %vm386_vm9 = vc.u32 %v378_v31, %v382_v56  ;;  %v388_v24 = vadd.s32 %v382_v56, %v378_v31  ;;  %v589_v5 = vsel %vm2904_vm8, 0, %v2903_v19 }
 0x124   : > { %1720 = vrot.lane.b32.xlu0 %v3796_v18, %s5267_s25  ;;  %v384_v26 = vshll.u32 %v380_v28, 16  ;;  %v387_v23 = vsel %vm386_vm9, 1, %v3120_v44  ;;  %v399_v21 = vshrl.u32 %v368_v32, 16  ;;  %vm893_vm10 = vcmp.lt.s32.totalorder %v3818_v41, 0 }
 0x125   : > { %v2906_v22 = vadd.s32 4294967294, %v741_v29  ;;  %v389_v59 = vadd.s32 %v387_v23, %v381_v20  ;;  %v402_v4 = vmul.u32 %v398_v49, %v375_v42  ;;  %v594_v48 = vsub.s32 4294967266, %v589_v5 }
 0x126   : > { %vm390_vm2 = vc.u32 %v388_v24, %v384_v26  ;;  %v401_v30 = vmul.u32 %v399_v21, %v374_v11  ;;  %v895_v58 = vsel %vm893_vm10, %v894_v33, %v3818_v41  ;;  %v400_v12 = vmul.u32 %v398_v49, %v374_v11 }
 0x127   : > { %v391_v17 = vsel %vm390_vm2, 1, %v3120_v44  ;;  %vm2907_vm11 = vcmp.lt.s32.totalorder %v2906_v22, 0  ;;  %v383_v36 = vshrl.u32 %v379_v9, 16  ;;  %v403_v37 = vmul.u32 %v399_v21, %v375_v42 }
 0x128   : > { %v393_v53 = vadd.s32 %v391_v17, %v389_v59  ;;  %v404_v3 = vshll.u32 %v401_v30, 16  ;;  %v406_v40 = vshll.u32 %v402_v4, 16  ;;  %v896_v46 = vclz %v895_v58 }
 0x129   : > { %v595_v50 = vadd.s32 127, %v594_v48  ;;  %v590_v61 = vsub.s32 32, %v589_v5  ;;  %v362_v51 = vsel %vm360_vm3, %v3744_v38, 2102212464  ;;  %v744_v11 = vsel %vm2907_vm11, 0, %v2906_v22 }
 0x12a   : > { %vm408_vm12 = vc.u32 %v400_v12, %v404_v3  ;;  %v410_v60 = vadd.s32 %v404_v3, %v400_v12  ;;  %v394_v19 = vadd.s32 %v393_v53, %v383_v36  ;;  %v341_v9 = vshrl.u32 %v3118_v43, %v3707_v63 }
 0x12b   : > { %v409_v54 = vsel %vm408_vm12, 1, %v3120_v44  ;;  %v385_v42 = vshrl.u32 %v380_v28, 16  ;;  %v574_v31 = vadd.s32 %v3552_v15, %v3534_v35  ;;  %v405_v56 = vshrl.u32 %v401_v30, 16 }
 0x12c   : > { %v411_v32 = vadd.s32 %v409_v54, %v403_v37  ;;  %vm412_vm13 = vc.u32 %v410_v60, %v406_v40  ;;  %v596_v33 = vshll.u32 %v595_v50, 23  ;;  %v361_v20 = vsel %vm357_vm4, %v341_v9, %v3749_v34 }
 0x12d   : > { %v413_v29 = vsel %vm412_vm13, 1, %v3120_v44  ;;  %v363_v38 = vsel %vm359_vm5, %v3742_v57, %v362_v51  ;;  %v395_v24 = vadd.s32 %v394_v19, %v385_v42  ;;  %v749_v26 = vsub.s32 4294967266, %v744_v11 }
 0x12e   : > { %v415_v49 = vadd.s32 %v413_v29, %v411_v32  ;;  %v407_v43 = vshrl.u32 %v402_v4, 16  ;;  %v2909_v28 = vadd.s32 4294967294, %v896_v46  ;;  %v592_v44 = vshrl.u32 %v574_v31, %v590_v61 }
 0x12f   : > { %v414_v23 = vadd.s32 %v410_v60, %v406_v40  ;;  %v364_v35 = vsel %vm358_vm6, %v361_v20, %v363_v38  ;;  %v591_v21 = vshll.u32 %v3611_v47, %v589_v5  ;;  %v597_v22 = vor.u32 4788187, %v596_v33 }
 0x130   : > { %v416_v63 = vadd.s32 %v415_v49, %v405_v56  ;;  %v750_v34 = vadd.s32 127, %v749_v26  ;;  %vm2910_vm15 = vcmp.lt.s32.totalorder %v2909_v28, 0  ;;  %v418_v57 = vmul.u32 %v3761_v2, %v364_v35 }
 0x131   : > { %vm420_vm14 = vc.u32 %v395_v24, %v414_v23  ;;  %v593_v30 = vor.u32 %v592_v44, %v591_v21  ;;  %v745_v48 = vsub.s32 32, %v744_v11  ;;  %v598_v17 = vand.u32 2147483647, %v597_v22 }
 0x132   : > { %v417_v15 = vadd.s32 %v416_v63, %v407_v43  ;;  %v899_v53 = vsel %vm2910_vm15, 0, %v2909_v28  ;;  %v729_v10 = vadd.s32 %v3716_v45, %v3714_v55  ;;  %v751_v12 = vshll.u32 %v750_v34, 23 }
 0x133   : > { %v600_v3 = vcvt.s32.f32 %v593_v30  ;;  %v904_v5 = vsub.s32 4294967266, %v899_v53  ;;  %v746_v60 = vshll.u32 %v3783_v52, %v744_v11  ;;  %v884_v50 = vadd.s32 %v3575_v7, %v3570_v13 }
 0x134   : > { %v421_v59 = vadd.s32 1, %v417_v15  ;;  %v747_v47 = vshrl.u32 %v729_v10, %v745_v48  ;;  %v752_v46 = vor.u32 4788187, %v751_v12  ;;  %v900_v54 = vsub.s32 32, %v899_v53 }
 0x135   : > { %v601_v37 = vmul.f32 %v600_v3, %v598_v17  ;;  %v905_v61 = vadd.s32 127, %v904_v5  ;;  %v901_v9 = vshll.u32 %v3818_v41, %v899_v53  ;;  %vm482_vm3 = vcmp.lt.s32.totalorder %v3274_v14, 0 }
 0x136   : > { %v422_v4 = vsel %vm420_vm14, %v421_v59, %v417_v15  ;;  %v748_v19 = vor.u32 %v747_v47, %v746_v60  ;;  %v753_v51 = vand.u32 2147483647, %v752_v46  ;;  %v902_v52 = vshrl.u32 %v884_v50, %v900_v54 }
 0x137   : > { %v423_v58 = vadd.s32 %v422_v4, %v418_v57  ;;  %v602_v55 = vxor.u32 2147483648, %v601_v37  ;;  %v906_v11 = vshll.u32 %v905_v61, 23  ;;  %v5351_v56 = vand.u32 2147483647, %v3274_v14 }
 0x138   : > { %v755_v42 = vcvt.s32.f32 %v748_v19  ;;  %v903_v20 = vor.u32 %v902_v52, %v901_v9  ;;  %v419_v28 = vadd.s32 %v414_v23, %v395_v24  ;;  %vm637_vm6 = vcmp.lt.s32.totalorder %v3595_v25, 0 }
 0x139   : > { %v424_v36 = vadd.s32 536870912, %v423_v58  ;;  %v603_v29 = vsel %vm482_vm3, %v602_v55, %v601_v37  ;;  %vm3860_vm4 = vcmp.le.f32.partialorder %v5351_v56, 0.7853982  ;;  %v907_v38 = vor.u32 4788187, %v906_v11 }
 0x13a   : > { %v756_v13 = vmul.f32 %v755_v42, %v753_v51  ;;  %v3867_v41 = vsel %vm3860_vm4, %v3274_v14, %v603_v29  ;;  %v910_v21 = vcvt.s32.f32 %v903_v20  ;;  %vm3879_vm7 = vcmp.le.f32.partialorder %v635_v62, 0.7853982 }
 0x13b   : > { %v3848_v40 = vshrl.u32 %v424_v36, 30  ;;  %v3871_v43 = vmul.f32 %v3867_v41, %v3867_v41  ;;  %v908_v15 = vand.u32 2147483647, %v907_v38  ;;  %vm792_vm8 = vcmp.lt.s32.totalorder %v3269_v8, 0 }
 0x13c   : > { %v757_v26 = vxor.u32 2147483648, %v756_v13  ;;  %vm327_vm9 = vcmp.lt.s32.totalorder %v3617_v16, 0  ;;  %vm3902_vm10 = vcmp.le.f32.partialorder %v325_v1, 0.7853982  ;;  %v5358_v9 = vand.u32 2147483647, %v3269_v8 }
 0x13d   : > { %v426_v2 = vshll.u32 %v3848_v40, 30  ;;  %v616_v57 = vmul.f32 -0.00019511016, %v3871_v43  ;;  %v911_v17 = vmul.f32 %v910_v21, %v908_v15  ;;  %v609_v47 = vmul.f32 -0.001358992, %v3871_v43 }
 0x13e   : > { %v758_v22 = vsel %vm637_vm6, %v757_v26, %v756_v13  ;;  %v449_v55 = vsub.s32 4, %v3848_v40  ;;  %vm3914_vm2 = vcmp.le.f32.partialorder %v5358_v9, 0.7853982 }
 0x13f   : > { %v427_v45 = vsub.s32 %v423_v58, %v426_v2  ;;  %v3886_v4 = vsel %vm3879_vm7, %v3595_v25, %v758_v22  ;;  %v617_v53 = vadd.f32 0.008332121, %v616_v57  ;;  %v912_v62 = vxor.u32 2147483648, %v911_v17 }
 0x140   : > { %v3890_v10 = vmul.f32 %v3886_v4, %v3886_v4  ;;  %v604_v2 = vsub.s32 4, %v3599_v27  ;;  %v610_v54 = vadd.f32 0.041655596, %v609_v47  ;;  %v450_v56 = vsel %vm327_vm9, %v449_v55, %v3848_v40 }
 0x141   : > { %vm428_vm1 = vcmp.lt.s32.totalorder %v427_v45, 0  ;;  %v429_v32 = vsub.s32 0, %v427_v45  ;;  %v618_v5 = vmul.f32 %v617_v53, %v3871_v43  ;;  %v913_v46 = vsel %vm792_vm8, %v912_v62, %v911_v17 }
 0x142   : > { %v771_v37 = vmul.f32 -0.00019511016, %v3890_v10  ;;  %v3921_v42 = vsel %vm3914_vm2, %v3269_v8, %v913_v46  ;;  %v605_v52 = vsel %vm482_vm3, %v604_v2, %v3599_v27  ;;  %v759_v40 = vsub.s32 4, %v3752_v6 }
 0x143   : > { %v430_v31 = vsel %vm428_vm1, %v429_v32, %v427_v45  ;;  %v619_v61 = vadd.f32 -0.16666654, %v618_v5  ;;  %v3935_v26 = vmul.f32 %v3921_v42, %v3921_v42  ;;  %v607_v27 = vsel %vm3860_vm4, 0, %v605_v52 }
 0x144   : > { %v431_v7 = vclz %v430_v31  ;;  %v772_v51 = vadd.f32 0.008332121, %v771_v37  ;;  %v611_v31 = vmul.f32 %v610_v54, %v3871_v43  ;;  %v760_v53 = vsel %vm637_vm6, %v759_v40, %v3752_v6 }
 0x145   : > { %v620_v13 = vmul.f32 %v619_v61, %v3871_v43  ;;  %v1397_v46 = vand.u32 3, %v607_v27  ;;  %v919_v9 = vmul.f32 -0.001358992, %v3935_v26  ;;  %vm468_vm3 = vweird.f32 %v3617_v16 }
 0x146   : > { %v2900_v33 = vadd.s32 4294967294, %v431_v7  ;;  %v764_v7 = vmul.f32 -0.001358992, %v3890_v10 }
 0x147   : > { %v621_v15 = vadd.f32 1.0, %v620_v13 }
 0x148   : > { %vm2901_vm5 = vcmp.lt.s32.totalorder %v2900_v33, 0  ;;  %v765_v21 = vadd.f32 0.041655596, %v764_v7 }
 0x149   : > { %v434_v63 = vsel %vm2901_vm5, 0, %v2900_v33  ;;  %v773_v33 = vmul.f32 %v772_v51, %v3890_v10  ;;  %vm1399_vm5 = vcmp.eq.s32.totalorder %v1397_v46, 0 }
 0x14a   : > { %v435_v44 = vsub.s32 32, %v434_v63  ;;  %v439_v35 = vsub.s32 4294967266, %v434_v63  ;;  %v436_v34 = vshll.u32 %v427_v45, %v434_v63  ;;  %v452_v63 = vsel %vm3902_vm10, 0, %v450_v56 }
 0x14b   : > { %v774_v22 = vadd.f32 -0.16666654, %v773_v33  ;;  %v469_v57 = vadd.s32 3, %v452_v63  ;;  %v1243_v47 = vand.u32 3, %v452_v63 }
 0x14c   : > { %v437_v59 = vshrl.u32 %v419_v28, %v435_v44  ;;  %v440_v30 = vadd.s32 127, %v439_v35  ;;  %v612_v35 = vadd.f32 -0.4999988, %v611_v31 }
 0x14d   : > { %v470_v37 = vand.u32 3, %v469_v57  ;;  %vm1244_vm11 = vcmp.lt.s32.totalorder %v1243_v47, 2  ;;  %vm1245_vm12 = vcmp.eq.s32.totalorder %v1243_v47, 0  ;;  %vm1248_vm1 = vcmp.eq.s32.totalorder %v1243_v47, 2 }
 0x14e   : > { %v438_v24 = vor.u32 %v437_v59, %v436_v34  ;;  %v441_v23 = vshll.u32 %v440_v30, 23  ;;  %v926_v30 = vmul.f32 -0.00019511016, %v3935_v26  ;;  %v613_v17 = vmul.f32 %v612_v35, %v3871_v43 }
 0x14f   : > { %vm471_vm13 = vcmp.lt.s32.totalorder %v470_v37, 2  ;;  %vm472_vm14 = vcmp.eq.s32.totalorder %v470_v37, 0  ;;  %vm475_vm15 = vcmp.eq.s32.totalorder %v470_v37, 2 }
 0x150   : > { %v442_v58 = vor.u32 4788187, %v441_v23  ;;  %v445_v3 = vcvt.s32.f32 %v438_v24  ;;  %v624_v24 = vadd.s32 3, %v607_v27  ;;  %v927_v5 = vadd.f32 0.008332121, %v926_v30 }
 0x151   : > { %v614_v43 = vadd.f32 1.0, %v613_v17 }
 0x152   : > { %v443_v12 = vand.u32 2147483647, %v442_v58  ;;  %v622_v58 = vmul.f32 %v621_v15, %v3867_v41  ;;  %v3952_v41 = vsel %vm3879_vm7, 0, %v760_v53  ;;  %vm1398_vm7 = vcmp.lt.s32.totalorder %v1397_v46, 2 }
 0x153   : > { %v779_v7 = vadd.s32 3, %v3952_v41  ;;  %v1551_v17 = vand.u32 3, %v3952_v41 }
 0x154   : > { %v446_v36 = vmul.f32 %v445_v3, %v443_v12  ;;  %v766_v12 = vmul.f32 %v765_v21, %v3890_v10  ;;  %v775_v3 = vmul.f32 %v774_v22, %v3890_v10  ;;  %v914_v21 = vsub.s32 4, %v3621_v0 }
 0x155   : > { %v780_v35 = vand.u32 3, %v779_v7 }
 0x156   : > { %v447_v60 = vxor.u32 2147483648, %v446_v36  ;;  %v767_v6 = vadd.f32 -0.4999988, %v766_v12  ;;  %v776_v54 = vadd.f32 1.0, %v775_v3 }
 0x158   : > { %v448_v19 = vsel %vm327_vm9, %v447_v60, %v446_v36  ;;  %v625_v60 = vand.u32 3, %v624_v24  ;;  %v777_v33 = vmul.f32 %v776_v54, %v3886_v4  ;;  %vm1402_vm9 = vcmp.eq.s32.totalorder %v1397_v46, 2 }
 0x159   : > { %v451_v45 = vsel %vm3902_vm10, %v3617_v16, %v448_v19  ;;  %v628_v19 = vxor.u32 2147483648, %v622_v58  ;;  %v928_v16 = vmul.f32 %v927_v5, %v3935_v26 }
 0x15a   : > { %v453_v32 = vmul.f32 %v451_v45, %v451_v45  ;;  %vm627_vm4 = vcmp.eq.s32.totalorder %v625_v60, 0  ;;  %vm630_vm6 = vcmp.eq.s32.totalorder %v625_v60, 2  ;;  %vm626_vm10 = vcmp.lt.s32.totalorder %v625_v60, 2 }
 0x15b   : > { %v629_v56 = vsel %vm627_vm4, %v614_v43, %v628_v19  ;;  %v929_v15 = vadd.f32 -0.16666654, %v928_v16  ;;  %v783_v40 = vxor.u32 2147483648, %v777_v33 }
 0x15c   : > { %v454_v11 = vmul.f32 -0.001358992, %v453_v32  ;;  %v461_v29 = vmul.f32 -0.00019511016, %v453_v32 }
 0x15d   : > { %v930_v30 = vmul.f32 %v929_v15, %v3935_v26 }
 0x15e   : > { %v455_v20 = vadd.f32 0.041655596, %v454_v11  ;;  %v462_v38 = vadd.f32 0.008332121, %v461_v29  ;;  %v631_v11 = vxor.u32 2147483648, %v614_v43  ;;  %v768_v29 = vmul.f32 %v767_v6, %v3890_v10 }
 0x15f   : > { %v1401_v10 = vsel %vm1399_vm5, %v614_v43, %v628_v19  ;;  %v931_v53 = vadd.f32 1.0, %v930_v30 }
 0x160   : > { %v456_v28 = vmul.f32 %v455_v20, %v453_v32  ;;  %v463_v44 = vmul.f32 %v462_v38, %v453_v32  ;;  %v920_v20 = vadd.f32 0.041655596, %v919_v9  ;;  %v632_v38 = vsel %vm630_vm6, %v631_v11, %v622_v58 }
 0x161   : > { %v1404_v27 = vsel %vm1402_vm9, %v631_v11, %v622_v58  ;;  %v769_v63 = vadd.f32 1.0, %v768_v29  ;;  %v932_v1 = vmul.f32 %v931_v53, %v3921_v42 }
 0x162   : > { %v457_v34 = vadd.f32 -0.4999988, %v456_v28  ;;  %v464_v59 = vadd.f32 -0.16666654, %v463_v44  ;;  %v633_v28 = vsel %vm626_vm10, %v629_v56, %v632_v38  ;;  %v1405_v44 = vsel %vm1398_vm7, %v1401_v10, %v1404_v27 }
 0x163   : > { %v921_v4 = vmul.f32 %v920_v20, %v3935_v26  ;;  %v938_v60 = vxor.u32 2147483648, %v932_v1  ;;  %vm933_vm10 = vweird.f32 %v3269_v8 }
 0x164   : > { %v458_v23 = vmul.f32 %v457_v34, %v453_v32  ;;  %v465_v49 = vmul.f32 %v464_v59, %v453_v32  ;;  %v786_v59 = vxor.u32 2147483648, %v769_v63 }
 0x165   : > { %v922_v24 = vadd.f32 -0.4999988, %v921_v4 }
 0x166   : > { %v459_v62 = vadd.f32 1.0, %v458_v23  ;;  %v466_v36 = vadd.f32 1.0, %v465_v49 }
 0x167   : > { %v923_v12 = vmul.f32 %v922_v24, %v3935_v26 }
 0x168   : > { %v467_v2 = vmul.f32 %v466_v36, %v451_v45  ;;  %v476_v50 = vxor.u32 2147483648, %v459_v62 }
 0x169   : > { %v924_v26 = vadd.f32 1.0, %v923_v12 }
 0x16a   : > { %v473_v61 = vxor.u32 2147483648, %v467_v2  ;;  %v477_v51 = vsel %vm475_vm15, %v476_v50, %v467_v2  ;;  %v1250_v45 = vsel %vm1248_vm1, %v476_v50, %v467_v2  ;;  %vm778_vm15 = vweird.f32 %v3595_v25 }
 0x16b   : > { %vm1552_vm1 = vcmp.lt.s32.totalorder %v1551_v17, 2  ;;  %v941_v46 = vxor.u32 2147483648, %v924_v26 }
 0x16c   : > { %v474_v55 = vsel %vm472_vm14, %v459_v62, %v473_v61  ;;  %v1247_v32 = vsel %vm1245_vm12, %v459_v62, %v473_v61  ;;  %vm782_vm12 = vcmp.eq.s32.totalorder %v780_v35, 0  ;;  %vm781_vm14 = vcmp.lt.s32.totalorder %v780_v35, 2 }
 0x16d   : > { %v478_v48 = vsel %vm471_vm13, %v474_v55, %v477_v51  ;;  %v1251_v52 = vsel %vm1244_vm11, %v1247_v32, %v1250_v45  ;;  %vm623_vm11 = vweird.f32 %v3274_v14  ;;  %v784_v57 = vsel %vm782_vm12, %v769_v63, %v783_v40 }
 0x16e   : > { %v3957_v31 = vsel %vm468_vm3, nan, %v478_v48  ;;  %v3959_v13 = vsel %vm468_vm3, nan, %v1251_v52  ;;  %v3973_v22 = vsel %vm623_vm11, nan, %v633_v28  ;;  %v3975_v34 = vsel %vm623_vm11, nan, %v1405_v44 }
 0x16f   : > { %1731 = vrot.lane.b32.xlu0 %v3959_v13, %s5255_s26  ;;  %1734 = vrot.lane.b32.xlu1 %v3957_v31, %s5269_s27  ;;  %v915_v14 = vsel %vm792_vm8, %v914_v21, %v3621_v0  ;;  %vm785_vm13 = vcmp.eq.s32.totalorder %v780_v35, 2  ;;  %vm1553_vm8 = vcmp.eq.s32.totalorder %v1551_v17, 0  ;;  %s5273_s26 = smov 100   ;;  %vm1768_vm11 = vcmask 31744  }
 0x170   : > { %1727 = vrot.lane.b32.xlu2 %v3957_v31, %s5265_s28  ;;  %v787_v23 = vsel %vm785_vm13, %v786_v59, %v777_v33  ;;  %v917_v58 = vsel %vm3914_vm2, 0, %v915_v14  ;;  %v1555_v62 = vsel %vm1553_vm8, %v769_v63, %v783_v40  ;;  %vm1556_vm2 = vcmp.eq.s32.totalorder %v1551_v17, 2 }
 0x171   : > { %v788_v49 = vsel %vm781_vm14, %v784_v57, %v787_v23  ;;  %v934_v0 = vadd.s32 3, %v917_v58  ;;  %v1558_v36 = vsel %vm1556_vm2, %v786_v59, %v777_v33  ;;  %v1705_v5 = vand.u32 3, %v917_v58 }
 0x172   : > { %v3994_v3 = vsel %vm778_vm15, nan, %v788_v49  ;;  %v1559_v37 = vsel %vm1552_vm1, %v1555_v62, %v1558_v36  ;;  %vm1770_vm12 = vcmask 64512   ;;  %vm1772_vm13 = vcmask 97280  }
 0x173   : > { %v935_v47 = vand.u32 3, %v934_v0  ;;  %v4005_v2 = vsel %vm778_vm15, nan, %v1559_v37  ;;  %vm1707_vm4 = vcmp.eq.s32.totalorder %v1705_v5, 0  ;;  %vm1710_vm6 = vcmp.eq.s32.totalorder %v1705_v5, 2 }
 0x174   : > { %v1709_v50 = vsel %vm1707_vm4, %v924_v26, %v938_v60  ;;  %vm1706_vm9 = vcmp.lt.s32.totalorder %v1705_v5, 2  ;;  %v1712_v43 = vsel %vm1710_vm6, %v941_v46, %v932_v1  ;;  %vm1774_vm14 = vcmask 130048  }
 0x175   : > { %vm937_vm3 = vcmp.eq.s32.totalorder %v935_v47, 0  ;;  %vm940_vm5 = vcmp.eq.s32.totalorder %v935_v47, 2  ;;  %vm936_vm7 = vcmp.lt.s32.totalorder %v935_v47, 2  ;;  %v1713_v41 = vsel %vm1706_vm9, %v1709_v50, %v1712_v43 }
 0x176   : > { %v939_v42 = vsel %vm937_vm3, %v924_v26, %v938_v60  ;;  %v942_v25 = vsel %vm940_vm5, %v941_v46, %v932_v1  ;;  %v4016_v54 = vsel %vm933_vm10, nan, %v1713_v41  ;;  %vm1776_vm15 = vcmask 162816  }
 0x177   : > { %1741 = vrot.lane.b32.xlu0 %v3973_v22, %s5259_s29  ;;  %1745 = vrot.lane.b32.xlu1 %v3975_v34, %s5302_s30  ;;  %v943_v19 = vsel %vm936_vm7, %v939_v42, %v942_v25  ;;  %vm1778_vm8 = vcmask 195584   ;;  %vm1780_vm2 = vcmask 228352   ;;  %vm1782_vm1 = vcmask 261120  }
 0x178   : > { %1737 = vrot.lane.b32.xlu2 %v3959_v13, %s5257_s2  ;;  %v4014_v6 = vsel %vm933_vm10, nan, %v943_v19  ;;  %s5291_s2 = smov 116   ;;  %vm1784_vm3 = vcmask 293888   ;;  %vm1786_vm4 = vcmask 326656   ;;  %vm1788_vm5 = vcmask 359424  }
 0x179   : > { %vm1790_vm6 = vcmask 392192   ;;  %vm1792_vm7 = vcmask 424960   ;;  %vm1794_vm9 = vcmask 457728   ;;  %vm1796_vm10 = vcmask 490496  }
 0x17d   : > { %v4060_v8 = vpop.permute.xlu2 %1716 }
 0x17e   : > { %5361 = vst [vmem:[#allocation8_spill] sm:$0xff] %v4060_v8 }
 0x17f   : > { %1751 = vrot.lane.b32.xlu0 %v3975_v34, %s5294_s3  ;;  %1755 = vrot.lane.b32.xlu1 %v3994_v3, %s5261_s4 }
 0x180   : > { %1748 = vrot.lane.b32.xlu2 %v3973_v22, %s5263_s5 }
 0x187   : > { %1762 = vrot.lane.b32.xlu0 %v3994_v3, %s5275_s11  ;;  %1765 = vrot.lane.b32.xlu1 %v4005_v2, %s5303_s13 }
 0x188   : > { %1759 = vrot.lane.b32.xlu2 %v4005_v2, %s5253_s14  ;;  %s5271_s14 = smov 44  }
 0x18f   : > { %1803 = vrot.lane.b32.xlu0 %v4014_v6, %s5267_s25  ;;  %1806 = vrot.lane.b32.xlu1 %v4016_v54, %s5289_s17 }
 0x190   : > { %1799 = vrot.lane.b32.xlu2 %v4016_v54, %s5287_s24 }
 0x195   : > { %v4082_v51 = vpop.permute.xlu1 %1723 }
 0x196   : > { %5364 = vst [vmem:[#allocation11_spill] sm:$0xff] %v4082_v51  ;;  %v4084_v32 = vpop.permute.xlu0 %1720 }
 0x197   : > { %1812 = vrot.lane.b32.xlu0 %v3800_v39, %s5265_s28  ;;  %1815 = vrot.lane.b32.xlu1 %v3796_v18, %s5320_s20  ;;  %5365 = vst [vmem:[#allocation12_spill] sm:$0xff] %v4084_v32 }
 0x198   : > { %1809 = vrot.lane.b32.xlu2 %v3796_v18, %s5322_s21 }
 0x19f   : > { %1821 = vrot.lane.b32.xlu0 %v3957_v31, %s3138_s22  ;;  %1824 = vrot.lane.b32.xlu1 %v3959_v13, %s5259_s29  ;;  %s5314_s29 = smov 68  }
 0x1a0   : > { %1818 = vrot.lane.b32.xlu2 %v3800_v39, %s5269_s27 }
 0x1a7   : > { %1830 = vrot.lane.b32.xlu0 %v3959_v13, %s5263_s5  ;;  %1833 = vrot.lane.b32.xlu1 %v3973_v22, %s5271_s14  ;;  %s5279_s5 = smov 40  }
 0x1a8   : > { %1827 = vrot.lane.b32.xlu2 %v3957_v31, %s5273_s26 }
 0x1af   : > { %1839 = vrot.lane.b32.xlu0 %v3973_v22, %s5291_s2  ;;  %1842 = vrot.lane.b32.xlu1 %v3975_v34, %s5275_s11 }
 0x1b0   : > { %1836 = vrot.lane.b32.xlu2 %v3975_v34, %s5261_s4  ;;  %s5283_s4 = smov 24  }
 0x1b7   : > { %1863 = vrot.lane.b32.xlu0 %v3994_v3, %s5314_s29  ;;  %1866 = vrot.lane.b32.xlu1 %v4005_v2, %s5267_s25  ;;  %s5297_s25 = smov 112  }
 0x1b8   : > { %1860 = vrot.lane.b32.xlu2 %v3994_v3, %s5303_s13 }
 0x1bf   : > { %1872 = vrot.lane.b32.xlu0 %v4016_v54, %s5265_s28  ;;  %1875 = vrot.lane.b32.xlu1 %v4014_v6, %s5320_s20  ;;  %s5281_s28 = smov 96  }
 0x1c0   : > { %1869 = vrot.lane.b32.xlu2 %v4014_v6, %s5322_s21 }
 0x1c7   : > { %1881 = vrot.lane.b32.xlu0 %v3796_v18, %s5283_s4  ;;  %1884 = vrot.lane.b32.xlu1 %v3800_v39, %s3138_s22 }
 0x1c8   : > { %1878 = vrot.lane.b32.xlu2 %v4016_v54, %s5269_s27  ;;  %s5285_s27 = smov 8  }
 0x1ca   : > { %v4068_v61 = vpop.permute.xlu2 %1727 }
 0x1cb   : > { %5362 = vst [vmem:[#allocation9_spill] sm:$0xff] %v4068_v61 }
 0x1cf   : > { %1890 = vrot.lane.b32.xlu0 %v3800_v39, %s5273_s26  ;;  %1893 = vrot.lane.b32.xlu1 %v3957_v31, %s5279_s5 }
 0x1d0   : > { %1887 = vrot.lane.b32.xlu2 %v3796_v18, %s5281_s28 }
 0x1d2   : > { %v4076_v55 = vpop.permute.xlu2 %1737 }
 0x1d3   : > { %5363 = vst [vmem:[#allocation10_spill] sm:$0xff] %v4076_v55 }
 0x1d7   : > { %1899 = vrot.lane.b32.xlu0 %v3957_v31, %s5297_s25  ;;  %1902 = vrot.lane.b32.xlu1 %v3959_v13, %s5291_s2 }
 0x1d8   : > { %1896 = vrot.lane.b32.xlu2 %v3959_v13, %s5271_s14  ;;  %s3148_s14 = smov 80  }
 0x1da   : > { %v4088_v45 = vpop.permute.xlu2 %1748 }
 0x1df   : > { %1923 = vrot.lane.b32.xlu0 %v3975_v34, %s5303_s13  ;;  %1926 = vrot.lane.b32.xlu1 %v3973_v22, %s5277_s23 }
 0x1e0   : > { %1920 = vrot.lane.b32.xlu2 %v3973_v22, %s5275_s11 }
 0x1e1   : > { %v4096_v9 = vpop.permute.xlu1 %1734  ;;  %v4098_v48 = vpop.permute.xlu0 %1731 }
 0x1e2   : > { %5366 = vst [vmem:[#allocation13_spill] sm:$0xff] %v4096_v9  ;;  %v4100_v52 = vpop.permute.xlu2 %1759 }
 0x1e3   : > { %5367 = vst [vmem:[#allocation14_spill] sm:$0xff] %v4098_v48 }
 0x1e4   : > { %5368 = vst [vmem:[#allocation15_spill] sm:$0xff] %v4100_v52 }
 0x1e7   : > { %1932 = vrot.lane.b32.xlu0 %v3994_v3, %s5285_s27  ;;  %1935 = vrot.lane.b32.xlu1 %v4005_v2, %s5322_s21 }
 0x1e8   : > { %1929 = vrot.lane.b32.xlu2 %v3975_v34, %s5314_s29 }
 0x1e9   : > { %v4108_v11 = vpop.permute.xlu1 %1745  ;;  %v4110_v29 = vpop.permute.xlu0 %1741 }
 0x1ea   : > { %5369 = vst [vmem:[#allocation16_spill] sm:$0xff] %v4108_v11  ;;  %v4112_v7 = vpop.permute.xlu2 %1799 }
 0x1eb   : > { %5370 = vst [vmem:[#allocation17_spill] sm:$0xff] %v4110_v29 }
 0x1ef   : > { %1941 = vrot.lane.b32.xlu0 %v4005_v2, %s5320_s20  ;;  %1944 = vrot.lane.b32.xlu1 %v4014_v6, %s5283_s4 }
 0x1f0   : > { %1938 = vrot.lane.b32.xlu2 %v3994_v3, %s3148_s14 }
 0x1f1   : > { %v4120_v16 = vpop.permute.xlu1 %1755  ;;  %v4122_v56 = vpop.permute.xlu0 %1751 }
 0x1f2   : > { %5371 = vst [vmem:[#allocation18_spill] sm:$0xff] %v4120_v16  ;;  %v4124_v10 = vpop.permute.xlu2 %1809 }
 0x1f3   : > { %5372 = vst [vmem:[#allocation19_spill] sm:$0xff] %v4124_v10 }
 0x1f7   : > { %1950 = vrot.lane.b32.xlu0 %v4014_v6, %s5281_s28  ;;  %1953 = vrot.lane.b32.xlu1 %v4016_v54, %s5273_s26  ;;  %s5327_s26 = smov 60  }
 0x1f8   : > { %1947 = vrot.lane.b32.xlu2 %v4016_v54, %s3138_s22 }
 0x1f9   : > { %v4132_v33 = vpop.permute.xlu1 %1765  ;;  %v4134_v20 = vpop.permute.xlu0 %1762 }
 0x1fa   : > { %5373 = vst [vmem:[#allocation20_spill] sm:$0xff] %v4132_v33  ;;  %v4136_v38 = vpop.permute.xlu2 %1818 }
 0x1fb   : > { %5374 = vst [vmem:[#allocation21_spill] sm:$0xff] %v4136_v38 }
 0x1ff   : > { %1959 = vrot.lane.b32.xlu0 %v3800_v39, %s5279_s5  ;;  %1962 = vrot.lane.b32.xlu1 %v3796_v18, %s5294_s3 }
 0x200   : > { %1956 = vrot.lane.b32.xlu2 %v3796_v18, %s5302_s30 }
 0x201   : > { %v4144_v27 = vpop.permute.xlu1 %1806  ;;  %v4146_v63 = vpop.permute.xlu0 %1803 }
 0x202   : > { %5375 = vst [vmem:[#allocation22_spill] sm:$0xff] %v4144_v27  ;;  %v4148_v28 = vpop.permute.xlu2 %1827 }
 0x207   : > { %1983 = vrot.lane.b32.xlu0 %v3957_v31, %s5291_s2  ;;  %1986 = vrot.lane.b32.xlu1 %v3959_v13, %s5275_s11  ;;  %s5383_s11 = smov 92  }
 0x208   : > { %1965 = vrot.lane.b32.xlu2 %v3800_v39, %s5297_s25 }
 0x209   : > { %v4156_v44 = vpop.permute.xlu1 %1815  ;;  %v4158_v35 = vpop.permute.xlu0 %1812 }
 0x20a   : > { %5376 = vst [vmem:[#allocation23_spill] sm:$0xff] %v4156_v44  ;;  %v4160_v15 = vpop.permute.xlu2 %1836 }
 0x20b   : > { %5377 = vst [vmem:[#allocation24_spill] sm:$0xff] %v4158_v35 }
 0x20c   : > { %5378 = vst [vmem:[#allocation25_spill] sm:$0xff] %v4160_v15 }
 0x20f   : > { %1992 = vrot.lane.b32.xlu0 %v3959_v13, %s5277_s23  ;;  %1995 = vrot.lane.b32.xlu1 %v3973_v22, %s5287_s24  ;;  %s5384_s23 = smov 20  }
 0x210   : > { %1989 = vrot.lane.b32.xlu2 %v3957_v31, %s5327_s26 }
 0x211   : > { %v4168_v40 = vpop.permute.xlu1 %1824  ;;  %v4170_v21 = vpop.permute.xlu0 %1821 }
 0x212   : > { %5379 = vst [vmem:[#allocation26_spill] sm:$0xff] %v4168_v40  ;;  %v4172_v4 = vpop.permute.xlu2 %1860 }
 0x213   : > { %5380 = vst [vmem:[#allocation27_spill] sm:$0xff] %v4172_v4 }
 0x217   : > { %2001 = vrot.lane.b32.xlu0 %v3973_v22, %s5289_s17  ;;  %2004 = vrot.lane.b32.xlu1 %v3975_v34, %s3148_s14 }
 0x218   : > { %1998 = vrot.lane.b32.xlu2 %v3975_v34, %s5285_s27  ;;  %s5397_s27 = smov 16  }
 0x219   : > { %v4180_v59 = vpop.permute.xlu1 %1833  ;;  %v4182_v30 = vpop.permute.xlu0 %1830 }
 0x21a   : > { %5381 = vst [vmem:[#allocation28_spill] sm:$0xff] %v4180_v59  ;;  %v4184_v57 = vpop.permute.xlu2 %1869 }
 0x21b   : > { %5382 = vst [vmem:[#allocation29_spill] sm:$0xff] %v4184_v57 }
 0x21f   : > { %2010 = vrot.lane.b32.xlu0 %v4005_v2, %s5283_s4  ;;  %2013 = vrot.lane.b32.xlu1 %v3994_v3, %s5383_s11  ;;  %s5396_s4 = smov 88  }
 0x220   : > { %2007 = vrot.lane.b32.xlu2 %v3994_v3, %s5384_s23 }
 0x221   : > { %v4192_v14 = vpop.permute.xlu1 %1842  ;;  %v4194_v24 = vpop.permute.xlu0 %1839 }
 0x222   : > { %v4196_v23 = vpop.permute.xlu2 %1878 }
 0x223   : > { %5385 = vst [vmem:[#allocation30_spill] sm:$0xff] %v4196_v23 }
 0x227   : > { %2019 = vrot.lane.b32.xlu0 %v4014_v6, %s5302_s30  ;;  %2022 = vrot.lane.b32.xlu1 %v4016_v54, %s5279_s5  ;;  %s3150_s5 = smov 56  }
 0x228   : > { %2016 = vrot.lane.b32.xlu2 %v4005_v2, %s5281_s28  ;;  %s5393_s28 = smov 72  }
 0x229   : > { %v4204_v49 = vpop.permute.xlu1 %1866  ;;  %v4206_v17 = vpop.permute.xlu0 %1863 }
 0x22a   : > { %5386 = vst [vmem:[#allocation31_spill] sm:$0xff] %v4204_v49  ;;  %v4208_v58 = vpop.permute.xlu2 %1887 }
 0x22b   : > { %5387 = vst [vmem:[#allocation32_spill] sm:$0xff] %v4206_v17 }
 0x22f   : > { %2028 = vrot.lane.b32.xlu0 %v4016_v54, %s5297_s25  ;;  %2046 = vrot.lane.b32.xlu1 %v3796_v18, %s5297_s25 }
 0x230   : > { %2025 = vrot.lane.b32.xlu2 %v4014_v6, %s5294_s3 }
 0x231   : > { %v4216_v53 = vpop.permute.xlu1 %1875  ;;  %v4218_v12 = vpop.permute.xlu0 %1872 }
 0x232   : > { %5388 = vst [vmem:[#allocation33_spill] sm:$0xff] %v4216_v53  ;;  %v4220_v0 = vpop.permute.xlu2 %1896 }
 0x233   : > { %5389 = vst [vmem:[#allocation34_spill] sm:$0xff] %v4218_v12 }
 0x234   : > { %5390 = vst [vmem:[#allocation35_spill] sm:$0xff] %v4220_v0 }
 0x237   : > { %2052 = vrot.lane.b32.xlu0 %v3796_v18, %s3150_s5  ;;  %2055 = vrot.lane.b32.xlu1 %v3800_v39, %s5327_s26 }
 0x238   : > { %2049 = vrot.lane.b32.xlu2 %v3800_v39, %s5291_s2 }
 0x239   : > { %v4228_v1 = vpop.permute.xlu1 %1884  ;;  %v4230_v62 = vpop.permute.xlu0 %1881 }
 0x23a   : > { %5391 = vst [vmem:[#allocation36_spill] sm:$0xff] %v4228_v1  ;;  %v4232_v26 = vpop.permute.xlu2 %1920 }
 0x23b   : > { %5392 = vst [vmem:[#allocation37_spill] sm:$0xff] %v4230_v62 }
 0x23f   : > { %2061 = vrot.lane.b32.xlu0 %v3957_v31, %s5393_s28  ;;  %2064 = vrot.lane.b32.xlu1 %v3959_v13, %s5289_s17  ;;  %s5402_s17 = smov 104  }
 0x240   : > { %2058 = vrot.lane.b32.xlu2 %v3959_v13, %s5287_s24  ;;  %s5401_s24 = smov 32  }
 0x241   : > { %v4240_v36 = vpop.permute.xlu1 %1893  ;;  %v4242_v47 = vpop.permute.xlu0 %1890 }
 0x242   : > { %5394 = vst [vmem:[#allocation38_spill] sm:$0xff] %v4240_v36  ;;  %v4244_v5 = vpop.permute.xlu2 %1929 }
 0x243   : > { %5395 = vst [vmem:[#allocation39_spill] sm:$0xff] %v4242_v47 }
 0x247   : > { %2070 = vrot.lane.b32.xlu0 %v3975_v34, %s5384_s23  ;;  %2073 = vrot.lane.b32.xlu1 %v3973_v22, %s5396_s4 }
 0x248   : > { %2067 = vrot.lane.b32.xlu2 %v3973_v22, %s5397_s27 }
 0x249   : > { %v4252_v37 = vpop.permute.xlu1 %1902  ;;  %v4254_v60 = vpop.permute.xlu0 %1899 }
 0x24a   : > { %5398 = vst [vmem:[#allocation40_spill] sm:$0xff] %v4252_v37  ;;  %v4256_v46 = vpop.permute.xlu2 %1938 }
 0x24b   : > { %5399 = vst [vmem:[#allocation41_spill] sm:$0xff] %v4254_v60 }
 0x24c   : > { %5400 = vst [vmem:[#allocation42_spill] sm:$0xff] %v4256_v46 }
 0x24f   : > { %2079 = vrot.lane.b32.xlu0 %v3994_v3, %s5401_s24  ;;  %2082 = vrot.lane.b32.xlu1 %v4005_v2, %s5302_s30  ;;  %s5423_s30 = smov 48  }
 0x250   : > { %2076 = vrot.lane.b32.xlu2 %v3975_v34, %s5383_s11 }
 0x251   : > { %v4264_v42 = vpop.permute.xlu1 %1926  ;;  %v4266_v50 = vpop.permute.xlu0 %1923 }
 0x252   : > { %v4268_v25 = vpop.permute.xlu2 %1947 }
 0x257   : > { %2088 = vrot.lane.b32.xlu0 %v4005_v2, %s5294_s3  ;;  %2106 = vrot.lane.b32.xlu1 %v4014_v6, %s5297_s25 }
 0x258   : > { %2085 = vrot.lane.b32.xlu2 %v3994_v3, %s5402_s17 }
 0x259   : > { %v4276_v43 = vpop.permute.xlu1 %1935  ;;  %v4278_v19 = vpop.permute.xlu0 %1932 }
 0x25a   : > { %5403 = vst [vmem:[#allocation43_spill] sm:$0xff] %v4276_v43  ;;  %v4280_v41 = vpop.permute.xlu2 %1956 }
 0x25b   : > { %5404 = vst [vmem:[#allocation44_spill] sm:$0xff] %v4278_v19 }
 0x25c   : > { %5405 = vst [vmem:[#allocation45_spill] sm:$0xff] %v4280_v41 }
 0x25f   : > { %2112 = vrot.lane.b32.xlu0 %v4014_v6, %s3150_s5  ;;  %2115 = vrot.lane.b32.xlu1 %v4016_v54, %s5327_s26 }
 0x260   : > { %2109 = vrot.lane.b32.xlu2 %v4016_v54, %s5291_s2  ;;  %s5412_s2 = smov 100  }
 0x261   : > { %v4288_v23 = vpop.permute.xlu1 %1944  ;;  %v4290_v53 = vpop.permute.xlu0 %1941 }
 0x262   : > { %5406 = vst [vmem:[#allocation46_spill] sm:$0xff] %v4290_v53  ;;  %v4292_v12 = vpop.permute.xlu2 %1965 }
 0x267   : > { %2121 = vrot.lane.b32.xlu0 %v3796_v18, %s5314_s29  ;;  %2124 = vrot.lane.b32.xlu1 %v3800_v39, %s5393_s28 }
 0x268   : > { %2118 = vrot.lane.b32.xlu2 %v3796_v18, %s5303_s13 }
 0x269   : > { %v4300_v57 = vpop.permute.xlu1 %1953  ;;  %v4302_v49 = vpop.permute.xlu0 %1950 }
 0x26a   : > { %v4304_v17 = vpop.permute.xlu2 %1989 }
 0x26b   : > { %5407 = vst [vmem:[#allocation47_spill] sm:$0xff] %v4304_v17 }
 0x26f   : > { %2130 = vrot.lane.b32.xlu0 %v3959_v13, %s5397_s27  ;;  %2133 = vrot.lane.b32.xlu1 %v3957_v31, %s5320_s20 }
 0x270   : > { %2127 = vrot.lane.b32.xlu2 %v3957_v31, %s5322_s21 }
 0x271   : > { %v4312_v4 = vpop.permute.xlu1 %1962  ;;  %v4314_v55 = vpop.permute.xlu0 %1959 }
 0x272   : > { %5408 = vst [vmem:[#allocation48_spill] sm:$0xff] %v4314_v55  ;;  %v4316_v9 = vpop.permute.xlu2 %1998 }
 0x273   : > { %5409 = vst [vmem:[#allocation49_spill] sm:$0xff] %v4316_v9 }
 0x277   : > { %2139 = vrot.lane.b32.xlu0 %v3973_v22, %s3138_s22  ;;  %2142 = vrot.lane.b32.xlu1 %v3975_v34, %s5401_s24  ;;  %s5415_s24 = smov 52  }
 0x278   : > { %2136 = vrot.lane.b32.xlu2 %v3959_v13, %s5396_s4 }
 0x279   : > { %v4324_v17 = vpop.permute.xlu1 %1986  ;;  %v4326_v48 = vpop.permute.xlu0 %1983 }
 0x27a   : > { %5410 = vst [vmem:[#allocation50_spill] sm:$0xff] %v4324_v17  ;;  %v4328_v61 = vpop.permute.xlu2 %2007 }
 0x27b   : > { %5411 = vst [vmem:[#allocation51_spill] sm:$0xff] %v4326_v48 }
 0x27f   : > { %2148 = vrot.lane.b32.xlu0 %v3975_v34, %s5402_s17  ;;  %2166 = vrot.lane.b32.xlu1 %v3994_v3, %s5294_s3  ;;  %s5418_s3 = smov 8  }
 0x280   : > { %2145 = vrot.lane.b32.xlu2 %v3973_v22, %s5412_s2 }
 0x281   : > { %v4336_v9 = vpop.permute.xlu1 %1995  ;;  %v4338_v51 = vpop.permute.xlu0 %1992 }
 0x282   : > { %5413 = vst [vmem:[#allocation52_spill] sm:$0xff] %v4336_v9  ;;  %v4340_v32 = vpop.permute.xlu2 %2016 }
 0x283   : > { %5414 = vst [vmem:[#allocation53_spill] sm:$0xff] %v4338_v51 }
 0x287   : > { %2172 = vrot.lane.b32.xlu0 %v3994_v3, %s5415_s24  ;;  %2175 = vrot.lane.b32.xlu1 %v4005_v2, %s3150_s5 }
 0x288   : > { %2169 = vrot.lane.b32.xlu2 %v4005_v2, %s5297_s25  ;;  %s5422_s25 = smov 24  }
 0x289   : > { %v4348_v48 = vpop.permute.xlu1 %2004  ;;  %v4350_v17 = vpop.permute.xlu0 %2001 }
 0x28a   : > { %5416 = vst [vmem:[#allocation54_spill] sm:$0xff] %v4348_v48  ;;  %v4352_v8 = vpop.permute.xlu2 %2025 }
 0x28b   : > { %5417 = vst [vmem:[#allocation55_spill] sm:$0xff] %v4350_v17 }
 0x28f   : > { %2181 = vrot.lane.b32.xlu0 %v4014_v6, %s5314_s29  ;;  %2184 = vrot.lane.b32.xlu1 %v4016_v54, %s5393_s28 }
 0x290   : > { %2178 = vrot.lane.b32.xlu2 %v4014_v6, %s5303_s13  ;;  %s5424_s13 = smov 96  }
 0x291   : > { %v4360_v9 = vpop.permute.xlu1 %2013  ;;  %v4362_v51 = vpop.permute.xlu0 %2010 }
 0x292   : > { %v4364_v0 = vpop.permute.xlu2 %2049 }
 0x297   : > { %2190 = vrot.lane.b32.xlu0 %v3800_v39, %s5322_s21  ;;  %2193 = vrot.lane.b32.xlu1 %v3796_v18, %s3148_s14 }
 0x298   : > { %2187 = vrot.lane.b32.xlu2 %v3796_v18, %s5418_s3 }
 0x299   : > { %v4372_v48 = vpop.permute.xlu1 %2022  ;;  %v4374_v17 = vpop.permute.xlu0 %2019 }
 0x29a   : > { %5419 = vst [vmem:[#allocation56_spill] sm:$0xff] %v4372_v48  ;;  %v4376_v36 = vpop.permute.xlu2 %2058 }
 0x29b   : > { %5420 = vst [vmem:[#allocation57_spill] sm:$0xff] %v4374_v17 }
 0x29c   : > { %5421 = vst [vmem:[#allocation58_spill] sm:$0xff] %v4376_v36 }
 0x29f   : > { %2199 = vrot.lane.b32.xlu0 %v3957_v31, %s5422_s25  ;;  %2202 = vrot.lane.b32.xlu1 %v3959_v13, %s3138_s22  ;;  %s5426_s22 = smov 64  }
 0x2a0   : > { %2196 = vrot.lane.b32.xlu2 %v3800_v39, %s5320_s20 }
 0x2a1   : > { %v4384_v52 = vpop.permute.xlu1 %2046  ;;  %v4386_v16 = vpop.permute.xlu0 %2028 }
 0x2a2   : > { %v4388_v55 = vpop.permute.xlu2 %2067 }
 0x2a7   : > { %2208 = vrot.lane.b32.xlu0 %v3959_v13, %s5412_s2  ;;  %2226 = vrot.lane.b32.xlu1 %v3973_v22, %s5423_s30 }
 0x2a8   : > { %2205 = vrot.lane.b32.xlu2 %v3957_v31, %s5424_s13 }
 0x2a9   : > { %v4396_v48 = vpop.permute.xlu1 %2055  ;;  %v4398_v17 = vpop.permute.xlu0 %2052 }
 0x2aa   : > { %v4400_v41 = vpop.permute.xlu2 %2076 }
 0x2ab   : > { %5425 = vst [vmem:[#allocation59_spill] sm:$0xff] %v4400_v41 }
 0x2af   : > { %2232 = vrot.lane.b32.xlu0 %v3994_v3, %s5426_s22  ;;  %2235 = vrot.lane.b32.xlu1 %v4005_v2, %s5314_s29  ;;  %s5433_s29 = smov 44  }
 0x2b0   : > { %2229 = vrot.lane.b32.xlu2 %v3975_v34, %s5415_s24 }
 0x2b1   : > { %v4408_v11 = vpop.permute.xlu1 %2064  ;;  %v4410_v29 = vpop.permute.xlu0 %2061 }
 0x2b2   : > { %5427 = vst [vmem:[#allocation60_spill] sm:$0xff] %v4408_v11  ;;  %v4412_v15 = vpop.permute.xlu2 %2085 }
 0x2b3   : > { %5428 = vst [vmem:[#allocation61_spill] sm:$0xff] %v4410_v29 }
 0x2b4   : > { %5429 = vst [vmem:[#allocation62_spill] sm:$0xff] %v4412_v15 }
 0x2b7   : > { %2241 = vrot.lane.b32.xlu0 %v4016_v54, %s5322_s21  ;;  %2244 = vrot.lane.b32.xlu1 %v4014_v6, %s3148_s14  ;;  %s5436_s21 = smov 4  }
 0x2b8   : > { %2238 = vrot.lane.b32.xlu2 %v4014_v6, %s5418_s3 }
 0x2b9   : > { %v4420_v41 = vpop.permute.xlu1 %2073  ;;  %v4422_v59 = vpop.permute.xlu0 %2070 }
 0x2ba   : > { %5430 = vst [vmem:[#allocation63_spill] sm:$0xff] %v4420_v41  ;;  %v2110_v38 = vpop.permute.xlu2 %2109 }
 0x2bf   : > { %2250 = vrot.lane.b32.xlu0 %v3796_v18, %s5384_s23  ;;  %2253 = vrot.lane.b32.xlu1 %v3800_v39, %s5422_s25 }
 0x2c0   : > { %2247 = vrot.lane.b32.xlu2 %v4016_v54, %s5320_s20  ;;  %s5435_s20 = smov 76  }
 0x2c1   : > { %v4430_v15 = vpop.permute.xlu1 %2082  ;;  %v4432_v11 = vpop.permute.xlu0 %2079 }
 0x2c2   : > { %5431 = vst [vmem:[#allocation64_spill] sm:$0xff] %v4430_v15  ;;  %v2119_v53 = vpop.permute.xlu2 %2118 }
 0x2c3   : > { %5432 = vst [vmem:[#allocation65_spill] sm:$0xff] %v4432_v11 }
 0x2c7   : > { %2259 = vrot.lane.b32.xlu0 %v3800_v39, %s5424_s13  ;;  %2277 = vrot.lane.b32.xlu1 %v3957_v31, %s5433_s29 }
 0x2c8   : > { %2256 = vrot.lane.b32.xlu2 %v3796_v18, %s5383_s11 }
 0x2c9   : > { %v2107_v41 = vpop.permute.xlu1 %2106  ;;  %v4440_v44 = vpop.permute.xlu0 %2088 }
 0x2ca   : > { %5434 = vst [vmem:[#allocation66_spill] sm:$0xff] %v4440_v44  ;;  %v4442_v29 = vpop.permute.xlu2 %2127  ;;  %v2151_v15 = vsel %vm1768_vm11, %v2107_v41, %v2110_v38 }
 0x2cf   : > { %2283 = vrot.lane.b32.xlu0 %v3973_v22, %s5327_s26  ;;  %2286 = vrot.lane.b32.xlu1 %v3975_v34, %s5426_s22 }
 0x2d0   : > { %2280 = vrot.lane.b32.xlu2 %v3959_v13, %s5423_s30 }
 0x2d1   : > { %v2116_v11 = vpop.permute.xlu1 %2115  ;;  %v2113_v46 = vpop.permute.xlu0 %2112 }
 0x2d2   : > { %v2137_v36 = vpop.permute.xlu2 %2136  ;;  %v2152_v44 = vsel %vm1770_vm12, %v2151_v15, %v2113_v46 }
 0x2d3   : > { %v2153_v35 = vsel %vm1772_vm13, %v2152_v44, %v2116_v11 }
 0x2d4   : > { %v2154_v43 = vsel %vm1774_vm14, %v2153_v35, %v2119_v53 }
 0x2d5   : > { %v2155_v15 = vsel %vm1776_vm15, %v2154_v43, %v3800_v39 }
 0x2d7   : > { %2292 = vrot.lane.b32.xlu0 %v4005_v2, %s5418_s3  ;;  %2295 = vrot.lane.b32.xlu1 %v3994_v3, %s5435_s20 }
 0x2d8   : > { %2289 = vrot.lane.b32.xlu2 %v3994_v3, %s5436_s21 }
 0x2d9   : > { %v2125_v38 = vpop.permute.xlu1 %2124  ;;  %v2122_v46 = vpop.permute.xlu0 %2121 }
 0x2da   : > { %v2146_v11 = vpop.permute.xlu2 %2145  ;;  %v2156_v44 = vsel %vm1778_vm8, %v2155_v15, %v2122_v46 }
 0x2db   : > { %v2157_v35 = vsel %vm1780_vm2, %v2156_v44, %v2125_v38 }
 0x2dc   : > { %v2158_v43 = vsel %vm1782_vm1, %v2157_v35, %v4442_v29 }
 0x2df   : > { %2301 = vrot.lane.b32.xlu0 %v4014_v6, %s5384_s23  ;;  %2304 = vrot.lane.b32.xlu1 %v4016_v54, %s5422_s25  ;;  %s5437_s25 = smov 40  }
 0x2e0   : > { %2298 = vrot.lane.b32.xlu2 %v4005_v2, %s3148_s14 }
 0x2e1   : > { %v2134_v53 = vpop.permute.xlu1 %2133  ;;  %v4472_v41 = vpop.permute.xlu0 %2130 }
 0x2e2   : > { %v2538_v38 = vsel %vm1768_vm11, %v2134_v53, %v2137_v36  ;;  %v2170_v15 = vpop.permute.xlu2 %2169  ;;  %v2159_v46 = vsel %vm1784_vm3, %v2158_v43, %v4472_v41 }
 0x2e3   : > { %v2539_v44 = vsel %vm1770_vm12, %v2538_v38, %v4170_v21  ;;  %v2160_v10 = vsel %vm1786_vm4, %v2159_v46, %v2134_v53 }
 0x2e4   : > { %v2161_v19 = vsel %vm1788_vm5, %v2160_v10, %v2137_v36  ;;  %v2540_v35 = vsel %vm1772_vm13, %v2539_v44, %v4168_v40 }
 0x2e5   : > { %v2541_v27 = vsel %vm1774_vm14, %v2540_v35, %v2146_v11 }
 0x2e7   : > { %2310 = vrot.lane.b32.xlu0 %v4016_v54, %s5424_s13  ;;  %2328 = vrot.lane.b32.xlu1 %v3796_v18, %s5437_s25  ;;  %s5444_s13 = smov 68  }
 0x2e8   : > { %2307 = vrot.lane.b32.xlu2 %v4014_v6, %s5383_s11 }
 0x2e9   : > { %v4490_v43 = vpop.permute.xlu1 %2142  ;;  %v4492_v53 = vpop.permute.xlu0 %2139 }
 0x2ea   : > { %5438 = vst [vmem:[#allocation67_spill] sm:$0xff] %v4490_v43  ;;  %v2179_v10 = vpop.permute.xlu2 %2178  ;;  %v2162_v36 = vsel %vm1790_vm6, %v2161_v19, %v4492_v53 }
 0x2eb   : > { %5439 = vst [vmem:[#allocation68_spill] sm:$0xff] %v4492_v53  ;;  %v2163_v38 = vsel %vm1792_vm7, %v2162_v36, %v4490_v43 }
 0x2ec   : > { %v2164_v46 = vsel %vm1794_vm9, %v2163_v38, %v2146_v11 }
 0x2ef   : > { %2337 = vrot.lane.b32.xlu1 %v3959_v13, %s5327_s26  ;;  %2334 = vrot.lane.b32.xlu0 %v3957_v31, %s3150_s5  ;;  %s5445_s26 = smov 84  }
 0x2f0   : > { %2331 = vrot.lane.b32.xlu2 %v3800_v39, %s5433_s29 }
 0x2f1   : > { %v2167_v44 = vpop.permute.xlu1 %2166  ;;  %v2149_v35 = vpop.permute.xlu0 %2148 }
 0x2f2   : > { %v2211_v19 = vsel %vm1768_vm11, %v2167_v44, %v2170_v15  ;;  %v2188_v53 = vpop.permute.xlu2 %2187  ;;  %v4507_v40 = vsel %vm1796_vm10, %v2164_v46, %v2149_v35  ;;  %v4510_v11 = vsel %vm1776_vm15, %v2541_v27, %v2149_v35 }
 0x2f3   : > { %5440 = vst [vmem:[#allocation69_spill] sm:$0xff] %v4507_v40 }
 0x2f4   : > { %5441 = vst [vmem:[#allocation70_spill] sm:$0xff] %v4510_v11 }
 0x2f7   : > { %2346 = vrot.lane.b32.xlu1 %v3975_v34, %s5435_s20  ;;  %2343 = vrot.lane.b32.xlu0 %v3973_v22, %s5393_s28 }
 0x2f8   : > { %2340 = vrot.lane.b32.xlu2 %v3975_v34, %s5436_s21 }
 0x2f9   : > { %v2176_v36 = vpop.permute.xlu1 %2175  ;;  %v2173_v38 = vpop.permute.xlu0 %2172 }
 0x2fa   : > { %v2197_v43 = vpop.permute.xlu2 %2196  ;;  %v2212_v15 = vsel %vm1770_vm12, %v2211_v19, %v2173_v38 }
 0x2fb   : > { %v2213_v46 = vsel %vm1772_vm13, %v2212_v15, %v2176_v36 }
 0x2fc   : > { %v2214_v44 = vsel %vm1774_vm14, %v2213_v46, %v2179_v10 }
 0x2fd   : > { %v2215_v35 = vsel %vm1776_vm15, %v2214_v44, %v4016_v54 }
 0x2ff   : > { %2355 = vrot.lane.b32.xlu1 %v3994_v3, %s5396_s4  ;;  %2352 = vrot.lane.b32.xlu0 %v4005_v2, %s5384_s23  ;;  %s5442_s23 = smov 124  }
 0x300   : > { %2349 = vrot.lane.b32.xlu2 %v3994_v3, %s5397_s27 }
 0x301   : > { %v2185_v27 = vpop.permute.xlu1 %2184  ;;  %v2182_v40 = vpop.permute.xlu0 %2181 }
 0x302   : > { %v2206_v11 = vpop.permute.xlu2 %2205  ;;  %v2216_v19 = vsel %vm1778_vm8, %v2215_v35, %v2182_v40 }
 0x303   : > { %v2217_v36 = vsel %vm1780_vm2, %v2216_v19, %v2185_v27 }
 0x304   : > { %v2218_v10 = vsel %vm1782_vm1, %v2217_v36, %v2188_v53 }
 0x307   : > { %2379 = vrot.lane.b32.xlu1 %v4016_v54, %s5433_s29  ;;  %2376 = vrot.lane.b32.xlu0 %v4014_v6, %s5437_s25 }
 0x308   : > { %2358 = vrot.lane.b32.xlu2 %v4005_v2, %s5383_s11  ;;  %s5443_s11 = smov 12  }
 0x309   : > { %v2194_v38 = vpop.permute.xlu1 %2193  ;;  %v2191_v15 = vpop.permute.xlu0 %2190 }
 0x30a   : > { %v2574_v46 = vsel %vm1768_vm11, %v2194_v38, %v2197_v43  ;;  %v2230_v44 = vpop.permute.xlu2 %2229  ;;  %v2219_v40 = vsel %vm1784_vm3, %v2218_v10, %v2191_v15 }
 0x30b   : > { %v2575_v27 = vsel %vm1770_vm12, %v2574_v46, %v4230_v62  ;;  %v2220_v53 = vsel %vm1786_vm4, %v2219_v40, %v2194_v38 }
 0x30c   : > { %v2221_v35 = vsel %vm1788_vm5, %v2220_v53, %v2197_v43  ;;  %v2576_v19 = vsel %vm1772_vm13, %v2575_v27, %v4228_v1  ;;  %v2262_v27 = vsel %vm1768_vm11, %v4088_v45, %v4122_v56 }
 0x30d   : > { %v2577_v36 = vsel %vm1774_vm14, %v2576_v19, %v2206_v11 }
 0x30f   : > { %2388 = vrot.lane.b32.xlu1 %v3957_v31, %s5442_s23  ;;  %2385 = vrot.lane.b32.xlu0 %v3800_v39, %s3150_s5 }
 0x310   : > { %2382 = vrot.lane.b32.xlu2 %v3796_v18, %s5415_s24 }
 0x311   : > { %v2203_v10 = vpop.permute.xlu1 %2202  ;;  %v2200_v15 = vpop.permute.xlu0 %2199 }
 0x312   : > { %v2239_v46 = vpop.permute.xlu2 %2238  ;;  %v2222_v38 = vsel %vm1790_vm6, %v2221_v35, %v2200_v15 }
 0x313   : > { %v2223_v43 = vsel %vm1792_vm7, %v2222_v38, %v2203_v10 }
 0x314   : > { %v2224_v40 = vsel %vm1794_vm9, %v2223_v43, %v2206_v11 }
 0x317   : > { %2397 = vrot.lane.b32.xlu1 %v3973_v22, %s5443_s11  ;;  %2394 = vrot.lane.b32.xlu0 %v3959_v13, %s5393_s28 }
 0x318   : > { %2391 = vrot.lane.b32.xlu2 %v3957_v31, %s5444_s13 }
 0x319   : > { %v2227_v53 = vpop.permute.xlu1 %2226  ;;  %v2209_v19 = vpop.permute.xlu0 %2208 }
 0x31a   : > { %v2263_v35 = vsel %vm1770_vm12, %v2262_v27, %v2227_v53  ;;  %v2248_v10 = vpop.permute.xlu2 %2247  ;;  %v4567_v11 = vsel %vm1796_vm10, %v2224_v40, %v2209_v19  ;;  %v4570_v15 = vsel %vm1776_vm15, %v2577_v36, %v2209_v19 }
 0x31b   : > { %v2264_v38 = vsel %vm1772_vm13, %v2263_v35, %v2230_v44 }
 0x31c   : > { %v2265_v43 = vsel %vm1774_vm14, %v2264_v38, %v4134_v20 }
 0x31d   : > { %v2266_v40 = vsel %vm1776_vm15, %v2265_v43, %v4132_v33 }
 0x31f   : > { %2406 = vrot.lane.b32.xlu1 %v3975_v34, %s5396_s4  ;;  %2403 = vrot.lane.b32.xlu0 %v3973_v22, %s5445_s26  ;;  %s5446_s4 = smov 36  }
 0x320   : > { %2400 = vrot.lane.b32.xlu2 %v3975_v34, %s5397_s27  ;;  %s5447_s27 = smov 120  }
 0x321   : > { %v2236_v27 = vpop.permute.xlu1 %2235  ;;  %v2233_v36 = vpop.permute.xlu0 %2232 }
 0x322   : > { %v2257_v53 = vpop.permute.xlu2 %2256  ;;  %v2267_v44 = vsel %vm1778_vm8, %v2266_v40, %v2233_v36 }
 0x323   : > { %v2268_v19 = vsel %vm1780_vm2, %v2267_v44, %v2236_v27 }
 0x324   : > { %v2269_v35 = vsel %vm1782_vm1, %v2268_v19, %v2239_v46 }
 0x327   : > { %2430 = vrot.lane.b32.xlu1 %v4014_v6, %s5415_s24  ;;  %2427 = vrot.lane.b32.xlu0 %v4005_v2, %s5437_s25  ;;  %s5450_s25 = smov 60  }
 0x328   : > { %2424 = vrot.lane.b32.xlu2 %v3994_v3, %s5446_s4 }
 0x329   : > { %v2245_v38 = vpop.permute.xlu1 %2244  ;;  %v2242_v1 = vpop.permute.xlu0 %2241 }
 0x32a   : > { %v2610_v43 = vsel %vm1768_vm11, %v2245_v38, %v2248_v10  ;;  %v2281_v62 = vpop.permute.xlu2 %2280  ;;  %v2270_v40 = vsel %vm1784_vm3, %v2269_v35, %v2242_v1 }
 0x32b   : > { %v2611_v27 = vsel %vm1770_vm12, %v2610_v43, %v4288_v23  ;;  %v2271_v46 = vsel %vm1786_vm4, %v2270_v40, %v2245_v38 }
 0x32c   : > { %v2272_v36 = vsel %vm1788_vm5, %v2271_v46, %v2248_v10  ;;  %v2612_v44 = vsel %vm1772_vm13, %v2611_v27, %v4268_v25  ;;  %v2313_v27 = vsel %vm1768_vm11, %v4148_v28, %v4182_v30 }
 0x32d   : > { %v2613_v19 = vsel %vm1774_vm14, %v2612_v44, %v2257_v53 }
 0x32f   : > { %2439 = vrot.lane.b32.xlu1 %v3800_v39, %s5442_s23  ;;  %2436 = vrot.lane.b32.xlu0 %v3796_v18, %s5447_s27 }
 0x330   : > { %2433 = vrot.lane.b32.xlu2 %v4016_v54, %s3150_s5 }
 0x331   : > { %v2254_v1 = vpop.permute.xlu1 %2253  ;;  %v2251_v35 = vpop.permute.xlu0 %2250 }
 0x332   : > { %v2290_v43 = vpop.permute.xlu2 %2289  ;;  %v2273_v38 = vsel %vm1790_vm6, %v2272_v36, %v2251_v35 }
 0x333   : > { %v2274_v10 = vsel %vm1792_vm7, %v2273_v38, %v2254_v1 }
 0x334   : > { %v2275_v40 = vsel %vm1794_vm9, %v2274_v10, %v2257_v53 }
 0x337   : > { %2448 = vrot.lane.b32.xlu1 %v3957_v31, %s5418_s3  ;;  %2445 = vrot.lane.b32.xlu0 %v3800_v39, %s5444_s13 }
 0x338   : > { %2442 = vrot.lane.b32.xlu2 %v3796_v18, %s5426_s22 }
 0x339   : > { %v2278_v46 = vpop.permute.xlu1 %2277  ;;  %v2260_v44 = vpop.permute.xlu0 %2259 }
 0x33a   : > { %v2314_v36 = vsel %vm1770_vm12, %v2313_v27, %v2278_v46  ;;  %v2299_v1 = vpop.permute.xlu2 %2298  ;;  %v4621_v53 = vsel %vm1796_vm10, %v2275_v40, %v2260_v44  ;;  %v4624_v35 = vsel %vm1776_vm15, %v2613_v19, %v2260_v44 }
 0x33b   : > { %5448 = vst [vmem:[#allocation71_spill] sm:$0xff] %v4621_v53  ;;  %v2315_v38 = vsel %vm1772_vm13, %v2314_v36, %v2281_v62 }
 0x33c   : > { %v2316_v10 = vsel %vm1774_vm14, %v2315_v38, %v4194_v24 }
 0x33d   : > { %v2317_v40 = vsel %vm1776_vm15, %v2316_v10, %v4192_v14 }
 0x33f   : > { %2457 = vrot.lane.b32.xlu1 %v3959_v13, %s5445_s26  ;;  %2454 = vrot.lane.b32.xlu0 %v3957_v31, %s3148_s14  ;;  %s5449_s26 = smov 116  }
 0x340   : > { %2451 = vrot.lane.b32.xlu2 %v3959_v13, %s5443_s11 }
 0x341   : > { %v2287_v27 = vpop.permute.xlu1 %2286  ;;  %v2284_v19 = vpop.permute.xlu0 %2283 }
 0x342   : > { %v2308_v46 = vpop.permute.xlu2 %2307  ;;  %v2318_v62 = vsel %vm1778_vm8, %v2317_v40, %v2284_v19 }
 0x343   : > { %v2319_v44 = vsel %vm1780_vm2, %v2318_v62, %v2287_v27 }
 0x344   : > { %v2320_v36 = vsel %vm1782_vm1, %v2319_v44, %v2290_v43 }
 0x347   : > { %2481 = vrot.lane.b32.xlu1 %v4014_v6, %s5426_s22  ;;  %2478 = vrot.lane.b32.xlu0 %v4016_v54, %s5442_s23 }
 0x348   : > { %2475 = vrot.lane.b32.xlu2 %v4014_v6, %s5447_s27 }
 0x349   : > { %v2296_v38 = vpop.permute.xlu1 %2295  ;;  %v2293_v53 = vpop.permute.xlu0 %2292 }
 0x34a   : > { %v2649_v10 = vsel %vm1768_vm11, %v2296_v38, %v2299_v1  ;;  %v2332_v33 = vpop.permute.xlu2 %2331  ;;  %v2321_v40 = vsel %vm1784_vm3, %v2320_v36, %v2293_v53 }
 0x34b   : > { %v2650_v27 = vsel %vm1770_vm12, %v2649_v10, %v4328_v61  ;;  %v2322_v43 = vsel %vm1786_vm4, %v2321_v40, %v2296_v38 }
 0x34c   : > { %v2323_v19 = vsel %vm1788_vm5, %v2322_v43, %v2299_v1  ;;  %v2651_v62 = vsel %vm1772_vm13, %v2650_v27, %v4362_v51  ;;  %v2361_v27 = vsel %vm1768_vm11, %v4208_v58, %v4242_v47 }
 0x34d   : > { %v2652_v44 = vsel %vm1774_vm14, %v2651_v62, %v2308_v46 }
 0x34f   : > { %2490 = vrot.lane.b32.xlu1 %v3800_v39, %s5418_s3  ;;  %2487 = vrot.lane.b32.xlu0 %v3796_v18, %s5436_s21 }
 0x350   : > { %2484 = vrot.lane.b32.xlu2 %v4016_v54, %s5444_s13 }
 0x351   : > { %v2305_v53 = vpop.permute.xlu1 %2304  ;;  %v2302_v36 = vpop.permute.xlu0 %2301 }
 0x352   : > { %v2341_v10 = vpop.permute.xlu2 %2340  ;;  %v2324_v38 = vsel %vm1790_vm6, %v2323_v19, %v2302_v36 }
 0x353   : > { %v2325_v1 = vsel %vm1792_vm7, %v2324_v38, %v2305_v53 }
 0x354   : > { %v2326_v40 = vsel %vm1794_vm9, %v2325_v1, %v2308_v46 }
 0x357   : > { %2514 = vrot.lane.b32.xlu1 %v3994_v3, %s5449_s26  ;;  %2496 = vrot.lane.b32.xlu0 %v3800_v39, %s3148_s14 }
 0x358   : > { %2493 = vrot.lane.b32.xlu2 %v3796_v18, %s5435_s20 }
 0x359   : > { %v2329_v43 = vpop.permute.xlu1 %2328  ;;  %v2311_v62 = vpop.permute.xlu0 %2310 }
 0x35a   : > { %v2362_v19 = vsel %vm1770_vm12, %v2361_v27, %v2329_v43  ;;  %v2350_v53 = vpop.permute.xlu2 %2349  ;;  %v4675_v46 = vsel %vm1796_vm10, %v2326_v40, %v2311_v62  ;;  %v4678_v36 = vsel %vm1776_vm15, %v2652_v44, %v2311_v62 }
 0x35b   : > { %v2363_v38 = vsel %vm1772_vm13, %v2362_v19, %v2332_v33 }
 0x35c   : > { %v2364_v1 = vsel %vm1774_vm14, %v2363_v38, %v4254_v60 }
 0x35d   : > { %v2365_v40 = vsel %vm1776_vm15, %v2364_v1, %v4252_v37 }
 0x35f   : > { %2523 = vrot.lane.b32.xlu1 %v4005_v2, %s5426_s22  ;;  %2520 = vrot.lane.b32.xlu0 %v3994_v3, %s5450_s25 }
 0x360   : > { %2517 = vrot.lane.b32.xlu2 %v4005_v2, %s5447_s27 }
 0x361   : > { %v2338_v27 = vpop.permute.xlu1 %2337  ;;  %v2335_v44 = vpop.permute.xlu0 %2334 }
 0x362   : > { %v2359_v43 = vpop.permute.xlu2 %2358  ;;  %v2366_v33 = vsel %vm1778_vm8, %v2365_v40, %v2335_v44 }
 0x363   : > { %v2367_v62 = vsel %vm1780_vm2, %v2366_v33, %v2338_v27 }
 0x364   : > { %v2368_v19 = vsel %vm1782_vm1, %v2367_v62, %v3973_v22 }
 0x365   : > { %v2369_v38 = vsel %vm1784_vm3, %v2368_v19, %v2341_v10 }
 0x367   : > { %2532 = vrot.lane.b32.xlu1 %v4014_v6, %s5435_s20  ;;  %2529 = vrot.lane.b32.xlu0 %v4016_v54, %s5418_s3  ;;  %s5451_s3 = smov 112  }
 0x368   : > { %2526 = vrot.lane.b32.xlu2 %v4014_v6, %s5436_s21 }
 0x369   : > { %v2347_v1 = vpop.permute.xlu1 %2346  ;;  %v2344_v37 = vpop.permute.xlu0 %2343 }
 0x36a   : > { %v2383_v60 = vpop.permute.xlu2 %2382  ;;  %v2370_v40 = vsel %vm1786_vm4, %v2369_v38, %v2344_v37  ;;  %v2688_v27 = vsel %vm1768_vm11, %v2344_v37, %v2347_v1 }
 0x36b   : > { %v2371_v44 = vsel %vm1788_vm5, %v2370_v40, %v2347_v1  ;;  %v2689_v33 = vsel %vm1770_vm12, %v2688_v27, %v4388_v55 }
 0x36c   : > { %v2372_v10 = vsel %vm1790_vm6, %v2371_v44, %v2350_v53  ;;  %v2690_v37 = vsel %vm1772_vm13, %v2689_v33, %v4422_v59 }
 0x36f   : > { %2556 = vrot.lane.b32.xlu1 %v3975_v34, %s5449_s26  ;;  %2553 = vrot.lane.b32.xlu0 %v3973_v22, %s5451_s3 }
 0x370   : > { %2535 = vrot.lane.b32.xlu2 %v4016_v54, %s3148_s14  ;;  %s5453_s14 = smov 108  }
 0x371   : > { %v2356_v62 = vpop.permute.xlu1 %2355  ;;  %v2353_v19 = vpop.permute.xlu0 %2352 }
 0x372   : > { %v2691_v38 = vsel %vm1774_vm14, %v2690_v37, %v2356_v62  ;;  %v2392_v53 = vpop.permute.xlu2 %2391  ;;  %v2373_v1 = vsel %vm1792_vm7, %v2372_v10, %v2353_v19  ;;  %v2409_v10 = vsel %vm1768_vm11, %v4302_v49, %v4300_v57 }
 0x373   : > { %v4719_v40 = vsel %vm1776_vm15, %v2691_v38, %v2359_v43  ;;  %v2374_v27 = vsel %vm1794_vm9, %v2373_v1, %v2356_v62 }
 0x374   : > { %v4723_v44 = vsel %vm1796_vm10, %v2374_v27, %v2359_v43 }
 0x375   : > { %5452 = vst [vmem:[#allocation72_spill] sm:$0xff] %v4723_v44 }
 0x377   : > { %2565 = vrot.lane.b32.xlu1 %v4005_v2, %s5436_s21  ;;  %2562 = vrot.lane.b32.xlu0 %v3975_v34, %s5450_s25 }
 0x378   : > { %2559 = vrot.lane.b32.xlu2 %v3973_v22, %s3150_s5 }
 0x379   : > { %v2380_v33 = vpop.permute.xlu1 %2379  ;;  %v2377_v37 = vpop.permute.xlu0 %2376 }
 0x37a   : > { %v2401_v19 = vpop.permute.xlu2 %2400  ;;  %v2410_v62 = vsel %vm1770_vm12, %v2409_v10, %v2377_v37 }
 0x37b   : > { %v2411_v43 = vsel %vm1772_vm13, %v2410_v62, %v2380_v33 }
 0x37c   : > { %v2412_v38 = vsel %vm1774_vm14, %v2411_v43, %v4312_v4 }
 0x37d   : > { %v2413_v1 = vsel %vm1776_vm15, %v2412_v38, %v4292_v12 }
 0x37e   : > { %v2414_v27 = vsel %vm1778_vm8, %v2413_v1, %v2383_v60 }
 0x37f   : > { %2589 = vrot.lane.b32.xlu1 %v3957_v31, %s5453_s14  ;;  %2571 = vrot.lane.b32.xlu0 %v4005_v2, %s5435_s20 }
 0x380   : > { %2568 = vrot.lane.b32.xlu2 %v3994_v3, %s5393_s28 }
 0x381   : > { %v2389_v10 = vpop.permute.xlu1 %2388  ;;  %v2386_v37 = vpop.permute.xlu0 %2385 }
 0x382   : > { %v2425_v33 = vpop.permute.xlu2 %2424  ;;  %v2415_v62 = vsel %vm1780_vm2, %v2414_v27, %v2386_v37 }
 0x383   : > { %v2416_v43 = vsel %vm1782_vm1, %v2415_v62, %v2389_v10 }
 0x384   : > { %v2417_v38 = vsel %vm1784_vm3, %v2416_v43, %v3959_v13 }
 0x385   : > { %v2418_v60 = vsel %vm1786_vm4, %v2417_v38, %v2392_v53 }
 0x387   : > { %2598 = vrot.lane.b32.xlu1 %v3959_v13, %s3150_s5  ;;  %2595 = vrot.lane.b32.xlu0 %v3957_v31, %s5415_s24 }
 0x388   : > { %2592 = vrot.lane.b32.xlu2 %v3959_v13, %s5451_s3 }
 0x389   : > { %v2398_v1 = vpop.permute.xlu1 %2397  ;;  %v2395_v44 = vpop.permute.xlu0 %2394 }
 0x38a   : > { %v2434_v47 = vpop.permute.xlu2 %2433  ;;  %v2419_v27 = vsel %vm1788_vm5, %v2418_v60, %v2395_v44  ;;  %v2727_v10 = vsel %vm1768_vm11, %v2392_v53, %v2395_v44 }
 0x38b   : > { %v2420_v37 = vsel %vm1790_vm6, %v2419_v27, %v2398_v1  ;;  %v2728_v43 = vsel %vm1770_vm12, %v2727_v10, %v4442_v29 }
 0x38c   : > { %v2421_v62 = vsel %vm1792_vm7, %v2420_v37, %v2401_v19  ;;  %v2729_v53 = vsel %vm1772_vm13, %v2728_v43, %v4472_v41 }
 0x38f   : > { %2607 = vrot.lane.b32.xlu1 %v3975_v34, %s5393_s28  ;;  %2604 = vrot.lane.b32.xlu0 %v3973_v22, %s5444_s13 }
 0x390   : > { %2601 = vrot.lane.b32.xlu2 %v3973_v22, %s5442_s23  ;;  %v2460_v22 = vsel %vm1768_vm11, %v4360_v9, %v4340_v32 }
 0x391   : > { %v2407_v38 = vpop.permute.xlu1 %2406  ;;  %v2404_v44 = vpop.permute.xlu0 %2403  ;;  %v2461_v41 = vsel %vm1770_vm12, %v2460_v22, %v2425_v33 }
 0x392   : > { %v2443_v60 = vpop.permute.xlu2 %2442  ;;  %v2422_v19 = vsel %vm1794_vm9, %v2421_v62, %v2404_v44  ;;  %v2730_v1 = vsel %vm1774_vm14, %v2729_v53, %v2404_v44 }
 0x393   : > { %v4775_v29 = vsel %vm1776_vm15, %v2730_v1, %v2407_v38  ;;  %v4778_v27 = vsel %vm1796_vm10, %v2422_v19, %v2407_v38 }
 0x397   : > { %2631 = vrot.lane.b32.xlu1 %v3796_v18, %s5423_s30  ;;  %2628 = vrot.lane.b32.xlu0 %v3800_v39, %s5453_s14 }
 0x398   : > { %2625 = vrot.lane.b32.xlu2 %v3796_v18, %s5402_s17 }
 0x399   : > { %v2431_v10 = vpop.permute.xlu1 %2430  ;;  %v2428_v37 = vpop.permute.xlu0 %2427 }
 0x39a   : > { %v2452_v62 = vpop.permute.xlu2 %2451  ;;  %v2462_v43 = vsel %vm1772_vm13, %v2461_v41, %v2428_v37 }
 0x39b   : > { %v2463_v38 = vsel %vm1774_vm14, %v2462_v43, %v4352_v8 }
 0x39c   : > { %v2464_v53 = vsel %vm1776_vm15, %v2463_v38, %v4386_v16 }
 0x39d   : > { %v2465_v44 = vsel %vm1778_vm8, %v2464_v53, %v2431_v10 }
 0x39e   : > { %v2466_v19 = vsel %vm1780_vm2, %v2465_v44, %v2434_v47 }
 0x39f   : > { %2703 = vrot.lane.b32.xlu1 %v3994_v3, %s5412_s2  ;;  %2637 = vrot.lane.b32.xlu0 %v3957_v31, %s5447_s27 }
 0x3a0   : > { %2634 = vrot.lane.b32.xlu2 %v3800_v39, %s5415_s24 }
 0x3a1   : > { %v2440_v33 = vpop.permute.xlu1 %2439  ;;  %v2437_v1 = vpop.permute.xlu0 %2436 }
 0x3a2   : > { %v4803_v22 = vpop.permute.xlu2 %2475  ;;  %v2467_v41 = vsel %vm1782_vm1, %v2466_v19, %v2437_v1 }
 0x3a3   : > { %v2468_v37 = vsel %vm1784_vm3, %v2467_v41, %v2440_v33 }
 0x3a4   : > { %v2469_v10 = vsel %vm1786_vm4, %v2468_v37, %v2443_v60 }
 0x3a7   : > { %2712 = vrot.lane.b32.xlu1 %v4005_v2, %s5423_s30  ;;  %2709 = vrot.lane.b32.xlu0 %v3994_v3, %s5433_s29  ;;  %s2930_s29 = smul.u32 80, %s3182_s10 }
 0x3a8   : > { %2706 = vrot.lane.b32.xlu2 %v4005_v2, %s5402_s17 }
 0x3a9   : > { %v2449_v47 = vpop.permute.xlu1 %2448  ;;  %v2446_v43 = vpop.permute.xlu0 %2445  ;;  %s2814_s5 = scalar_lea.hbm %s5243_s1, %s2930_s29 }
 0x3aa   : > { %v4814_v38 = vpop.permute.xlu2 %2484  ;;  %v2470_v53 = vsel %vm1788_vm5, %v2469_v10, %v2446_v43  ;;  %v2091_v10 = vsel %vm1768_vm11, %v4384_v52, %v4364_v0  ;;  %s2818_s21 = sshll.u32 %s2814_s5, 4  ;;  %s2819_s21 = int_to_ptr.hbm [resolvable:$true] %s2818_s21 }
 0x3ab   : > { %v2471_v44 = vsel %vm1790_vm6, %v2470_v53, %v2449_v47  ;;  %v1845_v47 = vsel %vm1768_vm11, %v4014_v6, %v4112_v7  ;;  %v2092_v53 = vsel %vm1770_vm12, %v2091_v10, %v4398_v17 }
 0x3ac   : > { %v2472_v19 = vsel %vm1792_vm7, %v2471_v44, %v2452_v62  ;;  %v1968_v62 = vsel %vm1768_vm11, %v4232_v26, %v4266_v50  ;;  %v1846_v26 = vsel %vm1770_vm12, %v1845_v47, %v4146_v63  ;;  %v2093_v17 = vsel %vm1772_vm13, %v2092_v53, %v4396_v48  ;;  %v5455_v44 = vld [vmem:[#allocation44_spill] sm:$0xff]  ;;  %v5459_v48 = vld [vmem:[#allocation58_spill] sm:$0xff]  ;;  %v5461_v53 = vld [vmem:[#allocation61_spill] sm:$0xff] }
 0x3ad   : > { %v1969_v43 = vsel %vm1770_vm12, %v1968_v62, %v4264_v42  ;;  %v5454_v42 = vld [vmem:[#allocation22_spill] sm:$0xff] }
 0x3ae   : > { %v1970_v0 = vsel %vm1772_vm13, %v1969_v43, %v4244_v5  ;;  %v1847_v50 = vsel %vm1772_vm13, %v1846_v26, %v5454_v42  ;;  %v5458_v5 = vld [vmem:[#allocation24_spill] sm:$0xff]  ;;  %v5462_v42 = vld [vmem:[#allocation23_spill] sm:$0xff] }
 0x3af   : > { %2718 = vrot.lane.b32.xlu1 %v4016_v54, %s5447_s27  ;;  %2640 = vrot.lane.b32.xlu0 %v3959_v13, %s5442_s23  ;;  %v1971_v63 = vsel %vm1774_vm14, %v1970_v0, %v5455_v44  ;;  %v5463_v44 = vld [vmem:[#allocation46_spill] sm:$0xff] }
 0x3b0   : > { %2715 = vrot.lane.b32.xlu2 %v4014_v6, %s5449_s26 }
 0x3b1   : > { %v2458_v60 = vpop.permute.xlu1 %2457  ;;  %v2455_v33 = vpop.permute.xlu0 %2454 }
 0x3b2   : > { %v4825_v1 = vpop.permute.xlu2 %2493  ;;  %v2473_v41 = vsel %vm1794_vm9, %v2472_v19, %v2455_v33  ;;  %v2094_v19 = vsel %vm1774_vm14, %v2093_v17, %v3957_v31 }
 0x3b3   : > { %v4829_v37 = vsel %vm1796_vm10, %v2473_v41, %v2458_v60  ;;  %v5456_v60 = vld [vmem:[#allocation19_spill] sm:$0xff]  ;;  %v2095_v47 = vsel %vm1776_vm15, %v2094_v19, %v5459_v48 }
 0x3b4   : > { %v1848_v33 = vsel %vm1774_vm14, %v1847_v50, %v5456_v60  ;;  %v5457_v41 = vld [vmem:[#allocation43_spill] sm:$0xff]  ;;  %v2096_v26 = vsel %vm1778_vm8, %v2095_v47, %v5461_v53  ;;  %v5464_v60 = vld [vmem:[#allocation60_spill] sm:$0xff] }
 0x3b5   : > { %v1972_v62 = vsel %vm1776_vm15, %v1971_v63, %v5457_v41  ;;  %v1849_v10 = vsel %vm1776_vm15, %v1848_v33, %v5458_v5  ;;  %v2097_v33 = vsel %vm1780_vm2, %v2096_v26, %v5464_v60  ;;  %v5465_v41 = vld [vmem:[#allocation21_spill] sm:$0xff]  ;;  %v5466_v47 = vld [vmem:[#allocation28_spill] sm:$0xff]  ;;  %v5468_v53 = vld [vmem:[#allocation59_spill] sm:$0xff] }
 0x3b6   : > { %v1850_v50 = vsel %vm1778_vm8, %v1849_v10, %v5462_v42  ;;  %v5469_v42 = vld [vmem:[#allocation63_spill] sm:$0xff]  ;;  %v2098_v26 = vsel %vm1782_vm1, %v2097_v33, %v4388_v55  ;;  %v5471_v60 = vld [vmem:[#allocation25_spill] sm:$0xff] }
 0x3b7   : > { %2646 = vrot.lane.b32.xlu1 %v3959_v13, %s5444_s13  ;;  %2721 = vrot.lane.b32.xlu0 %v4014_v6, %s5450_s25  ;;  %s3065_s13 = scalar_lea.hbm %s5243_s1, 160 }
 0x3b8   : > { %2643 = vrot.lane.b32.xlu2 %v3957_v31, %s5426_s22  ;;  %v5460_v31 = vld [vmem:[#allocation42_spill] sm:$0xff] }
 0x3b9   : > { %v4852_v52 = vpop.permute.xlu1 %2481  ;;  %v4854_v7 = vpop.permute.xlu0 %2478  ;;  %v1973_v43 = vsel %vm1778_vm8, %v1972_v62, %v5460_v31  ;;  %v1851_v62 = vsel %vm1780_vm2, %v1850_v50, %v5465_v41  ;;  %v5467_v31 = vld [vmem:[#allocation70_spill] sm:$0xff]  ;;  %v5472_v41 = vld [vmem:[#allocation17_spill] sm:$0xff] }
 0x3ba   : > { %v2518_v13 = vpop.permute.xlu2 %2517  ;;  %v1974_v63 = vsel %vm1780_vm2, %v1973_v43, %v5463_v44  ;;  %v1852_v48 = vsel %vm1782_vm1, %v1851_v62, %v4170_v21  ;;  %v2543_v10 = vsel %vm1778_vm8, %v5467_v31, %v5466_v47  ;;  %v2499_v43 = vsel %vm1768_vm11, %v5469_v42, %v5468_v53  ;;  %v5470_v50 = vld [vmem:[#allocation26_spill] sm:$0xff] }
 0x3bb   : > { %v1975_v5 = vsel %vm1782_vm1, %v1974_v63, %v4288_v23  ;;  %v2099_v23 = vsel %vm1784_vm3, %v2098_v26, %v4422_v59  ;;  %v1853_v44 = vsel %vm1784_vm3, %v1852_v48, %v5470_v50  ;;  %v2544_v33 = vsel %vm1780_vm2, %v2543_v10, %v5471_v60  ;;  %v5473_v10 = vld [vmem:[#allocation16_spill] sm:$0xff]  ;;  %v5477_v50 = vld [vmem:[#allocation62_spill] sm:$0xff] }
 0x3bc   : > { %v1976_v21 = vsel %vm1784_vm3, %v1975_v5, %v4268_v25  ;;  %v2500_v25 = vsel %vm1770_vm12, %v2499_v43, %v5472_v41 }
 0x3bd   : > { %v1977_v55 = vsel %vm1786_vm4, %v1976_v21, %v4302_v49  ;;  %v1854_v49 = vsel %vm1786_vm4, %v1853_v44, %v4148_v28  ;;  %v2501_v43 = vsel %vm1772_vm13, %v2500_v25, %v5473_v10  ;;  %v5474_v21 = vld [vmem:[#allocation45_spill] sm:$0xff]  ;;  %v5478_v44 = vld [vmem:[#allocation66_spill] sm:$0xff]  ;;  %v5479_v25 = vld [vmem:[#allocation64_spill] sm:$0xff] }
 0x3be   : > { %v1978_v48 = vsel %vm1788_vm5, %v1977_v55, %v4300_v57  ;;  %v1855_v31 = vsel %vm1788_vm5, %v1854_v49, %v4182_v30  ;;  %v5476_v30 = vld [vmem:[#allocation48_spill] sm:$0xff] }
 0x3bf   : > { %2667 = vrot.lane.b32.xlu1 %v4016_v54, %s5453_s14  ;;  %2664 = vrot.lane.b32.xlu0 %v4014_v6, %s5402_s17  ;;  %v1856_v28 = vsel %vm1790_vm6, %v1855_v31, %v5466_v47  ;;  %s2929_s17 = smul.u32 80, %s3247_s16 }
 0x3c0   : > { %2724 = vrot.lane.b32.xlu2 %v4016_v54, %s5426_s22  ;;  %v1857_v49 = vsel %vm1792_vm7, %v1856_v28, %v5471_v60  ;;  %v5481_v28 = vld [vmem:[#allocation15_spill] sm:$0xff] }
 0x3c1   : > { %v4884_v0 = vpop.permute.xlu1 %2490  ;;  %v4886_v17 = vpop.permute.xlu0 %2487  ;;  %s5139_s28 = scalar_lea.vmem [#allocation5], %s2929_s17 }
 0x3c2   : > { %v2527_v19 = vpop.permute.xlu2 %2526  ;;  %s2816_s20 = sshll.u32 %s5139_s28, 4  ;;  %s2817_s20 = int_to_ptr.vmem [resolvable:$true] %s2816_s20 }
 0x3c7   : > { %2676 = vrot.lane.b32.xlu1 %v3796_v18, %s5449_s26  ;;  %2673 = vrot.lane.b32.xlu0 %v4016_v54, %s5415_s24  ;;  %s2803_s24 = scalar_lea.sflag [#allocation4], %s3247_s16 }
 0x3c8   : > { %2670 = vrot.lane.b32.xlu2 %v4014_v6, %s5423_s30  ;;  %v2100_v6 = vsel %vm1786_vm4, %v2099_v23, %v5469_v42  ;;  %v1979_v42 = vsel %vm1790_vm6, %v1978_v48, %v5474_v21  ;;  %v5475_v23 = vld [vmem:[#allocation65_spill] sm:$0xff] }
 0x3c9   : > { %v2515_v63 = vpop.permute.xlu1 %2514  ;;  %v4924_v54 = vpop.permute.xlu0 %2496  ;;  %v2101_v26 = vsel %vm1788_vm5, %v2100_v6, %v5468_v53  ;;  %v1980_v57 = vsel %vm1792_vm7, %v1979_v42, %v5476_v30  ;;  %v2502_v53 = vsel %vm1774_vm14, %v2501_v43, %v5477_v50  ;;  %v5480_v43 = vld [vmem:[#allocation18_spill] sm:$0xff] }
 0x3ca   : > { %v2545_v59 = vsel %vm1782_vm1, %v2544_v33, %v2515_v63  ;;  %v2536_v62 = vpop.permute.xlu2 %2535  ;;  %v2503_v55 = vsel %vm1776_vm15, %v2502_v53, %v5478_v44  ;;  %v1981_v31 = vsel %vm1794_vm9, %v1980_v57, %v4312_v4 }
 0x3cb   : > { %v2546_v5 = vsel %vm1784_vm3, %v2545_v59, %v2518_v13  ;;  %v2102_v13 = vsel %vm1790_vm6, %v2101_v26, %v5475_v23  ;;  %v2504_v26 = vsel %vm1778_vm8, %v2503_v55, %v5480_v43 }
 0x3cc   : > { %v2103_v59 = vsel %vm1792_vm7, %v2102_v13, %v5479_v25  ;;  %v2505_v4 = vsel %vm1780_vm2, %v2504_v26, %v5481_v28 }
 0x3cd   : > { %v2104_v13 = vsel %vm1794_vm9, %v2103_v59, %v5477_v50 }
 0x3ce   : > { %v2105_v60 = vsel %vm1796_vm10, %v2104_v13, %v5478_v44 }
 0x3cf   : > { %2685 = vrot.lane.b32.xlu1 %v3800_v39, %s5426_s22  ;;  %2682 = vrot.lane.b32.xlu0 %v3796_v18, %s5450_s25 }
 0x3d0   : > { %2679 = vrot.lane.b32.xlu2 %v3800_v39, %s5447_s27  ;;  %v1858_v39 = vsel %vm1794_vm9, %v1857_v49, %v4194_v24  ;;  %v5483_v49 = vld [vmem:[#allocation35_spill] sm:$0xff] }
 0x3d1   : > { %v2524_v63 = vpop.permute.xlu1 %2523  ;;  %v2521_v33 = vpop.permute.xlu0 %2520  ;;  %v1859_v24 = vsel %vm1796_vm10, %v1858_v39, %v4192_v14 }
 0x3d2   : > { %v2560_v6 = vpop.permute.xlu2 %2559  ;;  %v2547_v47 = vsel %vm1786_vm4, %v2546_v5, %v2521_v33  ;;  %v1982_v5 = vsel %vm1796_vm10, %v1981_v31, %v4292_v12  ;;  %v5482_v33 = vld [vmem:[#allocation38_spill] sm:$0xff] }
 0x3d3   : > { %v2548_v48 = vsel %vm1788_vm5, %v2547_v47, %v2524_v63 }
 0x3d4   : > { %v2549_v42 = vsel %vm1790_vm6, %v2548_v48, %v2527_v19  ;;  %v2506_v19 = vsel %vm1782_vm1, %v2505_v4, %v4803_v22  ;;  %v2579_v22 = vsel %vm1778_vm8, %v4570_v15, %v5482_v33 }
 0x3d5   : > { %v2507_v12 = vsel %vm1784_vm3, %v2506_v19, %v4854_v7  ;;  %v2580_v15 = vsel %vm1780_vm2, %v2579_v22, %v5483_v49 }
 0x3d6   : > { %v2508_v14 = vsel %vm1786_vm4, %v2507_v12, %v4852_v52 }
 0x3d7   : > { %2747 = vrot.lane.b32.xlu0 %v1982_v5, %s5426_s22  ;;  %2751 = vrot.lane.b32.xlu1 %v2105_v60, %s5426_s22  ;;  %v2509_v7 = vsel %vm1788_vm5, %v2508_v14, %v4814_v38 }
 0x3d8   : > { %2743 = vrot.lane.b32.xlu2 %v1859_v24, %s5426_s22  ;;  %v2510_v59 = vsel %vm1790_vm6, %v2509_v7, %v4886_v17 }
 0x3d9   : > { %v2533_v57 = vpop.permute.xlu1 %2532  ;;  %v2530_v50 = vpop.permute.xlu0 %2529  ;;  %v2511_v38 = vsel %vm1792_vm7, %v2510_v59, %v4884_v0 }
 0x3da   : > { %v2569_v53 = vpop.permute.xlu2 %2568  ;;  %v2550_v44 = vsel %vm1792_vm7, %v2549_v42, %v2530_v50 }
 0x3db   : > { %v2551_v55 = vsel %vm1794_vm9, %v2550_v44, %v2533_v57 }
 0x3dc   : > { %v4995_v63 = vsel %vm1796_vm10, %v2551_v55, %v2536_v62 }
 0x3df   : > { %2759 = vrot.lane.b32.xlu0 %v4675_v46, %s5426_s22  ;;  %2763 = vrot.lane.b32.xlu1 %v4778_v27, %s5426_s22  ;;  %v2512_v27 = vsel %vm1794_vm9, %v2511_v38, %v4825_v1  ;;  %v2615_v1 = vsel %vm1778_vm8, %v4624_v35, %v5474_v21  ;;  %v5484_v38 = vld [vmem:[#allocation8_spill] sm:$0xff] }
 0x3e0   : > { %2755 = vrot.lane.b32.xlu2 %v4567_v11, %s5426_s22  ;;  %v2513_v17 = vsel %vm1796_vm10, %v2512_v27, %v4924_v54  ;;  %v2616_v54 = vsel %vm1780_vm2, %v2615_v1, %v5476_v30 }
 0x3e1   : > { %v2557_v52 = vpop.permute.xlu1 %2556  ;;  %v2554_v62 = vpop.permute.xlu0 %2553 }
 0x3e2   : > { %v2593_v47 = vpop.permute.xlu2 %2592  ;;  %v2581_v46 = vsel %vm1782_vm1, %v2580_v15, %v2554_v62 }
 0x3e3   : > { %v2582_v48 = vsel %vm1784_vm3, %v2581_v46, %v2557_v52  ;;  %v1769_v46 = vsel %vm1768_vm11, %v3796_v18, %v5484_v38  ;;  %v5490_v18 = vld [vmem:[#allocation68_spill] sm:$0xff] }
 0x3e4   : > { %v2583_v31 = vsel %vm1786_vm4, %v2582_v48, %v2560_v6  ;;  %v5485_v48 = vld [vmem:[#allocation12_spill] sm:$0xff] }
 0x3e8   : > { %2767 = vrot.lane.b32.xlu2 %v2513_v17, %s5426_s22  ;;  %v5486_v17 = vld [vmem:[#allocation11_spill] sm:$0xff] }
 0x3e9   : > { %v2566_v11 = vpop.permute.xlu1 %2565  ;;  %v2563_v39 = vpop.permute.xlu0 %2562 }
 0x3ea   : > { %v2602_v26 = vpop.permute.xlu2 %2601  ;;  %v2584_v42 = vsel %vm1788_vm5, %v2583_v31, %v2563_v39  ;;  %v5487_v31 = vld [vmem:[#allocation9_spill] sm:$0xff] }
 0x3eb   : > { %v2585_v0 = vsel %vm1790_vm6, %v2584_v42, %v3994_v3 }
 0x3ec   : > { %v2586_v13 = vsel %vm1792_vm7, %v2585_v0, %v2566_v11 }
 0x3ed   : > { %v2587_v60 = vsel %vm1794_vm9, %v2586_v13, %v2569_v53  ;;  %v5489_v13 = vld [vmem:[#allocation14_spill] sm:$0xff] }
 0x3f1   : > { %v2590_v5 = vpop.permute.xlu1 %2589  ;;  %v2572_v6 = vpop.permute.xlu0 %2571 }
 0x3f2   : > { %v2617_v4 = vsel %vm1782_vm1, %v2616_v54, %v2590_v5  ;;  %v2626_v24 = vpop.permute.xlu2 %2625  ;;  %v2588_v19 = vsel %vm1796_vm10, %v2587_v60, %v2572_v6  ;;  %v2732_v54 = vsel %vm1778_vm8, %v4775_v29, %v5490_v18  ;;  %v5491_v6 = vld [vmem:[#allocation56_spill] sm:$0xff] }
 0x3f3   : > { %2771 = vrot.lane.b32.xlu0 %v2588_v19, %s5426_s22  ;;  %v2618_v3 = vsel %vm1784_vm3, %v2617_v4, %v2593_v47  ;;  %v5492_v19 = vld [vmem:[#allocation13_spill] sm:$0xff] }
 0x3f9   : > { %v2599_v12 = vpop.permute.xlu1 %2598  ;;  %v2596_v35 = vpop.permute.xlu0 %2595 }
 0x3fa   : > { %v2635_v21 = vpop.permute.xlu2 %2634  ;;  %v2619_v57 = vsel %vm1786_vm4, %v2618_v3, %v2596_v35  ;;  %v5493_v35 = vld [vmem:[#allocation67_spill] sm:$0xff] }
 0x3fb   : > { %v2620_v50 = vsel %vm1788_vm5, %v2619_v57, %v2599_v12 }
 0x3fc   : > { %v2621_v30 = vsel %vm1790_vm6, %v2620_v50, %v2602_v26  ;;  %v5488_v26 = vld [vmem:[#allocation57_spill] sm:$0xff] }
 0x3fd   : > { %v2622_v44 = vsel %vm1792_vm7, %v2621_v30, %v3975_v34  ;;  %v1771_v34 = vsel %vm1770_vm12, %v1769_v46, %v5485_v48  ;;  %v2654_v42 = vsel %vm1778_vm8, %v4678_v36, %v5488_v26  ;;  %v2733_v36 = vsel %vm1780_vm2, %v2732_v54, %v5493_v35  ;;  %v5494_v30 = vld [vmem:[#allocation10_spill] sm:$0xff]  ;;  %v5499_v54 = vld [vmem:[#allocation47_spill] sm:$0xff] }
 0x3fe   : > { %v1773_v11 = vsel %vm1772_vm13, %v1771_v34, %v5486_v17  ;;  %v2655_v4 = vsel %vm1780_vm2, %v2654_v42, %v5491_v6 }
 0x3ff   : > { %v1775_v39 = vsel %vm1774_vm14, %v1773_v11, %v5487_v31  ;;  %v2656_v12 = vsel %vm1782_vm1, %v2655_v4, %v2626_v24  ;;  %v5495_v11 = vld [vmem:[#allocation27_spill] sm:$0xff]  ;;  %v5496_v31 = vld [vmem:[#allocation50_spill] sm:$0xff] }
 0x400   : > { %v1777_v5 = vsel %vm1776_vm15, %v1775_v39, %v5489_v13 }
 0x401   : > { %v2608_v53 = vpop.permute.xlu1 %2607  ;;  %v2605_v55 = vpop.permute.xlu0 %2604  ;;  %v1779_v3 = vsel %vm1778_vm8, %v1777_v5, %v5492_v19 }
 0x402   : > { %v2707_v14 = vpop.permute.xlu2 %2706  ;;  %v2623_v22 = vsel %vm1794_vm9, %v2622_v44, %v2605_v55 }
 0x403   : > { %v5043_v7 = vsel %vm1796_vm10, %v2623_v22, %v2608_v53  ;;  %v1781_v53 = vsel %vm1780_vm2, %v1779_v3, %v5494_v30  ;;  %v5501_v3 = vld [vmem:[#allocation53_spill] sm:$0xff] }
 0x404   : > { %v1783_v29 = vsel %vm1782_vm1, %v1781_v53, %v5472_v41  ;;  %v5504_v53 = vld [vmem:[#allocation34_spill] sm:$0xff] }
 0x409   : > { %v2632_v59 = vpop.permute.xlu1 %2631  ;;  %v2629_v52 = vpop.permute.xlu0 %2628 }
 0x40a   : > { %v2716_v62 = vpop.permute.xlu2 %2715  ;;  %v2657_v57 = vsel %vm1784_vm3, %v2656_v12, %v2629_v52  ;;  %v1785_v52 = vsel %vm1784_vm3, %v1783_v29, %v5473_v10  ;;  %v1905_v10 = vsel %vm1768_vm11, %v5495_v11, %v4005_v2  ;;  %v5510_v11 = vld [vmem:[#allocation54_spill] sm:$0xff] }
 0x40b   : > { %v2658_v44 = vsel %vm1786_vm4, %v2657_v57, %v2632_v59  ;;  %v1787_v59 = vsel %vm1786_vm4, %v1785_v52, %v4088_v45 }
 0x411   : > { %v2704_v47 = vpop.permute.xlu1 %2703  ;;  %v2638_v15 = vpop.permute.xlu0 %2637 }
 0x412   : > { %v2644_v27 = vpop.permute.xlu2 %2643  ;;  %v2734_v50 = vsel %vm1782_vm1, %v2733_v36, %v2704_v47  ;;  %v2659_v47 = vsel %vm1788_vm5, %v2658_v44, %v2635_v21  ;;  %v5497_v21 = vld [vmem:[#allocation51_spill] sm:$0xff]  ;;  %v5502_v36 = vld [vmem:[#allocation29_spill] sm:$0xff] }
 0x413   : > { %v2735_v55 = vsel %vm1784_vm3, %v2734_v50, %v2707_v14  ;;  %v2660_v48 = vsel %vm1790_vm6, %v2659_v47, %v2638_v15  ;;  %v1789_v14 = vsel %vm1788_vm5, %v1787_v59, %v4122_v56  ;;  %v2031_v15 = vsel %vm1768_vm11, %v5497_v21, %v5496_v31  ;;  %v5503_v50 = vld [vmem:[#allocation52_spill] sm:$0xff]  ;;  %v5511_v31 = vld [vmem:[#allocation37_spill] sm:$0xff] }
 0x414   : > { %v1791_v2 = vsel %vm1790_vm6, %v1789_v14, %v5480_v43  ;;  %v2032_v4 = vsel %vm1770_vm12, %v2031_v15, %v5499_v54  ;;  %v2693_v43 = vsel %vm1778_vm8, %v4719_v40, %v5475_v23  ;;  %v5509_v14 = vld [vmem:[#allocation30_spill] sm:$0xff] }
 0x415   : > { %v2033_v12 = vsel %vm1772_vm13, %v2032_v4, %v5501_v3  ;;  %v1793_v35 = vsel %vm1792_vm7, %v1791_v2, %v5481_v28  ;;  %v2694_v28 = vsel %vm1780_vm2, %v2693_v43, %v5479_v25  ;;  %v5514_v4 = vld [vmem:[#allocation39_spill] sm:$0xff] }
 0x416   : > { %v2034_v30 = vsel %vm1774_vm14, %v2033_v12, %v5503_v50  ;;  %v5516_v50 = vld [vmem:[#allocation40_spill] sm:$0xff] }
 0x419   : > { %v2713_v0 = vpop.permute.xlu1 %2712  ;;  %v2710_v1 = vpop.permute.xlu0 %2709 }
 0x41a   : > { %v2725_v60 = vpop.permute.xlu2 %2724  ;;  %v2736_v24 = vsel %vm1786_vm4, %v2735_v55, %v2710_v1  ;;  %v5498_v1 = vld [vmem:[#allocation32_spill] sm:$0xff] }
 0x41b   : > { %v2737_v34 = vsel %vm1788_vm5, %v2736_v24, %v2713_v0  ;;  %v1906_v56 = vsel %vm1770_vm12, %v1905_v10, %v5498_v1  ;;  %v5512_v1 = vld [vmem:[#allocation36_spill] sm:$0xff] }
 0x41c   : > { %v2738_v17 = vsel %vm1790_vm6, %v2737_v34, %v2716_v62 }
 0x421   : > { %v2719_v22 = vpop.permute.xlu1 %2718  ;;  %v2641_v38 = vpop.permute.xlu0 %2640 }
 0x422   : > { %v2671_v46 = vpop.permute.xlu2 %2670  ;;  %v2661_v41 = vsel %vm1792_vm7, %v2660_v48, %v2641_v38  ;;  %v2739_v39 = vsel %vm1792_vm7, %v2738_v17, %v2719_v22  ;;  %v5505_v22 = vld [vmem:[#allocation20_spill] sm:$0xff]  ;;  %v5506_v38 = vld [vmem:[#allocation49_spill] sm:$0xff] }
 0x423   : > { %v2662_v0 = vsel %vm1794_vm9, %v2661_v41, %v2644_v27  ;;  %v5500_v27 = vld [vmem:[#allocation31_spill] sm:$0xff]  ;;  %v2035_v24 = vsel %vm1776_vm15, %v2034_v30, %v5506_v38  ;;  %v5507_v48 = vld [vmem:[#allocation33_spill] sm:$0xff] }
 0x424   : > { %v1907_v19 = vsel %vm1772_vm13, %v1906_v56, %v5500_v27  ;;  %v5508_v41 = vld [vmem:[#allocation55_spill] sm:$0xff] }
 0x425   : > { %v1908_v57 = vsel %vm1774_vm14, %v1907_v19, %v5502_v36  ;;  %v2036_v25 = vsel %vm1778_vm8, %v2035_v24, %v5508_v41 }
 0x426   : > { %v1909_v29 = vsel %vm1776_vm15, %v1908_v57, %v5504_v53  ;;  %v2037_v10 = vsel %vm1780_vm2, %v2036_v25, %v5510_v11 }
 0x427   : > { %v1910_v34 = vsel %vm1778_vm8, %v1909_v29, %v5507_v48 }
 0x428   : > { %v1911_v17 = vsel %vm1780_vm2, %v1910_v34, %v5509_v14 }
 0x429   : > { %v2647_v42 = vpop.permute.xlu1 %2646  ;;  %v2722_v45 = vpop.permute.xlu0 %2721  ;;  %v1912_v21 = vsel %vm1782_vm1, %v1911_v17, %v5511_v31 }
 0x42a   : > { %v2663_v62 = vsel %vm1796_vm10, %v2662_v0, %v2647_v42  ;;  %v2680_v13 = vpop.permute.xlu2 %2679  ;;  %v2740_v5 = vsel %vm1794_vm9, %v2739_v39, %v2722_v45  ;;  %v2038_v42 = vsel %vm1782_vm1, %v2037_v10, %v4328_v61 }
 0x42b   : > { %2783 = vrot.lane.b32.xlu1 %v2663_v62, %s5426_s22  ;;  %v2741_v18 = vsel %vm1796_vm10, %v2740_v5, %v2725_v60  ;;  %v1795_v60 = vsel %vm1794_vm9, %v1793_v35, %v4134_v20  ;;  %v2039_v56 = vsel %vm1784_vm3, %v2038_v42, %v4362_v51  ;;  %v5513_v62 = vld [vmem:[#allocation69_spill] sm:$0xff] }
 0x42c   : > { %2787 = vrot.lane.b32.xlu2 %v2741_v18, %s5426_s22  ;;  %v1797_v40 = vsel %vm1796_vm10, %v1795_v60, %v5505_v22  ;;  %v2040_v54 = vsel %vm1786_vm4, %v2039_v56, %v4360_v9  ;;  %v5515_v60 = vld [vmem:[#allocation41_spill] sm:$0xff]  ;;  %s3059_s22 = sshra.s32 %s2819_s21, 4  ;;  %s3060_s22 = int_to_ptr.hbm [resolvable:$true] %s3059_s22 }
 0x42d   : > { %v2041_v51 = vsel %vm1788_vm5, %v2040_v54, %v4340_v32  ;;  %s3061_s23 = scalar_lea.hbm %s3060_s22, 80  ;;  %p3066_p0 = scmp.lt.s32.totalorder %s3060_s22, %s5243_s1 }
 0x42e   : > { %p3062_p6 = scmp.ne.s32.totalorder %s3060_s22, %s3061_s23  ;;  %p3067_p1 = scmp.lt.s32.totalorder %s3065_s13, %s3061_s23 }
 0x430   : > { %p3063_p9 = pnand %p3062_p6, %p3211_p11  ;;  %p3068_p3 = por %p3067_p1, %p3066_p0 }
 0x431   : > { %v2668_v44 = vpop.permute.xlu1 %2667  ;;  %v2665_v55 = vpop.permute.xlu0 %2664 }
 0x432   : > { %v2744_v23 = vpop.permute.xlu2 %2743  ;;  %v2695_v20 = vsel %vm1782_vm1, %v2694_v28, %v2665_v55  ;;  %v5518_v28 = vld [vmem:[#allocation71_spill] sm:$0xff]  ;;  %p3064_p13 = pneg %p3063_p9 }
 0x433   : > { %v2774_v52 = vsel %vm164_vm0, %v1797_v40, %v2744_v23  ;;  %v2696_v47 = vsel %vm1784_vm3, %v2695_v20, %v2668_v44  ;;  %v5517_v44 = vld [vmem:[#allocation72_spill] sm:$0xff] }
 0x434   : > { %2792 = vst [vmem:[%s5139_s28] sm:$0xff] %v2774_v52  ;;  %v2697_v59 = vsel %vm1786_vm4, %v2696_v47, %v2671_v46  ;;  %v1913_v46 = vsel %vm1784_vm3, %v1912_v21, %v5512_v1  ;;  %p3069_p4 = pnand %p3068_p3, %p3064_p13 }
 0x435   : > { %v1914_v61 = vsel %vm1786_vm4, %v1913_v46, %v4208_v58 }
 0x436   : > { %v1915_v27 = vsel %vm1788_vm5, %v1914_v61, %v5514_v4 }
 0x437   : > { %v1916_v12 = vsel %vm1790_vm6, %v1915_v27, %v5482_v33 }
 0x438   : > { %v1917_v32 = vsel %vm1792_vm7, %v1916_v12, %v5483_v49 }
 0x439   : > { %v2677_v15 = vpop.permute.xlu1 %2676  ;;  %v2674_v39 = vpop.permute.xlu0 %2673 }
 0x43a   : > { %v2756_v0 = vpop.permute.xlu2 %2755  ;;  %v2698_v45 = vsel %vm1788_vm5, %v2697_v59, %v2674_v39 }
 0x43b   : > { %v2777_v5 = vsel %vm164_vm0, %v5513_v62, %v2756_v0  ;;  %v2699_v2 = vsel %vm1790_vm6, %v2698_v45, %v2677_v15 }
 0x43c   : > { %2795 = vst [vmem:[%s5139_s28 + $0x18] sm:$0xff] %v2777_v5  ;;  %v2700_v18 = vsel %vm1792_vm7, %v2699_v2, %v2680_v13  ;;  %v2042_v13 = vsel %vm1790_vm6, %v2041_v51, %v5488_v26  ;;  %v1918_v26 = vsel %vm1794_vm9, %v1917_v32, %v5515_v60 }
 0x43d   : > { %v2043_v33 = vsel %vm1792_vm7, %v2042_v13, %v5491_v6  ;;  %v1919_v30 = vsel %vm1796_vm10, %v1918_v26, %v5516_v50 }
 0x43e   : > { %v2044_v36 = vsel %vm1794_vm9, %v2043_v33, %v4352_v8 }
 0x441   : > { %v2686_v19 = vpop.permute.xlu1 %2685  ;;  %v2683_v3 = vpop.permute.xlu0 %2682 }
 0x442   : > { %v2768_v35 = vpop.permute.xlu2 %2767  ;;  %v2701_v58 = vsel %vm1794_vm9, %v2700_v18, %v2683_v3 }
 0x443   : > { %v2780_v9 = vsel %vm164_vm0, %v4829_v37, %v2768_v35  ;;  %v2702_v43 = vsel %vm1796_vm10, %v2701_v58, %v2686_v19  ;;  %v2045_v37 = vsel %vm1796_vm10, %v2044_v36, %v4386_v16 }
 0x444   : > { %2798 = vst [vmem:[%s5139_s28 + $0x30] sm:$0xff] %v2780_v9 }
 0x449   : > { %v2752_v57 = vpop.permute.xlu1 %2751  ;;  %v2748_v49 = vpop.permute.xlu0 %2747 }
 0x44a   : > { %v2776_v53 = vsel %vm164_vm0, %v2045_v37, %v2752_v57  ;;  %v2775_v6 = vsel %vm164_vm0, %v1919_v30, %v2748_v49 }
 0x44b   : > { %2794 = vst [vmem:[%s5139_s28 + $0x10] sm:$0xff] %v2776_v53 }
 0x44c   : > { %2793 = vst [vmem:[%s5139_s28 + $0x8] sm:$0xff] %v2775_v6 }
 0x451   : > { %v2764_v29 = vpop.permute.xlu1 %2763  ;;  %v2760_v8 = vpop.permute.xlu0 %2759 }
 0x452   : > { %v2779_v16 = vsel %vm164_vm0, %v5517_v44, %v2764_v29  ;;  %v2778_v55 = vsel %vm164_vm0, %v5518_v28, %v2760_v8 }
 0x453   : > { %2797 = vst [vmem:[%s5139_s28 + $0x28] sm:$0xff] %v2779_v16 }
 0x454   : > { %2796 = vst [vmem:[%s5139_s28 + $0x20] sm:$0xff] %v2778_v55 }
 0x465   : > { %v2772_v22 = vpop.permute.xlu0 %2771 }
 0x466   : > { %v2781_v40 = vsel %vm164_vm0, %v4995_v63, %v2772_v22 }
 0x467   : > { %2799 = vst [vmem:[%s5139_s28 + $0x38] sm:$0xff] %v2781_v40 }
 0x486   : > { %v2788_v23 = vpop.permute.xlu2 %2787 }
 0x487   : > { %v2791_v20 = vsel %vm164_vm0, %v2702_v43, %v2788_v23 }
 0x488   : > { %2801 = vst [vmem:[%s5139_s28 + $0x48] sm:$0xff] %v2791_v20 }
 0x49d   : > { %v2784_v38 = vpop.permute.xlu1 %2783 }
 0x49e   : > { %v2790_v24 = vsel %vm164_vm0, %v5043_v7, %v2784_v38 }
 0x49f   : > { %2800 = vst [vmem:[%s5139_s28 + $0x40] sm:$0xff] %v2790_v24 }
 0x4a0   : > { %3072 = shalt.err (!%p3069_p4)
}
 0x4a1   : > { %2933 = dma.vmem_to_hbm [thread:$0]  (%p3211_p11), %s2817_s20, 1280, %s2819_s21, %s2803_s24  }
 0x4a2 PF: > { %s2830_s16 = sand.u32 1, %s3099_s6   ;;  %p5519_p7 = scmp.ge.s32.totalorder %s3111_s9, 2 }
 0x4a3   : > { %s2831_s26 = scalar_lea.sflag [#allocation4], %s2830_s16 }
 0x4a4   : > { %p2940_p5 = pnand %p5519_p7, %p3215_p12 }
 0x4a6   : > { %p2941_p8 = pneg %p2940_p5 }
 0x4a8   : > { %3094 = dma.done.wait (%p2941_p8), %s2831_s26, 1280  }
 0x4a9   : > { %3096 = vsyncadd (%p2941_p8), %s2831_s26, 4294966016  ;;  %p14_p10 = scmp.ge.s32.totalorder %s3186_s12, 4   ;;  %s5520_s6 = smov %s3103_s7 }
 0x4aa   : > { %s5521_s7 = smov %s3107_s8  ;;  %s5522_s8 = smov %s3198_s15 }
 0x4ab   : > { %s5523_s9 = smov %s3186_s12  ;;  %16 = sbr.rel (!%p14_p10) target bundleno = 5 (0x5), region = 69 }
 0x4b0   :  { %2837 = vsyncpa [#allocation3], 1 }
 0x4b1   :  { %2839 = vsyncpa [#allocation3 + $0x1], 1 }
 0x4b2   :  { %2840 = vsyncpa [#allocation4], 1 }
 0x4b3   :  { %2842 = vsyncpa [#allocation4 + $0x1], 1 }

</bundles_post_ra>
